<compile_context>
chip_gen: v7x
topology: tpu7x:2x2x1
jax: 0.10.0
libtpu: 0.0.40
codegen_flags: <defaults>
</compile_context>

<pallas_src>
import functools

import jax
import jax.numpy as jnp
from jax import lax
from jax.experimental import pallas as pl
from jax.experimental.pallas import tpu as pltpu


_VMEM_LIMIT_BYTES = 40 * 1024 * 1024   # < 64 MiB physical on v7x, ample headroom


# ----------------------------- Pallas kernels ------------------------------


def _conv_pair_kernel(a_ref, b_ref, w1_ref, b1_ref, w2_ref, b2_ref,
                      x_ref, psum_ref, xs_ref, c1p_ref, *, TH, W, C, HT):
    """Fused conv1(3x3)+ReLU -> conv2(3x3) for one TH-row output tile.

    a_ref : (TH,   W+4, C) f32  rows [i*TH, i*TH+TH)     of pad-2 input
    b_ref : (4,    W+4, C) f32  rows [i*TH+TH, i*TH+TH+4) of pad-2 input (halo)
    w1_ref/w2_ref : (3, 3C, C) bf16  per-ky slabs, row index = kx*C + cin
    b1_ref/b2_ref : (1, C) f32
    x_ref : (TH, W, C) bf16  conv2 output tile
    psum_ref : (1, 1, C) f32 per-tile channel sums of conv2 (for the SE pool)
    xs_ref  : (TH+4, W+4, C) f32 scratch (assembled halo tile)
    c1p_ref : (TH+2, W+2, C) f32 scratch (zero-padded ReLU(conv1) for conv2)
    """
    i = pl.program_id(0)
    R1 = TH + 2

    # Assemble the (TH+4)-row halo tile of the pad-2 padded input.
    xs_ref[0:TH] = a_ref[...]
    xs_ref[TH:TH + 4] = b_ref[...]

    # ---- conv1 (3x3, pad 1) + bias + ReLU, packed horizontal taps (K=3C) ----
    acc1 = jnp.zeros((R1 * W, C), jnp.float32)
    for ky in range(3):
        patch = jnp.concatenate(
            [xs_ref[ky:ky + R1, 1 + kx:1 + kx + W, :].astype(jnp.bfloat16)
             for kx in range(3)], axis=-1)                        # (R1, W, 3C)
        acc1 = acc1 + jnp.dot(patch.reshape(R1 * W, 3 * C), w1_ref[ky],
                              preferred_element_type=jnp.float32)
    a1 = jnp.maximum(acc1 + b1_ref[...], 0.0).reshape(R1, W, C)

    # Zero-padded conv1 output (pad 1 in both dims for conv2's "same" padding).
    c1p_ref[...] = jnp.zeros_like(c1p_ref)
    c1p_ref[:, 1:W + 1, :] = a1

    # Rows outside the image must be conv2's zero padding, not conv1 values.
    @pl.when(i == 0)
    def _():
        c1p_ref[0:1, :, :] = jnp.zeros((1, W + 2, C), jnp.float32)

    @pl.when(i == HT - 1)
    def _():
        c1p_ref[R1 - 1:R1, :, :] = jnp.zeros((1, W + 2, C), jnp.float32)

    # ---- conv2 (3x3, pad 1) + bias ----
    acc2 = jnp.zeros((TH * W, C), jnp.float32)
    for ky in range(3):
        patch = jnp.concatenate(
            [c1p_ref[ky:ky + TH, kx:kx + W, :].astype(jnp.bfloat16)
             for kx in range(3)], axis=-1)                        # (TH, W, 3C)
        acc2 = acc2 + jnp.dot(patch.reshape(TH * W, 3 * C), w2_ref[ky],
                              preferred_element_type=jnp.float32)
    acc2 = acc2 + b2_ref[...]

    x_ref[...] = acc2.astype(jnp.bfloat16).reshape(TH, W, C)
    # Per-tile channel sums for the SE global average pool (reduced outside).
    psum_ref[...] = jnp.sum(acc2, axis=0, keepdims=True).reshape(1, 1, C)


def _se_fuse_kernel(x_ref, feat_ref, pooled_ref, wse1_ref, wse2t_ref,
                    wa_ref, wb_ref, b_ref, o_ref, *, TH, W, C):
    """SE gate + folded 1x1 conv + residual for one TH-row tile.

    x_ref      : (TH, W, C) bf16   conv2 output tile
    feat_ref   : (TH, W, C) f32    original feature tile (residual)
    pooled_ref : (C, 1)     f32    global mean of conv2 output (column form)
    wse1_ref   : (C, hid)   f32    SE fc1 weight
    wse2t_ref  : (C, hid)   f32    SE fc2 weight, transposed
    wa_ref/wb_ref : (C, C)  f32    1x1 weight split (x part / x_se part)
    b_ref      : (1, C)     f32
    """
    # SE excitation -- tiny, recomputed per tile so the grid stays 'parallel'.
    h = jnp.sum(wse1_ref[...] * pooled_ref[...], axis=0, keepdims=True)  # (1, hid)
    h = jnp.maximum(h, 0.0)
    s_col = jax.nn.sigmoid(
        jnp.sum(wse2t_ref[...] * h, axis=1, keepdims=True))              # (C, 1)

    # Fold: cat([x, x*s]) @ W_1x1  ==  x @ (Wa + s ⊙_rows Wb)   (one MXU matmul)
    w_eff = (wa_ref[...] + s_col * wb_ref[...]).astype(jnp.bfloat16)     # (C, C)

    x2d = x_ref[...].reshape(TH * W, C)                                  # bf16
    f = jnp.dot(x2d, w_eff, preferred_element_type=jnp.float32) + b_ref[...]
    o_ref[...] = feat_ref[...] + f.reshape(TH, W, C)


# ------------------------------ JAX wrappers --------------------------------


def _pick_row_tile(H):
    # Row tile must divide H and be a multiple of 4 (halo block indexing).
    for th in (8, 16, 32, 4):
        if H % th == 0:
            return th
    raise ValueError("H must be a multiple of 4 for this kernel")


def prepare_carb_params(p):
    """One-time weight re-layout (hoisted out of the forward path)."""
    C = p["b1"].shape[0]
    # (Cout, Cin, ky, kx) -> (ky, kx, Cin, Cout) -> (3, 3C, C), bf16 MXU slabs.
    w1s = jnp.transpose(p["w1"], (2, 3, 1, 0)).reshape(3, 3 * C, C).astype(jnp.bfloat16)
    w2s = jnp.transpose(p["w2"], (2, 3, 1, 0)).reshape(3, 3 * C, C).astype(jnp.bfloat16)
    # 1x1 conv weight (C, 2C, 1, 1) split + transposed to (Cin, Cout).
    wa = jnp.transpose(p["w1x1"][:, :C, 0, 0], (1, 0))
    wb = jnp.transpose(p["w1x1"][:, C:, 0, 0], (1, 0))
    return dict(
        w1s=w1s, b1=p["b1"].reshape(1, C),
        w2s=w2s, b2=p["b2"].reshape(1, C),
        wse1=p["wse1"],                        # (C, hid)
        wse2_t=jnp.transpose(p["wse2"]),       # (C, hid)
        wa=wa, wb=wb, b1x1=p["b1x1"].reshape(1, C))


@jax.jit
def carb_forward(feature, q):
    """CARB forward.  feature: (1, C, H, W) f32 -> (1, C, H, W) f32."""
    assert feature.shape[0] == 1, "CARB contract is batch = 1"
    _, C, H, W = feature.shape
    hid = q["wse1"].shape[1]
    TH = _pick_row_tile(H)
    HT = H // TH

    feat_hwc = jnp.transpose(feature[0], (1, 2, 0))                  # (H, W, C)
    xp = jnp.pad(feat_hwc, ((2, 2), (2, 2), (0, 0)))                 # single pad

    # ---------------- fused conv1+ReLU -> conv2 (row-tiled) -----------------
    conv_kern = functools.partial(_conv_pair_kernel, TH=TH, W=W, C=C, HT=HT)
    x_bf16, psums = pl.pallas_call(
        conv_kern,
        grid=(HT,),
        in_specs=[
            pl.BlockSpec((TH, W + 4, C), lambda i: (i, 0, 0)),                   # body rows
            pl.BlockSpec((4, W + 4, C), lambda i: ((i + 1) * (TH // 4), 0, 0)),  # halo rows
            pl.BlockSpec((3, 3 * C, C), lambda i: (0, 0, 0)),                    # w1 slabs
            pl.BlockSpec((1, C), lambda i: (0, 0)),                              # b1
            pl.BlockSpec((3, 3 * C, C), lambda i: (0, 0, 0)),                    # w2 slabs
            pl.BlockSpec((1, C), lambda i: (0, 0)),                              # b2
        ],
        out_specs=(
            pl.BlockSpec((TH, W, C), lambda i: (i, 0, 0)),
            pl.BlockSpec((1, 1, C), lambda i: (i, 0, 0)),
        ),
        out_shape=(
            jax.ShapeDtypeStruct((H, W, C), jnp.bfloat16),
            jax.ShapeDtypeStruct((HT, 1, C), jnp.float32),
        ),
        scratch_shapes=[
            pltpu.VMEM((TH + 4, W + 4, C), jnp.float32),
            pltpu.VMEM((TH + 2, W + 2, C), jnp.float32),
        ],
        compiler_params=pltpu.CompilerParams(
            dimension_semantics=("parallel",),
            vmem_limit_bytes=_VMEM_LIMIT_BYTES),
        cost_estimate=pl.CostEstimate(
            flops=int(4 * 9 * H * W * C * C),
            transcendentals=0,
            bytes_accessed=int((H + 4) * (W + 4) * C * 4 + H * W * C * 2
                               + 6 * C * C * 2 + HT * C * 4)),
    )(xp, xp, q["w1s"], q["b1"], q["w2s"], q["b2"])

    # Tiny cross-tile finalization of the global average pool (plain JAX).
    pooled_col = (jnp.sum(psums, axis=(0, 1)) / float(H * W)).reshape(C, 1)

    # ---------------- SE gate + folded 1x1 + residual (row-tiled) -----------
    fuse_kern = functools.partial(_se_fuse_kernel, TH=TH, W=W, C=C)
    out_hwc = pl.pallas_call(
        fuse_kern,
        grid=(HT,),
        in_specs=[
            pl.BlockSpec((TH, W, C), lambda i: (i, 0, 0)),   # x (bf16)
            pl.BlockSpec((TH, W, C), lambda i: (i, 0, 0)),   # feature (residual)
            pl.BlockSpec((C, 1), lambda i: (0, 0)),          # pooled mean (column)
            pl.BlockSpec((C, hid), lambda i: (0, 0)),        # wse1
            pl.BlockSpec((C, hid), lambda i: (0, 0)),        # wse2^T
            pl.BlockSpec((C, C), lambda i: (0, 0)),          # wa
            pl.BlockSpec((C, C), lambda i: (0, 0)),          # wb
            pl.BlockSpec((1, C), lambda i: (0, 0)),          # b1x1
        ],
        out_specs=pl.BlockSpec((TH, W, C), lambda i: (i, 0, 0)),
        out_shape=jax.ShapeDtypeStruct((H, W, C), jnp.float32),
        input_output_aliases={1: 0},                         # residual in place
        compiler_params=pltpu.CompilerParams(
            dimension_semantics=("parallel",),
            vmem_limit_bytes=_VMEM_LIMIT_BYTES),
        cost_estimate=pl.CostEstimate(
            flops=int(2 * H * W * C * C),
            transcendentals=int(HT * C),
            bytes_accessed=int(H * W * C * (2 + 4 + 4) + 2 * C * C * 4)),
    )(x_bf16, feat_hwc, pooled_col, q["wse1"], q["wse2_t"],
      q["wa"], q["wb"], q["b1x1"])

    return jnp.transpose(out_hwc, (2, 0, 1))[None]           # back to NCHW


# -------------------------- pure-JAX reference ------------------------------


def carb_reference(feat, p):
    dn = ("NCHW", "OIHW", "NCHW")

    def conv3(x, w, b):
        y = lax.conv_general_dilated(x, w, (1, 1), [(1, 1), (1, 1)],
                                     dimension_numbers=dn)
        return y + b[None, :, None, None]

    x = jax.nn.relu(conv3(feat, p["w1"], p["b1"]))
    x = conv3(x, p["w2"], p["b2"])
    y = jnp.mean(x, axis=(2, 3))                              # (N, C)
    s = jax.nn.relu(y @ p["wse1"])
    s = jax.nn.sigmoid(s @ p["wse2"])
    x_se = x * s[:, :, None, None]
    f = jnp.concatenate([x, x_se], axis=1)
    f = lax.conv_general_dilated(f, p["w1x1"], (1, 1), [(0, 0), (0, 0)],
                                 dimension_numbers=dn)
    f = f + p["b1x1"][None, :, None, None]
    return feat + f


# ---------------------------------- main -------------------------------------


if __name__ == "__main__":
    C, H, W = 128, 32, 32       # module contract channels (ch=128), small H x W
    reduction = 4               # SELayer reduction
    hidden = C // reduction

    key = jax.random.PRNGKey(0)
    ks = jax.random.split(key, 9)

    feature = jax.random.normal(ks[0], (1, C, H, W), jnp.float32)

    params = {
        "w1":   0.02 * jax.random.normal(ks[1], (C, C, 3, 3), jnp.float32),
        "b1":   0.02 * jax.random.normal(ks[2], (C,), jnp.float32),
        "w2":   0.02 * jax.random.normal(ks[3], (C, C, 3, 3), jnp.float32),
        "b2":   0.02 * jax.random.normal(ks[4], (C,), jnp.float32),
        # SELayer Linear weights in (in, out) matmul form, bias-free.
        "wse1": 0.10 * jax.random.normal(ks[5], (C, hidden), jnp.float32),
        "wse2": 0.10 * jax.random.normal(ks[6], (hidden, C), jnp.float32),
        "w1x1": 0.05 * jax.random.normal(ks[7], (C, 2 * C, 1, 1), jnp.float32),
        "b1x1": 0.05 * jax.random.normal(ks[8], (C,), jnp.float32),
    }

    prepped = prepare_carb_params(params)
    out = jax.block_until_ready(carb_forward(feature, prepped))
    ref = jax.block_until_ready(carb_reference(feature, params))

    assert out.shape == feature.shape and out.dtype == jnp.float32
    max_err = float(jnp.max(jnp.abs(out - ref)))
    # bf16 MXU operands with f32 accumulation: looser tolerance than pure f32.
    assert jnp.allclose(out, ref, atol=5e-2, rtol=5e-2), max_err

    print("KERNEL_OK")
</pallas_src>

<mosaic_0001>
module attributes {stable_mosaic.version = 11 : i64} {
  func.func @_conv_pair_kernel(%arg0: i32, %arg1: memref<8x36x128xf32, #tpu.memory_space<vmem>>, %arg2: memref<4x36x128xf32, #tpu.memory_space<vmem>>, %arg3: memref<3x384x128xbf16, #tpu.memory_space<vmem>>, %arg4: memref<1x128xf32, #tpu.memory_space<vmem>>, %arg5: memref<3x384x128xbf16, #tpu.memory_space<vmem>>, %arg6: memref<1x128xf32, #tpu.memory_space<vmem>>, %arg7: memref<8x32x128xbf16, #tpu.memory_space<vmem>>, %arg8: memref<1x1x128xf32, #tpu.memory_space<vmem>>, %arg9: memref<12x36x128xf32, #tpu.memory_space<vmem>>, %arg10: memref<10x34x128xf32, #tpu.memory_space<vmem>>) attributes {dimension_semantics = [#tpu.dimension_semantics<parallel>], iteration_bounds = array<i64: 4>, scalar_prefetch = 0 : i64, scratch_operands = 2 : i64, tpu.core_type = #tpu.core_type<tc>, window_params = [{transform_indices = @transform_0, window_bounds = array<i64: 8, 36, 128>}, {transform_indices = @transform_1, window_bounds = array<i64: 4, 36, 128>}, {pipeline_mode = #tpu.pipeline_mode<synchronous>, transform_indices = @transform_2, window_bounds = array<i64: 3, 384, 128>}, {pipeline_mode = #tpu.pipeline_mode<synchronous>, transform_indices = @transform_3, window_bounds = array<i64: 1, 128>}, {pipeline_mode = #tpu.pipeline_mode<synchronous>, transform_indices = @transform_4, window_bounds = array<i64: 3, 384, 128>}, {pipeline_mode = #tpu.pipeline_mode<synchronous>, transform_indices = @transform_5, window_bounds = array<i64: 1, 128>}, {transform_indices = @transform_6, window_bounds = array<i64: 8, 32, 128>}, {transform_indices = @transform_7, window_bounds = array<i64: 1, 1, 128>}]} {
    %c0 = arith.constant 0 : index
    %c0_0 = arith.constant 0 : index
    %c0_1 = arith.constant 0 : index
    %0 = vector.load %arg1[%c0, %c0_0, %c0_1] : memref<8x36x128xf32, #tpu.memory_space<vmem>>, vector<8x36x128xf32>
    %c0_2 = arith.constant 0 : index
    %c0_3 = arith.constant 0 : index
    %c0_4 = arith.constant 0 : index
    %1 = vector.load %arg9[%c0_2, %c0_3, %c0_4] : memref<12x36x128xf32, #tpu.memory_space<vmem>>, vector<8x36x128xf32>
    tpu.vector_store %arg9[%c0_2, %c0_3, %c0_4], %0 {strides = array<i32>} : memref<12x36x128xf32, #tpu.memory_space<vmem>>, vector<8x36x128xf32>,
    %c0_5 = arith.constant 0 : index
    %c0_6 = arith.constant 0 : index
    %c0_7 = arith.constant 0 : index
    %2 = vector.load %arg2[%c0_5, %c0_6, %c0_7] : memref<4x36x128xf32, #tpu.memory_space<vmem>>, vector<4x36x128xf32>
    %c8 = arith.constant 8 : index
    %c0_8 = arith.constant 0 : index
    %c0_9 = arith.constant 0 : index
    %3 = vector.load %arg9[%c8, %c0_8, %c0_9] : memref<12x36x128xf32, #tpu.memory_space<vmem>>, vector<4x36x128xf32>
    tpu.vector_store %arg9[%c8, %c0_8, %c0_9], %2 {strides = array<i32>} : memref<12x36x128xf32, #tpu.memory_space<vmem>>, vector<4x36x128xf32>,
    %cst = arith.constant 0.000000e+00 : f32
    %4 = vector.broadcast %cst : f32 to vector<320x128xf32>
    %c0_10 = arith.constant 0 : index
    %c1 = arith.constant 1 : index
    %c0_11 = arith.constant 0 : index
    %5 = vector.load %arg9[%c0_10, %c1, %c0_11] : memref<12x36x128xf32, #tpu.memory_space<vmem>>, vector<10x32x128xf32>
    %6 = arith.truncf %5 : vector<10x32x128xf32> to vector<10x32x128xbf16>
    %c0_12 = arith.constant 0 : index
    %c2 = arith.constant 2 : index
    %c0_13 = arith.constant 0 : index
    %7 = vector.load %arg9[%c0_12, %c2, %c0_13] : memref<12x36x128xf32, #tpu.memory_space<vmem>>, vector<10x32x128xf32>
    %8 = arith.truncf %7 : vector<10x32x128xf32> to vector<10x32x128xbf16>
    %c0_14 = arith.constant 0 : index
    %c3 = arith.constant 3 : index
    %c0_15 = arith.constant 0 : index
    %9 = vector.load %arg9[%c0_14, %c3, %c0_15] : memref<12x36x128xf32, #tpu.memory_space<vmem>>, vector<10x32x128xf32>
    %10 = arith.truncf %9 : vector<10x32x128xf32> to vector<10x32x128xbf16>
    %11 = tpu.concatenate %6, %8, %10 in 2 : vector<10x32x128xbf16>, vector<10x32x128xbf16>, vector<10x32x128xbf16> -> vector<10x32x384xbf16>
    %12 = vector.shape_cast %11 : vector<10x32x384xbf16> to vector<320x384xbf16>
    %c0_16 = arith.constant 0 : index
    %c0_17 = arith.constant 0 : index
    %c0_18 = arith.constant 0 : index
    %13 = vector.load %arg3[%c0_16, %c0_17, %c0_18] : memref<3x384x128xbf16, #tpu.memory_space<vmem>>, vector<1x384x128xbf16>
    %14 = vector.shape_cast %13 : vector<1x384x128xbf16> to vector<384x128xbf16>
    %cst_19 = arith.constant dense<0.000000e+00> : vector<320x128xf32>
    %15 = tpu.matmul %12, %14, %cst_19 {dimension_numbers = #tpu.dot_dimension_numbers<[1], [0], [0], [1], [0, 0, 1, 1], [], []>} : vector<320x384xbf16>, vector<384x128xbf16>, vector<320x128xf32> -> vector<320x128xf32>
    %16 = arith.addf %4, %15 : vector<320x128xf32>
    %c1_20 = arith.constant 1 : index
    %c1_21 = arith.constant 1 : index
    %c0_22 = arith.constant 0 : index
    %17 = vector.load %arg9[%c1_20, %c1_21, %c0_22] : memref<12x36x128xf32, #tpu.memory_space<vmem>>, vector<10x32x128xf32>
    %18 = arith.truncf %17 : vector<10x32x128xf32> to vector<10x32x128xbf16>
    %c1_23 = arith.constant 1 : index
    %c2_24 = arith.constant 2 : index
    %c0_25 = arith.constant 0 : index
    %19 = vector.load %arg9[%c1_23, %c2_24, %c0_25] : memref<12x36x128xf32, #tpu.memory_space<vmem>>, vector<10x32x128xf32>
    %20 = arith.truncf %19 : vector<10x32x128xf32> to vector<10x32x128xbf16>
    %c1_26 = arith.constant 1 : index
    %c3_27 = arith.constant 3 : index
    %c0_28 = arith.constant 0 : index
    %21 = vector.load %arg9[%c1_26, %c3_27, %c0_28] : memref<12x36x128xf32, #tpu.memory_space<vmem>>, vector<10x32x128xf32>
    %22 = arith.truncf %21 : vector<10x32x128xf32> to vector<10x32x128xbf16>
    %23 = tpu.concatenate %18, %20, %22 in 2 : vector<10x32x128xbf16>, vector<10x32x128xbf16>, vector<10x32x128xbf16> -> vector<10x32x384xbf16>
    %24 = vector.shape_cast %23 : vector<10x32x384xbf16> to vector<320x384xbf16>
    %c1_29 = arith.constant 1 : index
    %c0_30 = arith.constant 0 : index
    %c0_31 = arith.constant 0 : index
    %25 = vector.load %arg3[%c1_29, %c0_30, %c0_31] : memref<3x384x128xbf16, #tpu.memory_space<vmem>>, vector<1x384x128xbf16>
    %26 = vector.shape_cast %25 : vector<1x384x128xbf16> to vector<384x128xbf16>
    %cst_32 = arith.constant dense<0.000000e+00> : vector<320x128xf32>
    %27 = tpu.matmul %24, %26, %cst_32 {dimension_numbers = #tpu.dot_dimension_numbers<[1], [0], [0], [1], [0, 0, 1, 1], [], []>} : vector<320x384xbf16>, vector<384x128xbf16>, vector<320x128xf32> -> vector<320x128xf32>
    %28 = arith.addf %16, %27 : vector<320x128xf32>
    %c2_33 = arith.constant 2 : index
    %c1_34 = arith.constant 1 : index
    %c0_35 = arith.constant 0 : index
    %29 = vector.load %arg9[%c2_33, %c1_34, %c0_35] : memref<12x36x128xf32, #tpu.memory_space<vmem>>, vector<10x32x128xf32>
    %30 = arith.truncf %29 : vector<10x32x128xf32> to vector<10x32x128xbf16>
    %c2_36 = arith.constant 2 : index
    %c2_37 = arith.constant 2 : index
    %c0_38 = arith.constant 0 : index
    %31 = vector.load %arg9[%c2_36, %c2_37, %c0_38] : memref<12x36x128xf32, #tpu.memory_space<vmem>>, vector<10x32x128xf32>
    %32 = arith.truncf %31 : vector<10x32x128xf32> to vector<10x32x128xbf16>
    %c2_39 = arith.constant 2 : index
    %c3_40 = arith.constant 3 : index
    %c0_41 = arith.constant 0 : index
    %33 = vector.load %arg9[%c2_39, %c3_40, %c0_41] : memref<12x36x128xf32, #tpu.memory_space<vmem>>, vector<10x32x128xf32>
    %34 = arith.truncf %33 : vector<10x32x128xf32> to vector<10x32x128xbf16>
    %35 = tpu.concatenate %30, %32, %34 in 2 : vector<10x32x128xbf16>, vector<10x32x128xbf16>, vector<10x32x128xbf16> -> vector<10x32x384xbf16>
    %36 = vector.shape_cast %35 : vector<10x32x384xbf16> to vector<320x384xbf16>
    %c2_42 = arith.constant 2 : index
    %c0_43 = arith.constant 0 : index
    %c0_44 = arith.constant 0 : index
    %37 = vector.load %arg3[%c2_42, %c0_43, %c0_44] : memref<3x384x128xbf16, #tpu.memory_space<vmem>>, vector<1x384x128xbf16>
    %38 = vector.shape_cast %37 : vector<1x384x128xbf16> to vector<384x128xbf16>
    %cst_45 = arith.constant dense<0.000000e+00> : vector<320x128xf32>
    %39 = tpu.matmul %36, %38, %cst_45 {dimension_numbers = #tpu.dot_dimension_numbers<[1], [0], [0], [1], [0, 0, 1, 1], [], []>} : vector<320x384xbf16>, vector<384x128xbf16>, vector<320x128xf32> -> vector<320x128xf32>
    %40 = arith.addf %28, %39 : vector<320x128xf32>
    %c0_46 = arith.constant 0 : index
    %c0_47 = arith.constant 0 : index
    %41 = vector.load %arg4[%c0_46, %c0_47] : memref<1x128xf32, #tpu.memory_space<vmem>>, vector<1x128xf32>
    %42 = vector.broadcast %41 : vector<1x128xf32> to vector<320x128xf32>
    %43 = arith.addf %40, %42 : vector<320x128xf32>
    %cst_48 = arith.constant 0.000000e+00 : f32
    %44 = vector.broadcast %cst_48 : f32 to vector<320x128xf32>
    %45 = arith.maximumf %43, %44 : vector<320x128xf32>
    %46 = vector.shape_cast %45 : vector<320x128xf32> to vector<10x32x128xf32>
    %cst_49 = arith.constant 0.000000e+00 : f32
    %47 = vector.broadcast %cst_49 : f32 to vector<10x34x128xf32>
    %c0_50 = arith.constant 0 : index
    %c0_51 = arith.constant 0 : index
    %c0_52 = arith.constant 0 : index
    %48 = vector.load %arg10[%c0_50, %c0_51, %c0_52] : memref<10x34x128xf32, #tpu.memory_space<vmem>>, vector<10x34x128xf32>
    tpu.vector_store %arg10[%c0_50, %c0_51, %c0_52], %47 {strides = array<i32>} : memref<10x34x128xf32, #tpu.memory_space<vmem>>, vector<10x34x128xf32>,
    %c0_53 = arith.constant 0 : index
    %c1_54 = arith.constant 1 : index
    %c0_55 = arith.constant 0 : index
    %49 = vector.load %arg10[%c0_53, %c1_54, %c0_55] : memref<10x34x128xf32, #tpu.memory_space<vmem>>, vector<10x32x128xf32>
    tpu.vector_store %arg10[%c0_53, %c1_54, %c0_55], %46 {strides = array<i32>} : memref<10x34x128xf32, #tpu.memory_space<vmem>>, vector<10x32x128xf32>,
    %c0_i32 = arith.constant 0 : i32
    %50 = arith.cmpi eq, %arg0, %c0_i32 : i32
    %51 = arith.extui %50 : i1 to i32
    %c0_i32_56 = arith.constant 0 : i32
    %52 = arith.cmpi ne, %51, %c0_i32_56 : i32
    scf.if %52 {
      %cst_107 = arith.constant 0.000000e+00 : f32
      %103 = vector.broadcast %cst_107 : f32 to vector<1x34x128xf32>
      %c0_108 = arith.constant 0 : index
      %c0_109 = arith.constant 0 : index
      %c0_110 = arith.constant 0 : index
      %104 = vector.load %arg10[%c0_108, %c0_109, %c0_110] : memref<10x34x128xf32, #tpu.memory_space<vmem>>, vector<1x34x128xf32>
      tpu.vector_store %arg10[%c0_108, %c0_109, %c0_110], %103 {strides = array<i32>} : memref<10x34x128xf32, #tpu.memory_space<vmem>>, vector<1x34x128xf32>,
    } else {
    }
    %c3_i32 = arith.constant 3 : i32
    %53 = arith.cmpi eq, %arg0, %c3_i32 : i32
    %54 = arith.extui %53 : i1 to i32
    %c0_i32_57 = arith.constant 0 : i32
    %55 = arith.cmpi ne, %54, %c0_i32_57 : i32
    scf.if %55 {
      %cst_107 = arith.constant 0.000000e+00 : f32
      %103 = vector.broadcast %cst_107 : f32 to vector<1x34x128xf32>
      %c9 = arith.constant 9 : index
      %c0_108 = arith.constant 0 : index
      %c0_109 = arith.constant 0 : index
      %104 = vector.load %arg10[%c9, %c0_108, %c0_109] : memref<10x34x128xf32, #tpu.memory_space<vmem>>, vector<1x34x128xf32>
      tpu.vector_store %arg10[%c9, %c0_108, %c0_109], %103 {strides = array<i32>} : memref<10x34x128xf32, #tpu.memory_space<vmem>>, vector<1x34x128xf32>,
    } else {
    }
    %cst_58 = arith.constant 0.000000e+00 : f32
    %56 = vector.broadcast %cst_58 : f32 to vector<256x128xf32>
    %c0_59 = arith.constant 0 : index
    %c0_60 = arith.constant 0 : index
    %c0_61 = arith.constant 0 : index
    %57 = vector.load %arg10[%c0_59, %c0_60, %c0_61] : memref<10x34x128xf32, #tpu.memory_space<vmem>>, vector<8x32x128xf32>
    %58 = arith.truncf %57 : vector<8x32x128xf32> to vector<8x32x128xbf16>
    %c0_62 = arith.constant 0 : index
    %c1_63 = arith.constant 1 : index
    %c0_64 = arith.constant 0 : index
    %59 = vector.load %arg10[%c0_62, %c1_63, %c0_64] : memref<10x34x128xf32, #tpu.memory_space<vmem>>, vector<8x32x128xf32>
    %60 = arith.truncf %59 : vector<8x32x128xf32> to vector<8x32x128xbf16>
    %c0_65 = arith.constant 0 : index
    %c2_66 = arith.constant 2 : index
    %c0_67 = arith.constant 0 : index
    %61 = vector.load %arg10[%c0_65, %c2_66, %c0_67] : memref<10x34x128xf32, #tpu.memory_space<vmem>>, vector<8x32x128xf32>
    %62 = arith.truncf %61 : vector<8x32x128xf32> to vector<8x32x128xbf16>
    %63 = tpu.concatenate %58, %60, %62 in 2 : vector<8x32x128xbf16>, vector<8x32x128xbf16>, vector<8x32x128xbf16> -> vector<8x32x384xbf16>
    %64 = vector.shape_cast %63 : vector<8x32x384xbf16> to vector<256x384xbf16>
    %c0_68 = arith.constant 0 : index
    %c0_69 = arith.constant 0 : index
    %c0_70 = arith.constant 0 : index
    %65 = vector.load %arg5[%c0_68, %c0_69, %c0_70] : memref<3x384x128xbf16, #tpu.memory_space<vmem>>, vector<1x384x128xbf16>
    %66 = vector.shape_cast %65 : vector<1x384x128xbf16> to vector<384x128xbf16>
    %cst_71 = arith.constant dense<0.000000e+00> : vector<256x128xf32>
    %67 = tpu.matmul %64, %66, %cst_71 {dimension_numbers = #tpu.dot_dimension_numbers<[1], [0], [0], [1], [0, 0, 1, 1], [], []>} : vector<256x384xbf16>, vector<384x128xbf16>, vector<256x128xf32> -> vector<256x128xf32>
    %68 = arith.addf %56, %67 : vector<256x128xf32>
    %c1_72 = arith.constant 1 : index
    %c0_73 = arith.constant 0 : index
    %c0_74 = arith.constant 0 : index
    %69 = vector.load %arg10[%c1_72, %c0_73, %c0_74] : memref<10x34x128xf32, #tpu.memory_space<vmem>>, vector<8x32x128xf32>
    %70 = arith.truncf %69 : vector<8x32x128xf32> to vector<8x32x128xbf16>
    %c1_75 = arith.constant 1 : index
    %c1_76 = arith.constant 1 : index
    %c0_77 = arith.constant 0 : index
    %71 = vector.load %arg10[%c1_75, %c1_76, %c0_77] : memref<10x34x128xf32, #tpu.memory_space<vmem>>, vector<8x32x128xf32>
    %72 = arith.truncf %71 : vector<8x32x128xf32> to vector<8x32x128xbf16>
    %c1_78 = arith.constant 1 : index
    %c2_79 = arith.constant 2 : index
    %c0_80 = arith.constant 0 : index
    %73 = vector.load %arg10[%c1_78, %c2_79, %c0_80] : memref<10x34x128xf32, #tpu.memory_space<vmem>>, vector<8x32x128xf32>
    %74 = arith.truncf %73 : vector<8x32x128xf32> to vector<8x32x128xbf16>
    %75 = tpu.concatenate %70, %72, %74 in 2 : vector<8x32x128xbf16>, vector<8x32x128xbf16>, vector<8x32x128xbf16> -> vector<8x32x384xbf16>
    %76 = vector.shape_cast %75 : vector<8x32x384xbf16> to vector<256x384xbf16>
    %c1_81 = arith.constant 1 : index
    %c0_82 = arith.constant 0 : index
    %c0_83 = arith.constant 0 : index
    %77 = vector.load %arg5[%c1_81, %c0_82, %c0_83] : memref<3x384x128xbf16, #tpu.memory_space<vmem>>, vector<1x384x128xbf16>
    %78 = vector.shape_cast %77 : vector<1x384x128xbf16> to vector<384x128xbf16>
    %cst_84 = arith.constant dense<0.000000e+00> : vector<256x128xf32>
    %79 = tpu.matmul %76, %78, %cst_84 {dimension_numbers = #tpu.dot_dimension_numbers<[1], [0], [0], [1], [0, 0, 1, 1], [], []>} : vector<256x384xbf16>, vector<384x128xbf16>, vector<256x128xf32> -> vector<256x128xf32>
    %80 = arith.addf %68, %79 : vector<256x128xf32>
    %c2_85 = arith.constant 2 : index
    %c0_86 = arith.constant 0 : index
    %c0_87 = arith.constant 0 : index
    %81 = vector.load %arg10[%c2_85, %c0_86, %c0_87] : memref<10x34x128xf32, #tpu.memory_space<vmem>>, vector<8x32x128xf32>
    %82 = arith.truncf %81 : vector<8x32x128xf32> to vector<8x32x128xbf16>
    %c2_88 = arith.constant 2 : index
    %c1_89 = arith.constant 1 : index
    %c0_90 = arith.constant 0 : index
    %83 = vector.load %arg10[%c2_88, %c1_89, %c0_90] : memref<10x34x128xf32, #tpu.memory_space<vmem>>, vector<8x32x128xf32>
    %84 = arith.truncf %83 : vector<8x32x128xf32> to vector<8x32x128xbf16>
    %c2_91 = arith.constant 2 : index
    %c2_92 = arith.constant 2 : index
    %c0_93 = arith.constant 0 : index
    %85 = vector.load %arg10[%c2_91, %c2_92, %c0_93] : memref<10x34x128xf32, #tpu.memory_space<vmem>>, vector<8x32x128xf32>
    %86 = arith.truncf %85 : vector<8x32x128xf32> to vector<8x32x128xbf16>
    %87 = tpu.concatenate %82, %84, %86 in 2 : vector<8x32x128xbf16>, vector<8x32x128xbf16>, vector<8x32x128xbf16> -> vector<8x32x384xbf16>
    %88 = vector.shape_cast %87 : vector<8x32x384xbf16> to vector<256x384xbf16>
    %c2_94 = arith.constant 2 : index
    %c0_95 = arith.constant 0 : index
    %c0_96 = arith.constant 0 : index
    %89 = vector.load %arg5[%c2_94, %c0_95, %c0_96] : memref<3x384x128xbf16, #tpu.memory_space<vmem>>, vector<1x384x128xbf16>
    %90 = vector.shape_cast %89 : vector<1x384x128xbf16> to vector<384x128xbf16>
    %cst_97 = arith.constant dense<0.000000e+00> : vector<256x128xf32>
    %91 = tpu.matmul %88, %90, %cst_97 {dimension_numbers = #tpu.dot_dimension_numbers<[1], [0], [0], [1], [0, 0, 1, 1], [], []>} : vector<256x384xbf16>, vector<384x128xbf16>, vector<256x128xf32> -> vector<256x128xf32>
    %92 = arith.addf %80, %91 : vector<256x128xf32>
    %c0_98 = arith.constant 0 : index
    %c0_99 = arith.constant 0 : index
    %93 = vector.load %arg6[%c0_98, %c0_99] : memref<1x128xf32, #tpu.memory_space<vmem>>, vector<1x128xf32>
    %94 = vector.broadcast %93 : vector<1x128xf32> to vector<256x128xf32>
    %95 = arith.addf %92, %94 : vector<256x128xf32>
    %96 = arith.truncf %95 : vector<256x128xf32> to vector<256x128xbf16>
    %97 = vector.shape_cast %96 : vector<256x128xbf16> to vector<8x32x128xbf16>
    %c0_100 = arith.constant 0 : index
    %c0_101 = arith.constant 0 : index
    %c0_102 = arith.constant 0 : index
    %98 = vector.load %arg7[%c0_100, %c0_101, %c0_102] : memref<8x32x128xbf16, #tpu.memory_space<vmem>>, vector<8x32x128xbf16>
    tpu.vector_store %arg7[%c0_100, %c0_101, %c0_102], %97 {strides = array<i32>} : memref<8x32x128xbf16, #tpu.memory_space<vmem>>, vector<8x32x128xbf16>,
    %cst_103 = arith.constant dense<0.000000e+00> : vector<128xf32>
    %99 = vector.multi_reduction <add>, %95, %cst_103 [0] : vector<256x128xf32> to vector<128xf32>
    %100 = vector.shape_cast %99 : vector<128xf32> to vector<1x128xf32>
    %101 = vector.shape_cast %100 : vector<1x128xf32> to vector<1x1x128xf32>
    %c0_104 = arith.constant 0 : index
    %c0_105 = arith.constant 0 : index
    %c0_106 = arith.constant 0 : index
    %102 = vector.load %arg8[%c0_104, %c0_105, %c0_106] : memref<1x1x128xf32, #tpu.memory_space<vmem>>, vector<1x1x128xf32>
    tpu.vector_store %arg8[%c0_104, %c0_105, %c0_106], %101 {strides = array<i32>} : memref<1x1x128xf32, #tpu.memory_space<vmem>>, vector<1x1x128xf32>,
    return
  }
  func.func @transform_0(%arg0: i32) -> (i32, i32, i32) {
    %c0_i32 = arith.constant 0 : i32
    %c0_i32_0 = arith.constant 0 : i32
    %c0_i32_1 = arith.constant 0 : i32
    return %arg0, %c0_i32, %c0_i32_0 : i32, i32, i32
  }
  func.func @transform_1(%arg0: i32) -> (i32, i32, i32) {
    %c1_i32 = arith.constant 1 : i32
    %0 = arith.addi %arg0, %c1_i32 : i32
    %c2_i32 = arith.constant 2 : i32
    %1 = arith.muli %0, %c2_i32 : i32
    %c0_i32 = arith.constant 0 : i32
    %c0_i32_0 = arith.constant 0 : i32
    %c0_i32_1 = arith.constant 0 : i32
    return %1, %c0_i32, %c0_i32_0 : i32, i32, i32
  }
  func.func @transform_2(%arg0: i32) -> (i32, i32, i32) {
    %c0_i32 = arith.constant 0 : i32
    %c0_i32_0 = arith.constant 0 : i32
    %c0_i32_1 = arith.constant 0 : i32
    %c0_i32_2 = arith.constant 0 : i32
    return %c0_i32, %c0_i32_0, %c0_i32_1 : i32, i32, i32
  }
  func.func @transform_3(%arg0: i32) -> (i32, i32) {
    %c0_i32 = arith.constant 0 : i32
    %c0_i32_0 = arith.constant 0 : i32
    %c0_i32_1 = arith.constant 0 : i32
    return %c0_i32, %c0_i32_0 : i32, i32
  }
  func.func @transform_4(%arg0: i32) -> (i32, i32, i32) {
    %c0_i32 = arith.constant 0 : i32
    %c0_i32_0 = arith.constant 0 : i32
    %c0_i32_1 = arith.constant 0 : i32
    %c0_i32_2 = arith.constant 0 : i32
    return %c0_i32, %c0_i32_0, %c0_i32_1 : i32, i32, i32
  }
  func.func @transform_5(%arg0: i32) -> (i32, i32) {
    %c0_i32 = arith.constant 0 : i32
    %c0_i32_0 = arith.constant 0 : i32
    %c0_i32_1 = arith.constant 0 : i32
    return %c0_i32, %c0_i32_0 : i32, i32
  }
  func.func @transform_6(%arg0: i32) -> (i32, i32, i32) {
    %c0_i32 = arith.constant 0 : i32
    %c0_i32_0 = arith.constant 0 : i32
    %c0_i32_1 = arith.constant 0 : i32
    return %arg0, %c0_i32, %c0_i32_0 : i32, i32, i32
  }
  func.func @transform_7(%arg0: i32) -> (i32, i32, i32) {
    %c0_i32 = arith.constant 0 : i32
    %c0_i32_0 = arith.constant 0 : i32
    %c0_i32_1 = arith.constant 0 : i32
    return %arg0, %c0_i32, %c0_i32_0 : i32, i32, i32
  }
}

module attributes {stable_mosaic.version = 11 : i64} {
  func.func @_se_fuse_kernel(%arg0: i32, %arg1: memref<8x32x128xbf16, #tpu.memory_space<vmem>>, %arg2: memref<8x32x128xf32, #tpu.memory_space<vmem>>, %arg3: memref<128x1xf32, #tpu.memory_space<vmem>>, %arg4: memref<128x32xf32, #tpu.memory_space<vmem>>, %arg5: memref<128x32xf32, #tpu.memory_space<vmem>>, %arg6: memref<128x128xf32, #tpu.memory_space<vmem>>, %arg7: memref<128x128xf32, #tpu.memory_space<vmem>>, %arg8: memref<1x128xf32, #tpu.memory_space<vmem>>, %arg9: memref<8x32x128xf32, #tpu.memory_space<vmem>>) attributes {dimension_semantics = [#tpu.dimension_semantics<parallel>], iteration_bounds = array<i64: 4>, scalar_prefetch = 0 : i64, scratch_operands = 0 : i64, tpu.core_type = #tpu.core_type<tc>, window_params = [{transform_indices = @transform_0, window_bounds = array<i64: 8, 32, 128>}, {transform_indices = @transform_1, window_bounds = array<i64: 8, 32, 128>}, {pipeline_mode = #tpu.pipeline_mode<synchronous>, transform_indices = @transform_2, window_bounds = array<i64: 128, 1>}, {pipeline_mode = #tpu.pipeline_mode<synchronous>, transform_indices = @transform_3, window_bounds = array<i64: 128, 32>}, {pipeline_mode = #tpu.pipeline_mode<synchronous>, transform_indices = @transform_4, window_bounds = array<i64: 128, 32>}, {pipeline_mode = #tpu.pipeline_mode<synchronous>, transform_indices = @transform_5, window_bounds = array<i64: 128, 128>}, {pipeline_mode = #tpu.pipeline_mode<synchronous>, transform_indices = @transform_6, window_bounds = array<i64: 128, 128>}, {pipeline_mode = #tpu.pipeline_mode<synchronous>, transform_indices = @transform_7, window_bounds = array<i64: 1, 128>}, {transform_indices = @transform_8, window_bounds = array<i64: 8, 32, 128>}]} {
    %c0 = arith.constant 0 : index
    %c0_0 = arith.constant 0 : index
    %0 = vector.load %arg4[%c0, %c0_0] : memref<128x32xf32, #tpu.memory_space<vmem>>, vector<128x32xf32>
    %c0_1 = arith.constant 0 : index
    %c0_2 = arith.constant 0 : index
    %1 = vector.load %arg3[%c0_1, %c0_2] : memref<128x1xf32, #tpu.memory_space<vmem>>, vector<128x1xf32>
    %2 = vector.broadcast %1 : vector<128x1xf32> to vector<128x32xf32>
    %3 = arith.mulf %0, %2 : vector<128x32xf32>
    %cst = arith.constant dense<0.000000e+00> : vector<32xf32>
    %4 = vector.multi_reduction <add>, %3, %cst [0] : vector<128x32xf32> to vector<32xf32>
    %5 = vector.shape_cast %4 : vector<32xf32> to vector<1x32xf32>
    %cst_3 = arith.constant 0.000000e+00 : f32
    %6 = vector.broadcast %cst_3 : f32 to vector<1x32xf32>
    %7 = arith.maximumf %5, %6 : vector<1x32xf32>
    %c0_4 = arith.constant 0 : index
    %c0_5 = arith.constant 0 : index
    %8 = vector.load %arg5[%c0_4, %c0_5] : memref<128x32xf32, #tpu.memory_space<vmem>>, vector<128x32xf32>
    %9 = vector.broadcast %7 : vector<1x32xf32> to vector<128x32xf32>
    %10 = arith.mulf %8, %9 : vector<128x32xf32>
    %cst_6 = arith.constant dense<0.000000e+00> : vector<128xf32>
    %11 = vector.multi_reduction <add>, %10, %cst_6 [1] : vector<128x32xf32> to vector<128xf32>
    %12 = vector.shape_cast %11 : vector<128xf32> to vector<128x1xf32>
    %13 = arith.negf %12 : vector<128x1xf32>
    %14 = math.exp %13 : vector<128x1xf32>
    %cst_7 = arith.constant 1.000000e+00 : f32
    %15 = vector.broadcast %cst_7 : f32 to vector<128x1xf32>
    %16 = arith.addf %15, %14 : vector<128x1xf32>
    %17 = arith.divf %15, %16 : vector<128x1xf32>
    %c0_8 = arith.constant 0 : index
    %c0_9 = arith.constant 0 : index
    %18 = vector.load %arg6[%c0_8, %c0_9] : memref<128x128xf32, #tpu.memory_space<vmem>>, vector<128x128xf32>
    %c0_10 = arith.constant 0 : index
    %c0_11 = arith.constant 0 : index
    %19 = vector.load %arg7[%c0_10, %c0_11] : memref<128x128xf32, #tpu.memory_space<vmem>>, vector<128x128xf32>
    %20 = vector.broadcast %17 : vector<128x1xf32> to vector<128x128xf32>
    %21 = arith.mulf %20, %19 : vector<128x128xf32>
    %22 = arith.addf %18, %21 : vector<128x128xf32>
    %23 = arith.truncf %22 : vector<128x128xf32> to vector<128x128xbf16>
    %c0_12 = arith.constant 0 : index
    %c0_13 = arith.constant 0 : index
    %c0_14 = arith.constant 0 : index
    %24 = vector.load %arg1[%c0_12, %c0_13, %c0_14] : memref<8x32x128xbf16, #tpu.memory_space<vmem>>, vector<8x32x128xbf16>
    %25 = vector.shape_cast %24 : vector<8x32x128xbf16> to vector<256x128xbf16>
    %cst_15 = arith.constant dense<0.000000e+00> : vector<256x128xf32>
    %26 = tpu.matmul %25, %23, %cst_15 {dimension_numbers = #tpu.dot_dimension_numbers<[1], [0], [0], [1], [0, 0, 1, 1], [], []>} : vector<256x128xbf16>, vector<128x128xbf16>, vector<256x128xf32> -> vector<256x128xf32>
    %c0_16 = arith.constant 0 : index
    %c0_17 = arith.constant 0 : index
    %27 = vector.load %arg8[%c0_16, %c0_17] : memref<1x128xf32, #tpu.memory_space<vmem>>, vector<1x128xf32>
    %28 = vector.broadcast %27 : vector<1x128xf32> to vector<256x128xf32>
    %29 = arith.addf %26, %28 : vector<256x128xf32>
    %c0_18 = arith.constant 0 : index
    %c0_19 = arith.constant 0 : index
    %c0_20 = arith.constant 0 : index
    %30 = vector.load %arg2[%c0_18, %c0_19, %c0_20] : memref<8x32x128xf32, #tpu.memory_space<vmem>>, vector<8x32x128xf32>
    %31 = vector.shape_cast %29 : vector<256x128xf32> to vector<8x32x128xf32>
    %32 = arith.addf %30, %31 : vector<8x32x128xf32>
    %c0_21 = arith.constant 0 : index
    %c0_22 = arith.constant 0 : index
    %c0_23 = arith.constant 0 : index
    %33 = vector.load %arg9[%c0_21, %c0_22, %c0_23] : memref<8x32x128xf32, #tpu.memory_space<vmem>>, vector<8x32x128xf32>
    tpu.vector_store %arg9[%c0_21, %c0_22, %c0_23], %32 {strides = array<i32>} : memref<8x32x128xf32, #tpu.memory_space<vmem>>, vector<8x32x128xf32>,
    return
  }
  func.func @transform_0(%arg0: i32) -> (i32, i32, i32) {
    %c0_i32 = arith.constant 0 : i32
    %c0_i32_0 = arith.constant 0 : i32
    %c0_i32_1 = arith.constant 0 : i32
    return %arg0, %c0_i32, %c0_i32_0 : i32, i32, i32
  }
  func.func @transform_1(%arg0: i32) -> (i32, i32, i32) {
    %c0_i32 = arith.constant 0 : i32
    %c0_i32_0 = arith.constant 0 : i32
    %c0_i32_1 = arith.constant 0 : i32
    return %arg0, %c0_i32, %c0_i32_0 : i32, i32, i32
  }
  func.func @transform_2(%arg0: i32) -> (i32, i32) {
    %c0_i32 = arith.constant 0 : i32
    %c0_i32_0 = arith.constant 0 : i32
    %c0_i32_1 = arith.constant 0 : i32
    return %c0_i32, %c0_i32_0 : i32, i32
  }
  func.func @transform_3(%arg0: i32) -> (i32, i32) {
    %c0_i32 = arith.constant 0 : i32
    %c0_i32_0 = arith.constant 0 : i32
    %c0_i32_1 = arith.constant 0 : i32
    return %c0_i32, %c0_i32_0 : i32, i32
  }
  func.func @transform_4(%arg0: i32) -> (i32, i32) {
    %c0_i32 = arith.constant 0 : i32
    %c0_i32_0 = arith.constant 0 : i32
    %c0_i32_1 = arith.constant 0 : i32
    return %c0_i32, %c0_i32_0 : i32, i32
  }
  func.func @transform_5(%arg0: i32) -> (i32, i32) {
    %c0_i32 = arith.constant 0 : i32
    %c0_i32_0 = arith.constant 0 : i32
    %c0_i32_1 = arith.constant 0 : i32
    return %c0_i32, %c0_i32_0 : i32, i32
  }
  func.func @transform_6(%arg0: i32) -> (i32, i32) {
    %c0_i32 = arith.constant 0 : i32
    %c0_i32_0 = arith.constant 0 : i32
    %c0_i32_1 = arith.constant 0 : i32
    return %c0_i32, %c0_i32_0 : i32, i32
  }
  func.func @transform_7(%arg0: i32) -> (i32, i32) {
    %c0_i32 = arith.constant 0 : i32
    %c0_i32_0 = arith.constant 0 : i32
    %c0_i32_1 = arith.constant 0 : i32
    return %c0_i32, %c0_i32_0 : i32, i32
  }
  func.func @transform_8(%arg0: i32) -> (i32, i32, i32) {
    %c0_i32 = arith.constant 0 : i32
    %c0_i32_0 = arith.constant 0 : i32
    %c0_i32_1 = arith.constant 0 : i32
    return %arg0, %c0_i32, %c0_i32_0 : i32, i32, i32
  }
}

</mosaic_0001>

<bundles_post_ra>
// kernel: carb_forward.3
= control target key start
LH: loop header
LB: loop body
LE: loop exit
PB: predicated region body
PF: predicated region fallthrough
CT: control target
= control target key end

     0   :  { %s1502_s27 = smov 0   ;;  %s1999_s0 = inlined_call_operand.vmem [shape: bf16[32,32,128], index: 0, kind: input, shape index: {}]   ;;  %s2000_s1 = inlined_call_operand.vmem [shape: f32[32,32,128], index: 1, kind: input, shape index: {}, may-alias: {1,8}]   ;;  %s2001_s2 = inlined_call_operand.vmem [shape: f32[128,1], index: 2, kind: input, shape index: {}]   ;;  %s2002_s3 = inlined_call_operand.vmem [shape: f32[128,32], index: 3, kind: input, shape index: {}]   ;;  %s2003_s4 = inlined_call_operand.vmem [shape: f32[128,32], index: 4, kind: input, shape index: {}]   ;;  %s2004_s5 = inlined_call_operand.vmem [shape: f32[128,128], index: 5, kind: input, shape index: {}]   ;;  %s2005_s6 = inlined_call_operand.vmem [shape: f32[128,128], index: 6, kind: input, shape index: {}]   ;;  %s2006_s7 = inlined_call_operand.vmem [shape: f32[1,128], index: 7, kind: input, shape index: {}]   ;;  %s2007_s8 = inlined_call_operand.vmem [shape: f32[32,32,128], index: 8, kind: output, shape index: {}, may-alias: {1,8}]  }
   0x1 LB: > { %s1217_s28 = sadd.s32 4294967295, %s1454_s27   ;;  %p1221_p0 = scmp.ge.s32.totalorder %s1454_s27, 1  ;;  %s1454_s27 = sphi %s1502_s27, %s18_s27  }
   0x2   : > { %p276_p1 = scmp.lt.s32.totalorder %s1454_s27, 5 }
   0x4   : > { %p277_p2 = pnand %p1221_p0, %p276_p1 }
   0x5   : > { %v358_v0 = vld [vmem:[%s2001_s2 + $0x10] sm:$0xff] (!%p277_p2)  ;;  %v356_v1 = vld [vmem:[%s2001_s2] sm:$0xff] (!%p277_p2)  ;;  %v1456_v2 = vmov (!%p277_p2), 0   ;;  %v359_v3 = vld [vmem:[%s2001_s2 + $0x18] sm:$0xff] (!%p277_p2)  ;;  %vm468_vm0 = vcmask (!%p277_p2), 261120   ;;  %s1222_s23 = sshll.u32 (!%p277_p2), %s1217_s28, 3 }
   0x6   : > { %280 = sbr.rel (%p277_p2) target bundleno = 646 (0x286), region = 52  ;;  %1367 = vset.pattern.permute.xlu1 (!%p277_p2), %v1456_v2  ;;  %1366 = vset.pattern.permute.xlu0 (!%p277_p2), %v1456_v2  ;;  %v357_v4 = vld [vmem:[%s2001_s2 + $0x8] sm:$0xff] (!%p277_p2)  ;;  %v360_v6 = vld [vmem:[%s2001_s2 + $0x20] sm:$0xff] (!%p277_p2)  ;;  %v363_v7 = vld [vmem:[%s2001_s2 + $0x38] sm:$0xff] (!%p277_p2)  ;;  %p319_p3 = scmp.lt.s32.totalorder (!%p277_p2), %s1222_s23, 31 }
   0x7   : > { %384 = vperm.xlu1 (!%p277_p2), %1367, %v358_v0   ;;  %374 = vperm.xlu0 (!%p277_p2), %1366, %v356_v1   ;;  %v361_v5 = vld [vmem:[%s2001_s2 + $0x28] sm:$0xff] (!%p277_p2)  ;;  %v362_v8 = vld [vmem:[%s2001_s2 + $0x30] sm:$0xff] (!%p277_p2)  ;;  %v364_v10 = vld [vmem:[%s2001_s2 + $0x40] sm:$0xff] (!%p277_p2) }
   0x8   : > { %v365_v9 = vld [vmem:[%s2001_s2 + $0x48] sm:$0xff] (!%p277_p2)  ;;  %v367_v11 = vld [vmem:[%s2001_s2 + $0x58] sm:$0xff] (!%p277_p2)  ;;  %v366_v12 = vld [vmem:[%s2001_s2 + $0x50] sm:$0xff] (!%p277_p2) }
   0x9   : > { %v369_v13 = vld [vmem:[%s2001_s2 + $0x68] sm:$0xff] (!%p277_p2)  ;;  %v368_v14 = vld [vmem:[%s2001_s2 + $0x60] sm:$0xff] (!%p277_p2)  ;;  %v371_v15 = vld [vmem:[%s2001_s2 + $0x78] sm:$0xff] (!%p277_p2) }
   0xa   : > { %v370_v16 = vld [vmem:[%s2001_s2 + $0x70] sm:$0xff] (!%p277_p2)  ;;  %v340_v19 = vld [vmem:[%s2002_s3] sm:$0xff] (!%p277_p2)  ;;  %v341_v21 = vld [vmem:[%s2002_s3 + $0x8] sm:$0xff] (!%p277_p2) }
   0xb   : > { %389 = vperm.xlu1 (!%p277_p2), %1367, %v359_v3   ;;  %379 = vperm.xlu0 (!%p277_p2), %1366, %v357_v4   ;;  %v342_v20 = vld [vmem:[%s2002_s3 + $0x10] sm:$0xff] (!%p277_p2)  ;;  %v343_v24 = vld [vmem:[%s2002_s3 + $0x18] sm:$0xff] (!%p277_p2)  ;;  %v344_v28 = vld [vmem:[%s2002_s3 + $0x20] sm:$0xff] (!%p277_p2) }
   0xc   : > { %v345_v34 = vld [vmem:[%s2002_s3 + $0x28] sm:$0xff] (!%p277_p2)  ;;  %v346_v39 = vld [vmem:[%s2002_s3 + $0x30] sm:$0xff] (!%p277_p2)  ;;  %v347_v44 = vld [vmem:[%s2002_s3 + $0x38] sm:$0xff] (!%p277_p2) }
   0xd   : > { %v348_v49 = vld [vmem:[%s2002_s3 + $0x40] sm:$0xff]  ;;  %v349_v54 = vld [vmem:[%s2002_s3 + $0x48] sm:$0xff]  ;;  %v350_v59 = vld [vmem:[%s2002_s3 + $0x50] sm:$0xff]  ;;  %s2009_s23 = smov (!%p319_p3, %s1222_s23), 31 }
   0xe   : > { %v351_v0 = vld [vmem:[%s2002_s3 + $0x58] sm:$0xff]  ;;  %s1266_s24 = sshll.u32 %s2009_s23, 4  ;;  %s1267_s14 = sshll.u32 %s2009_s23, 5 }
   0xf   : > { %399 = vperm.xlu1 %1367, %v361_v5   ;;  %394 = vperm.xlu0 %1366, %v360_v6   ;;  %v352_v5 = vld [vmem:[%s2002_s3 + $0x60] sm:$0xff]  ;;  %s1694_s29 = scalar_lea.vmem %s1999_s0, %s1266_s24  ;;  %s1814_s17 = scalar_lea.vmem %s2000_s1, %s1267_s14 }
  0x10   : > { %s1899_s21 = scalar_lea.vmem %s2007_s8, %s1267_s14 }
  0x13   : > { %409 = vperm.xlu1 %1367, %v363_v7   ;;  %404 = vperm.xlu0 %1366, %v362_v8  }
  0x17   : > { %419 = vperm.xlu1 %1367, %v365_v9   ;;  %414 = vperm.xlu0 %1366, %v364_v10   ;;  %v353_v10 = vld [vmem:[%s2002_s3 + $0x68] sm:$0xff] }
  0x1b   : > { %429 = vperm.xlu1 %1367, %v367_v11   ;;  %424 = vperm.xlu0 %1366, %v366_v12  }
  0x1f   : > { %439 = vperm.xlu1 %1367, %v369_v13   ;;  %434 = vperm.xlu0 %1366, %v368_v14  }
  0x23   : > { %449 = vperm.xlu1 %1367, %v371_v15   ;;  %444 = vperm.xlu0 %1366, %v370_v16   ;;  %v354_v15 = vld [vmem:[%s2002_s3 + $0x70] sm:$0xff] }
  0x86   : > { %v385_v17 = vpop.permute.xlu1 %384  ;;  %v375_v18 = vpop.permute.xlu0 %374 }
  0x87   : > { %v452_v22 = vmul.f32 %v375_v18, %v340_v19  ;;  %v454_v26 = vmul.f32 %v385_v17, %v342_v20  ;;  %v355_v20 = vld [vmem:[%s2002_s3 + $0x78] sm:$0xff] }
  0x89   : > { %v469_v29 = vsel %vm468_vm0, %v452_v22, 0.0  ;;  %v472_v36 = vsel %vm468_vm0, %v454_v26, 0.0 }
  0x8a   : > { %v390_v23 = vpop.permute.xlu1 %389  ;;  %v380_v25 = vpop.permute.xlu0 %379 }
  0x8b   : > { %v453_v27 = vmul.f32 %v380_v25, %v341_v21  ;;  %v455_v30 = vmul.f32 %v390_v23, %v343_v24 }
  0x8d   : > { %v470_v31 = vsel %vm468_vm0, %v453_v27, 0.0  ;;  %v474_v40 = vsel %vm468_vm0, %v455_v30, 0.0 }
  0x8e   : > { %v471_v32 = vadd.f32 %v470_v31, %v469_v29  ;;  %v400_v33 = vpop.permute.xlu1 %399  ;;  %v395_v35 = vpop.permute.xlu0 %394 }
  0x8f   : > { %v456_v37 = vmul.f32 %v395_v35, %v344_v28  ;;  %v457_v41 = vmul.f32 %v400_v33, %v345_v34 }
  0x90   : > { %v473_v38 = vadd.f32 %v472_v36, %v471_v32 }
  0x91   : > { %v476_v46 = vsel %vm468_vm0, %v456_v37, 0.0  ;;  %v478_v50 = vsel %vm468_vm0, %v457_v41, 0.0  ;;  %v511_v41 = vld [vmem:[%s2003_s4 + $0x20] sm:$0xff] }
  0x92   : > { %v475_v42 = vadd.f32 %v474_v40, %v473_v38  ;;  %v410_v43 = vpop.permute.xlu1 %409  ;;  %v405_v45 = vpop.permute.xlu0 %404  ;;  %v508_v38 = vld [vmem:[%s2003_s4 + $0x8] sm:$0xff] }
  0x93   : > { %v458_v47 = vmul.f32 %v405_v45, %v346_v39  ;;  %v459_v51 = vmul.f32 %v410_v43, %v347_v44  ;;  %v507_v39 = vld [vmem:[%s2003_s4] sm:$0xff] }
  0x94   : > { %v477_v48 = vadd.f32 %v476_v46, %v475_v42  ;;  %v509_v42 = vld [vmem:[%s2003_s4 + $0x10] sm:$0xff] }
  0x95   : > { %v480_v56 = vsel %vm468_vm0, %v458_v47, 0.0  ;;  %v482_v60 = vsel %vm468_vm0, %v459_v51, 0.0 }
  0x96   : > { %v479_v52 = vadd.f32 %v478_v50, %v477_v48  ;;  %v420_v53 = vpop.permute.xlu1 %419  ;;  %v415_v55 = vpop.permute.xlu0 %414  ;;  %v510_v50 = vld [vmem:[%s2003_s4 + $0x18] sm:$0xff] }
  0x97   : > { %v460_v57 = vmul.f32 %v415_v55, %v348_v49  ;;  %v461_v61 = vmul.f32 %v420_v53, %v349_v54  ;;  %v513_v49 = vld [vmem:[%s2003_s4 + $0x30] sm:$0xff]  ;;  %v515_v55 = vld [vmem:[%s2003_s4 + $0x40] sm:$0xff] }
  0x98   : > { %v481_v58 = vadd.f32 %v480_v56, %v479_v52  ;;  %v512_v56 = vld [vmem:[%s2003_s4 + $0x28] sm:$0xff] }
  0x99   : > { %v484_v2 = vsel %vm468_vm0, %v460_v57, 0.0  ;;  %v486_v6 = vsel %vm468_vm0, %v461_v61, 0.0  ;;  %v517_v61 = vld [vmem:[%s2003_s4 + $0x50] sm:$0xff] }
  0x9a   : > { %v483_v62 = vadd.f32 %v482_v60, %v481_v58  ;;  %v430_v63 = vpop.permute.xlu1 %429  ;;  %v425_v1 = vpop.permute.xlu0 %424 }
  0x9b   : > { %v462_v3 = vmul.f32 %v425_v1, %v350_v59  ;;  %v463_v7 = vmul.f32 %v430_v63, %v351_v0 }
  0x9c   : > { %v485_v4 = vadd.f32 %v484_v2, %v483_v62  ;;  %v514_v62 = vld [vmem:[%s2003_s4 + $0x38] sm:$0xff] }
  0x9d   : > { %v488_v12 = vsel %vm468_vm0, %v462_v3, 0.0  ;;  %v490_v16 = vsel %vm468_vm0, %v463_v7, 0.0  ;;  %v519_v3 = vld [vmem:[%s2003_s4 + $0x60] sm:$0xff] }
  0x9e   : > { %v487_v8 = vadd.f32 %v486_v6, %v485_v4  ;;  %v440_v9 = vpop.permute.xlu1 %439  ;;  %v435_v11 = vpop.permute.xlu0 %434  ;;  %v516_v4 = vld [vmem:[%s2003_s4 + $0x48] sm:$0xff] }
  0x9f   : > { %v464_v13 = vmul.f32 %v435_v11, %v352_v5  ;;  %v465_v17 = vmul.f32 %v440_v9, %v353_v10  ;;  %v521_v9 = vld [vmem:[%s2003_s4 + $0x70] sm:$0xff]  ;;  %v518_v10 = vld [vmem:[%s2003_s4 + $0x58] sm:$0xff] }
  0xa0   : > { %v489_v14 = vadd.f32 %v488_v12, %v487_v8 }
  0xa1   : > { %v492_v22 = vsel %vm468_vm0, %v464_v13, 0.0  ;;  %v494_v25 = vsel %vm468_vm0, %v465_v17, 0.0 }
  0xa2   : > { %v491_v18 = vadd.f32 %v490_v16, %v489_v14  ;;  %v450_v19 = vpop.permute.xlu1 %449  ;;  %v445_v21 = vpop.permute.xlu0 %444 }
  0xa3   : > { %v466_v23 = vmul.f32 %v445_v21, %v354_v15  ;;  %v467_v26 = vmul.f32 %v450_v19, %v355_v20  ;;  %v520_v15 = vld [vmem:[%s2003_s4 + $0x68] sm:$0xff]  ;;  %v522_v19 = vld [vmem:[%s2003_s4 + $0x78] sm:$0xff] }
  0xa4   : > { %v493_v24 = vadd.f32 %v492_v22, %v491_v18 }
  0xa5   : > { %v496_v28 = vsel %vm468_vm0, %v466_v23, 0.0  ;;  %v498_v30 = vsel %vm468_vm0, %v467_v26, 0.0  ;;  %v1368_v23 = vld [vmem:[%s1694_s29] sm:$0xff]  }
  0xa6   : > { %v495_v27 = vadd.f32 %v494_v25, %v493_v24  ;;  %v1369_v24 = vld [vmem:[%s1694_s29 + $0x40] sm:$0xff]   ;;  %1309 = vmatprep.mubr.bf16.mxu0 %v1368_v23 }
  0xa7   : > { %1325 = vmatprep.mubr.bf16.mxu1 %v1369_v24 }
  0xa8   : > { %v497_v29 = vadd.f32 %v496_v28, %v495_v27 }
  0xaa   : > { %v499_v31 = vadd.f32 %v498_v30, %v497_v29 }
  0xac   : > { %v500_v32 = vrot.slane %v499_v31, 4 }
  0xae   : > { %v501_v33 = vadd.f32 %v500_v32, %v499_v31 }
  0xb0   : > { %v502_v34 = vrot.slane %v501_v33, 2 }
  0xb2   : > { %v503_v35 = vadd.f32 %v502_v34, %v501_v33 }
  0xb4   : > { %v504_v36 = vrot.slane %v503_v35, 1 }
  0xb6   : > { %v505_v37 = vadd.f32 %v504_v36, %v503_v35 }
  0xb8   : > { %v506_v40 = vmax.f32 %v505_v37, 0.0 }
  0xba   : > { %v524_v43 = vmul.f32 %v508_v38, %v506_v40  ;;  %v523_v44 = vmul.f32 %v507_v39, %v506_v40  ;;  %v527_v47 = vmul.f32 %v511_v41, %v506_v40  ;;  %v525_v48 = vmul.f32 %v509_v42, %v506_v40 }
  0xbb   : > { %v529_v53 = vmul.f32 %v513_v49, %v506_v40  ;;  %v526_v54 = vmul.f32 %v510_v50, %v506_v40  ;;  %v531_v59 = vmul.f32 %v515_v55, %v506_v40  ;;  %v528_v60 = vmul.f32 %v512_v56, %v506_v40 }
  0xbc   : > { %v542_v45 = vsel %vm468_vm0, %v524_v43, 0.0  ;;  %v539_v46 = vsel %vm468_vm0, %v523_v44, 0.0  ;;  %v551_v51 = vsel %vm468_vm0, %v527_v47, 0.0  ;;  %v545_v52 = vsel %vm468_vm0, %v525_v48, 0.0 }
  0xbd   : > { %543 = vadd.xlane.f32.xlu1 %v542_v45  ;;  %540 = vadd.xlane.f32.xlu0 %v539_v46  ;;  %v557_v57 = vsel %vm468_vm0, %v529_v53, 0.0  ;;  %v548_v58 = vsel %vm468_vm0, %v526_v54, 0.0  ;;  %v563_v63 = vsel %vm468_vm0, %v531_v59, 0.0  ;;  %v554_v0 = vsel %vm468_vm0, %v528_v60, 0.0 }
  0xbe   : > { %v533_v1 = vmul.f32 %v517_v61, %v506_v40  ;;  %v530_v2 = vmul.f32 %v514_v62, %v506_v40  ;;  %v535_v7 = vmul.f32 %v519_v3, %v506_v40  ;;  %v532_v8 = vmul.f32 %v516_v4, %v506_v40  ;;  %v700_v62 = vld [vmem:[%s2005_s6 + $0x8] sm:$0xff] }
  0xbf   : > { %v537_v13 = vmul.f32 %v521_v9, %v506_v40  ;;  %v534_v14 = vmul.f32 %v518_v10, %v506_v40  ;;  %v536_v18 = vmul.f32 %v520_v15, %v506_v40  ;;  %v538_v21 = vmul.f32 %v522_v19, %v506_v40  ;;  %v701_v19 = vld [vmem:[%s2005_s6 + $0x10] sm:$0xff] }
  0xc0   : > { %v569_v5 = vsel %vm468_vm0, %v533_v1, 0.0  ;;  %v560_v6 = vsel %vm468_vm0, %v530_v2, 0.0  ;;  %v575_v11 = vsel %vm468_vm0, %v535_v7, 0.0  ;;  %v566_v12 = vsel %vm468_vm0, %v532_v8, 0.0  ;;  %v699_v2 = vld [vmem:[%s2005_s6] sm:$0xff] }
  0xc1   : > { %552 = vadd.xlane.f32.xlu1 %v551_v51  ;;  %546 = vadd.xlane.f32.xlu0 %v545_v52  ;;  %v581_v16 = vsel %vm468_vm0, %v537_v13, 0.0  ;;  %v572_v17 = vsel %vm468_vm0, %v534_v14, 0.0  ;;  %v578_v20 = vsel %vm468_vm0, %v536_v18, 0.0  ;;  %v584_v22 = vsel %vm468_vm0, %v538_v21, 0.0  ;;  %v683_v7 = vld [vmem:[%s2004_s5] sm:$0xff] }
  0xc5   : > { %558 = vadd.xlane.f32.xlu1 %v557_v57  ;;  %549 = vadd.xlane.f32.xlu0 %v548_v58 }
  0xc9   : > { %564 = vadd.xlane.f32.xlu1 %v563_v63  ;;  %555 = vadd.xlane.f32.xlu0 %v554_v0 }
  0xcd   : > { %570 = vadd.xlane.f32.xlu1 %v569_v5  ;;  %561 = vadd.xlane.f32.xlu0 %v560_v6  ;;  %v684_v5 = vld [vmem:[%s2004_s5 + $0x8] sm:$0xff] }
  0xd1   : > { %576 = vadd.xlane.f32.xlu1 %v575_v11  ;;  %567 = vadd.xlane.f32.xlu0 %v566_v12 }
  0xd5   : > { %582 = vadd.xlane.f32.xlu1 %v581_v16  ;;  %573 = vadd.xlane.f32.xlu0 %v572_v17 }
  0xd9   : > { %579 = vadd.xlane.f32.xlu0 %v578_v20 }
  0xdd   : > { %585 = vadd.xlane.f32.xlu0 %v584_v22 }
 0x14a   : > { %v544_v25 = vpop.xlane.xlu1 %543  ;;  %v541_v26 = vpop.xlane.xlu0 %540 }
 0x14b   : > { %v1232_v27 = vmul.f32 -1.442695, %v544_v25  ;;  %v1231_v28 = vmul.f32 -1.442695, %v541_v26  ;;  %v702_v25 = vld [vmem:[%s2005_s6 + $0x18] sm:$0xff] }
 0x14d   : > { %1384 = vpow2.f32 %v1232_v27 }
 0x14e   : > { %1386 = vpow2.f32 %v1231_v28  ;;  %v553_v29 = vpop.xlane.xlu1 %552  ;;  %v547_v30 = vpop.xlane.xlu0 %546 }
 0x14f   : > { %v1233_v31 = vmul.f32 -1.442695, %v547_v30  ;;  %v1235_v32 = vmul.f32 -1.442695, %v553_v29  ;;  %v685_v30 = vld [vmem:[%s2004_s5 + $0x10] sm:$0xff] }
 0x151   : > { %1388 = vpow2.f32 %v1233_v31  ;;  %v686_v31 = vld [vmem:[%s2004_s5 + $0x18] sm:$0xff] }
 0x152   : > { %v559_v33 = vpop.xlane.xlu1 %558  ;;  %v550_v34 = vpop.xlane.xlu0 %549  ;;  %1390 = vpow2.f32 %v1235_v32 }
 0x153   : > { %v1237_v35 = vmul.f32 -1.442695, %v559_v33  ;;  %v1234_v36 = vmul.f32 -1.442695, %v550_v34 }
 0x155   : > { %1392 = vpow2.f32 %v1234_v36 }
 0x156   : > { %v565_v37 = vpop.xlane.xlu1 %564  ;;  %v556_v38 = vpop.xlane.xlu0 %555  ;;  %1394 = vpow2.f32 %v1237_v35 }
 0x157   : > { %v1385_v39 = vpop.eup %1384  ;;  %v1239_v40 = vmul.f32 -1.442695, %v565_v37  ;;  %v1236_v43 = vmul.f32 -1.442695, %v556_v38  ;;  %v703_v37 = vld [vmem:[%s2005_s6 + $0x20] sm:$0xff] }
 0x158   : > { %v1387_v41 = vpop.eup %1386  ;;  %v636_v42 = vadd.f32 1.0, %v1385_v39 }
 0x159   : > { %v635_v44 = vadd.f32 1.0, %v1387_v41  ;;  %1396 = vpow2.f32 %v1239_v40 }
 0x15a   : > { %1398 = vrcp.f32 %v636_v42  ;;  %v571_v45 = vpop.xlane.xlu1 %570  ;;  %v562_v46 = vpop.xlane.xlu0 %561  ;;  %v704_v42 = vld [vmem:[%s2005_s6 + $0x28] sm:$0xff] }
 0x15b   : > { %1400 = vrcp.f32 %v635_v44  ;;  %v1241_v47 = vmul.f32 -1.442695, %v571_v45  ;;  %v1389_v48 = vpop.eup %1388  ;;  %v1238_v49 = vmul.f32 -1.442695, %v562_v46 }
 0x15c   : > { %1402 = vpow2.f32 %v1236_v43  ;;  %v637_v50 = vadd.f32 1.0, %v1389_v48  ;;  %v1391_v51 = vpop.eup %1390 }
 0x15d   : > { %1404 = vpow2.f32 %v1241_v47  ;;  %v639_v58 = vadd.f32 1.0, %v1391_v51  ;;  %v705_v51 = vld [vmem:[%s2005_s6 + $0x30] sm:$0xff] }
 0x15e   : > { %v577_v52 = vpop.xlane.xlu1 %576  ;;  %v568_v53 = vpop.xlane.xlu0 %567  ;;  %1406 = vrcp.f32 %v637_v50  ;;  %v688_v50 = vld [vmem:[%s2004_s5 + $0x28] sm:$0xff] }
 0x15f   : > { %v1243_v54 = vmul.f32 -1.442695, %v577_v52  ;;  %v1393_v55 = vpop.eup %1392  ;;  %1408 = vpow2.f32 %v1238_v49  ;;  %v1240_v56 = vmul.f32 -1.442695, %v568_v53  ;;  %v687_v49 = vld [vmem:[%s2004_s5 + $0x20] sm:$0xff] }
 0x160   : > { %v1395_v57 = vpop.eup %1394  ;;  %v638_v59 = vadd.f32 1.0, %v1393_v55 }
 0x161   : > { %1410 = vpow2.f32 %v1243_v54  ;;  %v641_v4 = vadd.f32 1.0, %v1395_v57  ;;  %v706_v54 = vld [vmem:[%s2005_s6 + $0x38] sm:$0xff] }
 0x162   : > { %v583_v60 = vpop.xlane.xlu1 %582  ;;  %v574_v61 = vpop.xlane.xlu0 %573  ;;  %1412 = vrcp.f32 %v638_v59 }
 0x163   : > { %v1397_v63 = vpop.eup %1396  ;;  %v1245_v0 = vmul.f32 -1.442695, %v583_v60  ;;  %v1242_v1 = vmul.f32 -1.442695, %v574_v61  ;;  %1414 = vpow2.f32 %v1240_v56  ;;  %v689_v61 = vld [vmem:[%s2004_s5 + $0x30] sm:$0xff] }
 0x164   : > { %v1399_v3 = vpop.eup %1398  ;;  %1416 = vrcp.f32 %v639_v58  ;;  %v643_v16 = vadd.f32 1.0, %v1397_v63  ;;  %v707_v63 = vld [vmem:[%s2005_s6 + $0x40] sm:$0xff] }
 0x165   : > { %v1401_v6 = vpop.eup %1400  ;;  %v716_v8 = vmul.f32 %v1399_v3, %v700_v62  ;;  %1418 = vpow2.f32 %v1245_v0  ;;  %v690_v62 = vld [vmem:[%s2004_s5 + $0x38] sm:$0xff]  ;;  %v708_v3 = vld [vmem:[%s2005_s6 + $0x48] sm:$0xff] }
 0x166   : > { %v1403_v9 = vpop.eup %1402  ;;  %v580_v10 = vpop.xlane.xlu0 %579  ;;  %v715_v11 = vmul.f32 %v1401_v6, %v699_v2  ;;  %1420 = vpow2.f32 %v1242_v1 }
 0x167   : > { %v640_v12 = vadd.f32 1.0, %v1403_v9  ;;  %v1244_v13 = vmul.f32 -1.442695, %v580_v10  ;;  %v732_v14 = vadd.f32 %v716_v8, %v684_v5  ;;  %v1405_v15 = vpop.eup %1404  ;;  %1422 = vrcp.f32 %v641_v4  ;;  %v709_v9 = vld [vmem:[%s2005_s6 + $0x50] sm:$0xff] }
 0x168   : > { %v731_v17 = vadd.f32 %v715_v11, %v683_v7  ;;  %v1407_v18 = vpop.eup %1406  ;;  %v645_v27 = vadd.f32 1.0, %v1405_v15  ;;  %v691_v11 = vld [vmem:[%s2004_s5 + $0x40] sm:$0xff]  ;;  %v710_v15 = vld [vmem:[%s2005_s6 + $0x58] sm:$0xff] }
 0x169   : > { %1424 = vrcp.f32 %v640_v12  ;;  %v1409_v20 = vpop.eup %1408  ;;  %v717_v28 = vmul.f32 %v1407_v18, %v701_v19  ;;  %v692_v12 = vld [vmem:[%s2004_s5 + $0x48] sm:$0xff] }
 0x16a   : > { %v586_v21 = vpop.xlane.xlu0 %585  ;;  %v747_v22 = vpack.c.bf16 %v732_v14, %v731_v17  ;;  %v642_v23 = vadd.f32 1.0, %v1409_v20  ;;  %1426 = vpow2.f32 %v1244_v13 }
 0x16b   : > { %v1246_v24 = vmul.f32 -1.442695, %v586_v21  ;;  %v1411_v26 = vpop.eup %1410  ;;  %1428 = vrcp.f32 %v643_v16  ;;  %v733_v39 = vadd.f32 %v717_v28, %v685_v30  ;;  %v693_v21 = vld [vmem:[%s2004_s5 + $0x50] sm:$0xff] }
 0x16c   : > { %1293 = vmatprep.subr.bf16.mxu0 %v747_v22  ;;  %1341 = vmatprep.subr.bf16.mxu1 %v747_v22  ;;  %v1413_v29 = vpop.eup %1412  ;;  %1430 = vrcp.f32 %v642_v23  ;;  %v647_v35 = vadd.f32 1.0, %v1411_v26  ;;  %v711_v23 = vld [vmem:[%s2005_s6 + $0x60] sm:$0xff]  ;;  %v712_v26 = vld [vmem:[%s2005_s6 + $0x68] sm:$0xff] }
 0x16d   : > { %1294 = vmatpush3.bf16.msra.mxu0 %v747_v22  ;;  %1349 = vmatpush3.bf16.msra.mxu1 %v747_v22  ;;  %v1415_v32 = vpop.eup %1414  ;;  %v718_v33 = vmul.f32 %v1413_v29, %v702_v25  ;;  %1432 = vpow2.f32 %v1246_v24  ;;  %v694_v22 = vld [vmem:[%s2004_s5 + $0x58] sm:$0xff] }
 0x16e   : > { %v1417_v34 = vpop.eup %1416  ;;  %v644_v36 = vadd.f32 1.0, %v1415_v32  ;;  %1434 = vrcp.f32 %v645_v27  ;;  %v695_v32 = vld [vmem:[%s2004_s5 + $0x60] sm:$0xff] }
 0x16f   : > { %v1419_v38 = vpop.eup %1418  ;;  %v734_v40 = vadd.f32 %v718_v33, %v686_v31  ;;  %v719_v46 = vmul.f32 %v1417_v34, %v703_v37  ;;  %v696_v33 = vld [vmem:[%s2004_s5 + $0x68] sm:$0xff]  ;;  %v713_v34 = vld [vmem:[%s2005_s6 + $0x70] sm:$0xff]  ;;  %v714_v37 = vld [vmem:[%s2005_s6 + $0x78] sm:$0xff] }
 0x170   : > { %v1421_v41 = vpop.eup %1420  ;;  %1436 = vrcp.f32 %v644_v36  ;;  %v649_v48 = vadd.f32 1.0, %v1419_v38 }
 0x171   : > { %v1423_v43 = vpop.eup %1422  ;;  %v646_v44 = vadd.f32 1.0, %v1421_v41  ;;  %v748_v45 = vpack.c.bf16 %v734_v40, %v733_v39  ;;  %1438 = vrcp.f32 %v647_v35  ;;  %v735_v57 = vadd.f32 %v719_v46, %v687_v49  ;;  %v1370_v49 = vld [vmem:[%s1694_s29 + $0x8] sm:$0xff]  }
 0x172   : > { %v721_v59 = vmul.f32 %v1423_v43, %v705_v51  ;;  %v698_v43 = vld [vmem:[%s2004_s5 + $0x78] sm:$0xff]  ;;  %v1372_v51 = vld [vmem:[%s1694_s29 + $0x10] sm:$0xff]  }
 0x173   : > { %v1425_v47 = vpop.eup %1424  ;;  %1440 = vrcp.f32 %v646_v44  ;;  %1295 = vmatprep.subr.bf16.mxu0 %v748_v45  ;;  %1342 = vmatprep.subr.bf16.mxu1 %v748_v45 }
 0x174   : > { %v720_v52 = vmul.f32 %v1425_v47, %v704_v42  ;;  %v1427_v53 = vpop.eup %1426  ;;  %1296 = vmatpush3.bf16.msra.mxu0 %v748_v45  ;;  %1350 = vmatpush3.bf16.msra.mxu1 %v748_v45  ;;  %1442 = vrcp.f32 %v649_v48  ;;  %v737_v6 = vadd.f32 %v721_v59, %v689_v61  ;;  %v697_v42 = vld [vmem:[%s2004_s5 + $0x70] sm:$0xff]  ;;  %v1382_v61 = vld [vmem:[%s1694_s29 + $0x38] sm:$0xff]  }
 0x175   : > { %v1429_v55 = vpop.eup %1428  ;;  %v648_v56 = vadd.f32 1.0, %v1427_v53  ;;  %v1374_v53 = vld [vmem:[%s1694_s29 + $0x18] sm:$0xff]   ;;  %v1380_v59 = vld [vmem:[%s1694_s29 + $0x30] sm:$0xff]  }
 0x176   : > { %v736_v58 = vadd.f32 %v720_v52, %v688_v50  ;;  %v1431_v60 = vpop.eup %1430  ;;  %v723_v8 = vmul.f32 %v1429_v55, %v707_v63  ;;  %v1371_v50 = vld [vmem:[%s1694_s29 + $0x48] sm:$0xff]   ;;  %v1373_v52 = vld [vmem:[%s1694_s29 + $0x50] sm:$0xff]   ;;  %v1376_v55 = vld [vmem:[%s1694_s29 + $0x20] sm:$0xff]  }
 0x177   : > { %1444 = vrcp.f32 %v648_v56  ;;  %v722_v1 = vmul.f32 %v1431_v60, %v706_v54  ;;  %v1433_v2 = vpop.eup %1432  ;;  %v1375_v54 = vld [vmem:[%s1694_s29 + $0x58] sm:$0xff]   ;;  %v1377_v56 = vld [vmem:[%s1694_s29 + $0x60] sm:$0xff]   ;;  %v1381_v60 = vld [vmem:[%s1694_s29 + $0x70] sm:$0xff]  }
 0x178   : > { %v749_v0 = vpack.c.bf16 %v736_v58, %v735_v57  ;;  %v1435_v4 = vpop.eup %1434  ;;  %v650_v5 = vadd.f32 1.0, %v1433_v2  ;;  %v739_v19 = vadd.f32 %v723_v8, %v691_v11  ;;  %v1378_v57 = vld [vmem:[%s1694_s29 + $0x28] sm:$0xff]   ;;  %v1819_v63 = vld [vmem:[%s2006_s7] ss:$0 sm:$0xff]  ;;  %v1833_v11 = vld [vmem:[%s1814_s17 + $0xb0] sm:$0xff] }
 0x179   : > { %v738_v7 = vadd.f32 %v722_v1, %v690_v62  ;;  %v725_v17 = vmul.f32 %v1435_v4, %v709_v9  ;;  %v1379_v58 = vld [vmem:[%s1694_s29 + $0x68] sm:$0xff]   ;;  %v1383_v62 = vld [vmem:[%s1694_s29 + $0x78] sm:$0xff]   ;;  %v1069_v1 = vld [vmem:[%s1814_s17 + $0x90] sm:$0xff] }
 0x17a   : > { %1297 = vmatprep.subr.bf16.mxu0 %v749_v0  ;;  %1343 = vmatprep.subr.bf16.mxu1 %v749_v0  ;;  %v1437_v10 = vpop.eup %1436  ;;  %1446 = vrcp.f32 %v650_v5  ;;  %v1051_v2 = vld [vmem:[%s1814_s17] sm:$0xff]  ;;  %v1052_v8 = vld [vmem:[%s1814_s17 + $0x8] sm:$0xff] }
 0x17b   : > { %1298 = vmatpush3.bf16.msra.mxu0 %v749_v0  ;;  %1351 = vmatpush3.bf16.msra.mxu1 %v749_v0  ;;  %v750_v13 = vpack.c.bf16 %v738_v7, %v737_v6  ;;  %v724_v14 = vmul.f32 %v1437_v10, %v708_v3  ;;  %v1439_v16 = vpop.eup %1438  ;;  %v741_v28 = vadd.f32 %v725_v17, %v693_v21  ;;  %v1053_v0 = vld [vmem:[%s1814_s17 + $0x10] sm:$0xff]  ;;  %v1067_v3 = vld [vmem:[%s1814_s17 + $0x80] sm:$0xff]  ;;  %v1054_v6 = vld [vmem:[%s1814_s17 + $0x18] sm:$0xff] }
 0x17c   : > { %v727_v30 = vmul.f32 %v1439_v16, %v711_v23  ;;  %v1070_v7 = vld [vmem:[%s1814_s17 + $0x98] sm:$0xff]  ;;  %v1068_v9 = vld [vmem:[%s1814_s17 + $0x88] sm:$0xff]  ;;  %v1830_v10 = vld [vmem:[%s1814_s17 + $0x30] sm:$0xff] }
 0x17d   : > { %v1441_v18 = vpop.eup %1440  ;;  %1299 = vmatprep.subr.bf16.mxu0 %v750_v13  ;;  %1344 = vmatprep.subr.bf16.mxu1 %v750_v13  ;;  %v740_v20 = vadd.f32 %v724_v14, %v692_v12  ;;  %v1836_v12 = vld [vmem:[%s1814_s17 + $0x20] sm:$0xff]  ;;  %v1842_v14 = vld [vmem:[%s1814_s17 + $0x38] sm:$0xff]  ;;  %v1848_v16 = vld [vmem:[%s1814_s17 + $0x28] sm:$0xff] }
 0x17e   : > { %v726_v24 = vmul.f32 %v1441_v18, %v710_v15  ;;  %v1443_v27 = vpop.eup %1442  ;;  %v743_v38 = vadd.f32 %v727_v30, %v695_v32  ;;  %v1845_v15 = vld [vmem:[%s1814_s17 + $0xb8] sm:$0xff]  ;;  %v1851_v17 = vld [vmem:[%s1814_s17 + $0xa8] sm:$0xff]  ;;  %v1854_v18 = vld [vmem:[%s1814_s17 + $0x50] sm:$0xff] }
 0x17f   : > { %1300 = vmatpush3.bf16.msra.mxu0 %v750_v13  ;;  %1352 = vmatpush3.bf16.msra.mxu1 %v750_v13  ;;  %v751_v25 = vpack.c.bf16 %v740_v20, %v739_v19  ;;  %v729_v40 = vmul.f32 %v1443_v27, %v713_v34  ;;  %v1839_v13 = vld [vmem:[%s1814_s17 + $0xa0] sm:$0xff]  ;;  %v1857_v19 = vld [vmem:[%s1814_s17 + $0xd0] sm:$0xff]  ;;  %v1869_v23 = vld [vmem:[%s1814_s17 + $0xd8] sm:$0xff] }
 0x180   : > { %v742_v29 = vadd.f32 %v726_v24, %v694_v22  ;;  %v1860_v20 = vld [vmem:[%s1814_s17 + $0x40] sm:$0xff]  ;;  %v1866_v22 = vld [vmem:[%s1814_s17 + $0x58] sm:$0xff]  ;;  %v1872_v24 = vld [vmem:[%s1814_s17 + $0x48] sm:$0xff] }
 0x181   : > { %v1445_v31 = vpop.eup %1444  ;;  %1301 = vmatprep.subr.bf16.mxu0 %v751_v25  ;;  %1345 = vmatprep.subr.bf16.mxu1 %v751_v25  ;;  %v745_v46 = vadd.f32 %v729_v40, %v697_v42  ;;  %v1863_v21 = vld [vmem:[%s1814_s17 + $0xc0] sm:$0xff]  ;;  %v1881_v27 = vld [vmem:[%s1814_s17 + $0xf0] sm:$0xff]  ;;  %v1892_v34 = vld [vmem:[%s1814_s17 + $0x78] sm:$0xff] }
 0x182   : > { %v752_v35 = vpack.c.bf16 %v742_v29, %v741_v28  ;;  %v728_v36 = vmul.f32 %v1445_v31, %v712_v26  ;;  %v1878_v26 = vld [vmem:[%s1814_s17 + $0x70] sm:$0xff]  ;;  %v1886_v32 = vld [vmem:[%s1814_s17 + $0x60] sm:$0xff]  ;;  %v1907_v40 = vld [vmem:[%s1814_s17 + $0x68] sm:$0xff] }
 0x183   : > { %1302 = vmatpush3.bf16.msra.mxu0 %v751_v25  ;;  %1353 = vmatpush3.bf16.msra.mxu1 %v751_v25  ;;  %v1875_v25 = vld [vmem:[%s1814_s17 + $0xc8] sm:$0xff] }
 0x184   : > { %1303 = vmatprep.subr.bf16.mxu0 %v752_v35  ;;  %1346 = vmatprep.subr.bf16.mxu1 %v752_v35  ;;  %v744_v39 = vadd.f32 %v728_v36, %v696_v33  ;;  %v1447_v41 = vpop.eup %1446  ;;  %v1889_v33 = vld [vmem:[%s1814_s17 + $0xe0] sm:$0xff] }
 0x185   : > { %v730_v45 = vmul.f32 %v1447_v41, %v714_v37  ;;  %v1910_v41 = vld [vmem:[%s1814_s17 + $0xe8] sm:$0xff] }
 0x186   : > { %v753_v44 = vpack.c.bf16 %v744_v39, %v743_v38  ;;  %v1904_v39 = vld [vmem:[%s1814_s17 + $0xf8] sm:$0xff] }
 0x187   : > { %1304 = vmatpush3.bf16.msra.mxu0 %v752_v35  ;;  %1354 = vmatpush3.bf16.msra.mxu1 %v752_v35  ;;  %v746_v47 = vadd.f32 %v730_v45, %v698_v43 }
 0x188   : > { %1305 = vmatprep.subr.bf16.mxu0 %v753_v44  ;;  %1347 = vmatprep.subr.bf16.mxu1 %v753_v44 }
 0x189   : > { %v754_v48 = vpack.c.bf16 %v746_v47, %v745_v46 }
 0x18b   : > { %1306 = vmatpush3.bf16.msra.mxu0 %v753_v44  ;;  %1355 = vmatpush3.bf16.msra.mxu1 %v753_v44 }
 0x18c   : > { %1307 = vmatprep.subr.bf16.mxu0 %v754_v48  ;;  %1348 = vmatprep.subr.bf16.mxu1 %v754_v48 }
 0x18f   : > { %1308 = vmatpush3.bf16.msra.mxu0 %v754_v48  ;;  %1356 = vmatpush3.bf16.msra.mxu1 %v754_v48 }
 0x192   : > { %1310 = vmatmul.mubr.bf16.vlgmr.msra.gmra.mrb[0].mxu0 %v1370_v49  ;;  %1326 = vmatmul.mubr.bf16.vlgmr.msra.gmra.mrb[0].mxu1 %v1371_v50 }
 0x193   : > { %1313 = vmatprep.mubr.bf16.mxu0 %v1372_v51  ;;  %1329 = vmatprep.mubr.bf16.mxu1 %v1373_v52 }
 0x19a   : > { %1314 = vmatmul.mubr.bf16.gmra.mrb[4].mxu0 %v1374_v53  ;;  %1330 = vmatmul.mubr.bf16.gmra.mrb[4].mxu1 %v1375_v54 }
 0x19b   : > { %1317 = vmatprep.mubr.bf16.mxu0 %v1376_v55  ;;  %1333 = vmatprep.mubr.bf16.mxu1 %v1377_v56 }
 0x1a2   : > { %1318 = vmatmul.mubr.bf16.gmra.mrb[8].mxu0 %v1378_v57  ;;  %1334 = vmatmul.mubr.bf16.gmra.mrb[8].mxu1 %v1379_v58 }
 0x1a3   : > { %1321 = vmatprep.mubr.bf16.mxu0 %v1380_v59  ;;  %1337 = vmatprep.mubr.bf16.mxu1 %v1381_v60 }
 0x1aa   : > { %1322 = vmatmul.mubr.bf16.gmra.mrb[12].mxu0 %v1382_v61  ;;  %1338 = vmatmul.mubr.bf16.gmra.mrb[12].mxu1 %v1383_v62 }
 0x265   : > { %v1311_v4 = vpop.f32.mrb[0].mxu0  ;;  %v1327_v5 = vpop.f32.mrb[0].mxu1 }
 0x266   : > { %v933_v28 = vadd.f32 %v1311_v4, %v1819_v63  ;;  %v997_v29 = vadd.f32 %v1327_v5, %v1819_v63  ;;  %v924_v30 = vpop.f32.mrb[1].mxu0  ;;  %v988_v31 = vpop.f32.mrb[1].mxu1 }
 0x267   : > { %v925_v35 = vadd.f32 %v1819_v63, %v924_v30  ;;  %v989_v36 = vadd.f32 %v1819_v63, %v988_v31  ;;  %v1312_v37 = vpop.f32.mrb[2].mxu0  ;;  %v1328_v38 = vpop.f32.mrb[2].mxu1 }
 0x268   : > { %v1085_v42 = vadd.f32 %v1053_v0, %v933_v28  ;;  %v1101_v43 = vadd.f32 %v1069_v1, %v997_v29  ;;  %v936_v44 = vadd.f32 %v1312_v37, %v1819_v63  ;;  %v1000_v45 = vadd.f32 %v1328_v38, %v1819_v63  ;;  %v927_v46 = vpop.f32.mrb[3].mxu0  ;;  %v991_v47 = vpop.f32.mrb[3].mxu1 }
 0x269   : > { %v1083_v48 = vadd.f32 %v1051_v2, %v925_v35  ;;  %v1099_v49 = vadd.f32 %v1067_v3, %v989_v36  ;;  %v928_v50 = vadd.f32 %v1819_v63, %v927_v46  ;;  %v992_v51 = vadd.f32 %v1819_v63, %v991_v47 }
 0x26a   : > { %v1086_v52 = vadd.f32 %v1054_v6, %v936_v44  ;;  %v1102_v53 = vadd.f32 %v1070_v7, %v1000_v45  ;;  %1117 = vst [vmem:[%s1899_s21 + $0x10] sm:$0xff] %v1085_v42  ;;  %1133 = vst [vmem:[%s1899_s21 + $0x90] sm:$0xff] %v1101_v43 }
 0x26b   : > { %v1084_v54 = vadd.f32 %v1052_v8, %v928_v50  ;;  %v1100_v55 = vadd.f32 %v1068_v9, %v992_v51  ;;  %1115 = vst [vmem:[%s1899_s21] sm:$0xff] %v1083_v48  ;;  %1131 = vst [vmem:[%s1899_s21 + $0x80] sm:$0xff] %v1099_v49 }
 0x26c   : > { %1118 = vst [vmem:[%s1899_s21 + $0x18] sm:$0xff] %v1086_v52  ;;  %1134 = vst [vmem:[%s1899_s21 + $0x98] sm:$0xff] %v1102_v53 }
 0x26d   : > { %v1315_v56 = vpop.f32.mrb[4].mxu0  ;;  %v1331_v57 = vpop.f32.mrb[4].mxu1  ;;  %1116 = vst [vmem:[%s1899_s21 + $0x8] sm:$0xff] %v1084_v54  ;;  %1132 = vst [vmem:[%s1899_s21 + $0x88] sm:$0xff] %v1100_v55 }
 0x26e   : > { %v949_v58 = vadd.f32 %v1315_v56, %v1819_v63  ;;  %v1013_v59 = vadd.f32 %v1331_v57, %v1819_v63  ;;  %v940_v60 = vpop.f32.mrb[5].mxu0  ;;  %v1004_v61 = vpop.f32.mrb[5].mxu1 }
 0x26f   : > { %v941_v62 = vadd.f32 %v1819_v63, %v940_v60  ;;  %v1005_v0 = vadd.f32 %v1819_v63, %v1004_v61  ;;  %v1316_v1 = vpop.f32.mrb[6].mxu0  ;;  %v1332_v2 = vpop.f32.mrb[6].mxu1 }
 0x270   : > { %v1089_v3 = vadd.f32 %v1830_v10, %v949_v58  ;;  %v1105_v4 = vadd.f32 %v1833_v11, %v1013_v59  ;;  %v952_v5 = vadd.f32 %v1316_v1, %v1819_v63  ;;  %v1016_v6 = vadd.f32 %v1332_v2, %v1819_v63  ;;  %v943_v7 = vpop.f32.mrb[7].mxu0  ;;  %v1007_v8 = vpop.f32.mrb[7].mxu1 }
 0x271   : > { %v1087_v9 = vadd.f32 %v1836_v12, %v941_v62  ;;  %v1103_v28 = vadd.f32 %v1839_v13, %v1005_v0  ;;  %v944_v10 = vadd.f32 %v1819_v63, %v943_v7  ;;  %v1008_v29 = vadd.f32 %v1819_v63, %v1007_v8 }
 0x272   : > { %v1090_v11 = vadd.f32 %v1842_v14, %v952_v5  ;;  %v1106_v30 = vadd.f32 %v1845_v15, %v1016_v6  ;;  %1121 = vst [vmem:[%s1899_s21 + $0x30] sm:$0xff] %v1089_v3  ;;  %1137 = vst [vmem:[%s1899_s21 + $0xb0] sm:$0xff] %v1105_v4 }
 0x273   : > { %v1088_v31 = vadd.f32 %v1848_v16, %v944_v10  ;;  %v1104_v35 = vadd.f32 %v1851_v17, %v1008_v29  ;;  %1119 = vst [vmem:[%s1899_s21 + $0x20] sm:$0xff] %v1087_v9  ;;  %1135 = vst [vmem:[%s1899_s21 + $0xa0] sm:$0xff] %v1103_v28 }
 0x274   : > { %1122 = vst [vmem:[%s1899_s21 + $0x38] sm:$0xff] %v1090_v11  ;;  %1138 = vst [vmem:[%s1899_s21 + $0xb8] sm:$0xff] %v1106_v30 }
 0x275   : > { %v1319_v12 = vpop.f32.mrb[8].mxu0  ;;  %v1335_v13 = vpop.f32.mrb[8].mxu1  ;;  %1120 = vst [vmem:[%s1899_s21 + $0x28] sm:$0xff] %v1088_v31  ;;  %1136 = vst [vmem:[%s1899_s21 + $0xa8] sm:$0xff] %v1104_v35 }
 0x276   : > { %v965_v36 = vadd.f32 %v1319_v12, %v1819_v63  ;;  %v1029_v14 = vadd.f32 %v1335_v13, %v1819_v63  ;;  %v956_v37 = vpop.f32.mrb[9].mxu0  ;;  %v1020_v15 = vpop.f32.mrb[9].mxu1 }
 0x277   : > { %v957_v38 = vadd.f32 %v1819_v63, %v956_v37  ;;  %v1021_v16 = vadd.f32 %v1819_v63, %v1020_v15  ;;  %v1320_v17 = vpop.f32.mrb[10].mxu0  ;;  %v1336_v42 = vpop.f32.mrb[10].mxu1 }
 0x278   : > { %v1093_v43 = vadd.f32 %v1854_v18, %v965_v36  ;;  %v1109_v44 = vadd.f32 %v1857_v19, %v1029_v14  ;;  %v968_v45 = vadd.f32 %v1320_v17, %v1819_v63  ;;  %v1032_v46 = vadd.f32 %v1336_v42, %v1819_v63  ;;  %v959_v47 = vpop.f32.mrb[11].mxu0  ;;  %v1023_v48 = vpop.f32.mrb[11].mxu1 }
 0x279   : > { %v1091_v49 = vadd.f32 %v1860_v20, %v957_v38  ;;  %v1107_v50 = vadd.f32 %v1863_v21, %v1021_v16  ;;  %v960_v18 = vadd.f32 %v1819_v63, %v959_v47  ;;  %v1024_v51 = vadd.f32 %v1819_v63, %v1023_v48 }
 0x27a   : > { %v1094_v19 = vadd.f32 %v1866_v22, %v968_v45  ;;  %v1110_v52 = vadd.f32 %v1869_v23, %v1032_v46  ;;  %1125 = vst [vmem:[%s1899_s21 + $0x50] sm:$0xff] %v1093_v43  ;;  %1141 = vst [vmem:[%s1899_s21 + $0xd0] sm:$0xff] %v1109_v44 }
 0x27b   : > { %v1092_v53 = vadd.f32 %v1872_v24, %v960_v18  ;;  %v1108_v54 = vadd.f32 %v1875_v25, %v1024_v51  ;;  %1123 = vst [vmem:[%s1899_s21 + $0x40] sm:$0xff] %v1091_v49  ;;  %1139 = vst [vmem:[%s1899_s21 + $0xc0] sm:$0xff] %v1107_v50 }
 0x27c   : > { %1126 = vst [vmem:[%s1899_s21 + $0x58] sm:$0xff] %v1094_v19  ;;  %1142 = vst [vmem:[%s1899_s21 + $0xd8] sm:$0xff] %v1110_v52 }
 0x27d   : > { %v1323_v20 = vpop.f32.mrb[12].mxu0  ;;  %v1339_v21 = vpop.f32.mrb[12].mxu1  ;;  %1124 = vst [vmem:[%s1899_s21 + $0x48] sm:$0xff] %v1092_v53  ;;  %1140 = vst [vmem:[%s1899_s21 + $0xc8] sm:$0xff] %v1108_v54 }
 0x27e   : > { %v981_v55 = vadd.f32 %v1323_v20, %v1819_v63  ;;  %v1045_v22 = vadd.f32 %v1339_v21, %v1819_v63  ;;  %v972_v56 = vpop.f32.mrb[13].mxu0  ;;  %v1036_v23 = vpop.f32.mrb[13].mxu1 }
 0x27f   : > { %v973_v57 = vadd.f32 %v1819_v63, %v972_v56  ;;  %v1037_v24 = vadd.f32 %v1819_v63, %v1036_v23  ;;  %v1324_v25 = vpop.f32.mrb[14].mxu0  ;;  %v1340_v58 = vpop.f32.mrb[14].mxu1 }
 0x280   : > { %v1097_v59 = vadd.f32 %v1878_v26, %v981_v55  ;;  %v1113_v60 = vadd.f32 %v1881_v27, %v1045_v22  ;;  %v984_v61 = vadd.f32 %v1324_v25, %v1819_v63  ;;  %v1048_v62 = vadd.f32 %v1340_v58, %v1819_v63  ;;  %v975_v0 = vpop.f32.mrb[15].mxu0  ;;  %v1039_v1 = vpop.f32.mrb[15].mxu1 }
 0x281   : > { %v1095_v2 = vadd.f32 %v1886_v32, %v973_v57  ;;  %v1111_v3 = vadd.f32 %v1889_v33, %v1037_v24  ;;  %v976_v26 = vadd.f32 %v1819_v63, %v975_v0  ;;  %v1040_v4 = vadd.f32 %v1819_v63, %v1039_v1 }
 0x282   : > { %v1098_v27 = vadd.f32 %v1892_v34, %v984_v61  ;;  %v1114_v5 = vadd.f32 %v1904_v39, %v1048_v62  ;;  %1129 = vst [vmem:[%s1899_s21 + $0x70] sm:$0xff] %v1097_v59  ;;  %1145 = vst [vmem:[%s1899_s21 + $0xf0] sm:$0xff] %v1113_v60 }
 0x283   : > { %v1096_v6 = vadd.f32 %v1907_v40, %v976_v26  ;;  %v1112_v7 = vadd.f32 %v1910_v41, %v1040_v4  ;;  %1127 = vst [vmem:[%s1899_s21 + $0x60] sm:$0xff] %v1095_v2  ;;  %1143 = vst [vmem:[%s1899_s21 + $0xe0] sm:$0xff] %v1111_v3 }
 0x284   : > { %1130 = vst [vmem:[%s1899_s21 + $0x78] sm:$0xff] %v1098_v27  ;;  %1146 = vst [vmem:[%s1899_s21 + $0xf8] sm:$0xff] %v1114_v5 }
 0x285   : > { %1128 = vst [vmem:[%s1899_s21 + $0x68] sm:$0xff] %v1096_v6  ;;  %1144 = vst [vmem:[%s1899_s21 + $0xe8] sm:$0xff] %v1112_v7 }
 0x286 PF: > { %s18_s27 = sadd.s32 1, %s1454_s27  }
 0x287   : > { %p15_p4 = scmp.ge.s32.totalorder %s18_s27, 6  }
 0x289   :  { %17 = sbr.rel (!%p15_p4) target bundleno = 1 (0x1), region = 85 }

// kernel: carb_forward.2
= control target key start
LH: loop header
LB: loop body
LE: loop exit
PB: predicated region body
PF: predicated region fallthrough
CT: control target
= control target key end

     0   :  { %s7070_s24 = smov 0   ;;  %s8939_s0 = inlined_call_operand.vmem [shape: f32[36,36,128], index: 0, kind: input, shape index: {}, may-alias: {0,1}]   ;;  %s8940_s1 = inlined_call_operand.vmem [shape: f32[36,36,128], index: 1, kind: input, shape index: {}, may-alias: {0,1}]   ;;  %s8941_s2 = inlined_call_operand.vmem [shape: bf16[3,384,128], index: 2, kind: input, shape index: {}]   ;;  %s8942_s3 = inlined_call_operand.vmem [shape: f32[1,128], index: 3, kind: input, shape index: {}]   ;;  %s8943_s4 = inlined_call_operand.vmem [shape: bf16[3,384,128], index: 4, kind: input, shape index: {}]   ;;  %s8944_s5 = inlined_call_operand.vmem [shape: f32[1,128], index: 5, kind: input, shape index: {}]   ;;  %s8945_s6 = inlined_call_operand.vmem [shape: bf16[32,32,128], index: 6, kind: output, shape index: {0}]   ;;  %s8946_s7 = inlined_call_operand.vmem [shape: f32[4,1,128], index: 7, kind: output, shape index: {1}]  }
   0x1 LB: > { %s7076_s25 = sadd.s32 4294967295, %s7024_s24   ;;  %p5344_p0 = scmp.ge.s32.totalorder %s7024_s24, 1  ;;  %s7024_s24 = sphi %s7070_s24, %s18_s24  }
   0x2   : > { %p272_p1 = scmp.lt.s32.totalorder %s7024_s24, 5 }
   0x4   : > { %p273_p2 = pnand %p5344_p0, %p272_p1 }
   0x6   : > { %276 = sbr.rel (%p273_p2) target bundleno = 1263 (0x4ef), region = 44 }
   0xd   : > { %p357_p3 = scmp.lt.s32.totalorder %s7076_s25, 3  ;;  %v7026_v0 = vmov 0   ;;  %v6874_v1 = vld [vmem:[%s8941_s2 + $0xc0] sm:$0xff]   ;;  %s7086_s28 = sshll.u32 %s7076_s25, 3  ;;  %v6875_v2 = vld [vmem:[%s8941_s2 + $0xc8] sm:$0xff]   ;;  %v6876_v5 = vld [vmem:[%s8941_s2 + $0xd0] sm:$0xff]  }
   0xe   : > { %1084 = vmatprep.subr.bf16.mxu0 %v7026_v0  ;;  %p328_p4 = scmp.lt.s32.totalorder %s7086_s28, 35  ;;  %v6877_v3 = vld [vmem:[%s8941_s2 + $0x140] sm:$0xff]   ;;  %p351_p5 = scmp.lt.s32.totalorder %s7086_s28, 31  ;;  %v6879_v4 = vld [vmem:[%s8941_s2 + $0x148] sm:$0xff]   ;;  %v6881_v6 = vld [vmem:[%s8941_s2 + $0x150] sm:$0xff]  }
   0xf   : > { %s7089_s29 = scalar_select %p357_p3, %s7076_s25, 3  ;;  %1085 = vmatpush1.bf16.msra.mxu0 %v6874_v1  ;;  %6356 = vmatprep.subr.bf16.mxu1 %v6877_v3  ;;  %v6878_v7 = vld [vmem:[%s8941_s2 + $0xd8] sm:$0xff]   ;;  %v6880_v9 = vld [vmem:[%s8941_s2 + $0xe0] sm:$0xff]   ;;  %v6882_v11 = vld [vmem:[%s8941_s2 + $0xe8] sm:$0xff]  }
  0x10   : > { %1086 = vmatprep.subr.bf16.mxu0 %v7026_v0  ;;  %s352_s16 = scalar_select %p351_p5, %s7086_s28, 31  ;;  %6357 = vmatpush3.bf16.msra.mxu1 %v6877_v3  ;;  %v6883_v8 = vld [vmem:[%s8941_s2 + $0x158] sm:$0xff]   ;;  %v6885_v10 = vld [vmem:[%s8941_s2 + $0x160] sm:$0xff]   ;;  %v6887_v12 = vld [vmem:[%s8941_s2 + $0x168] sm:$0xff]  }
  0x11   : > { %s359_s11 = scalar_lea.vmem %s8946_s7, %s7089_s29  ;;  %6358 = vmatprep.subr.bf16.mxu1 %v6879_v4  ;;  %v6884_v18 = vld [vmem:[%s8941_s2 + $0xf0] sm:$0xff]   ;;  %v6886_v25 = vld [vmem:[%s8941_s2 + $0xf8] sm:$0xff]   ;;  %v6888_v35 = vld [vmem:[%s8941_s2 + $0x100] sm:$0xff]   ;;  %s5848_s10 = sadd.s32 8, %s7086_s28 }
  0x12   : > { %s329_s19 = scalar_select %p328_p4, %s7086_s28, 35  ;;  %v6889_v19 = vld [vmem:[%s8941_s2 + $0x170] sm:$0xff]   ;;  %v6891_v30 = vld [vmem:[%s8941_s2 + $0x178] sm:$0xff]   ;;  %v6890_v44 = vld [vmem:[%s8941_s2 + $0x108] sm:$0xff]  }
  0x13   : > { %1087 = vmatpush1.bf16.msra.mxu0 %v6875_v2  ;;  %s5734_s22 = sshll.u32 %s352_s16, 4  ;;  %v7186_v46 = vld [vmem:[%s8941_s2] sm:$0xff]   ;;  %v6892_v50 = vld [vmem:[%s8941_s2 + $0x110] sm:$0xff]   ;;  %v7201_v56 = vld [vmem:[%s8941_s2 + $0x8] sm:$0xff]   ;;  %p7228_p6 = scmp.lt.s32.totalorder %s5848_s10, 35 }
  0x14   : > { %1088 = vmatprep.subr.bf16.mxu0 %v7026_v0  ;;  %s7119_s27 = scalar_lea.vmem %s8945_s6, %s5734_s22  ;;  %6359 = vmatpush3.bf16.msra.mxu1 %v6879_v4  ;;  %s6860_s12 = smul.u32 40, %s329_s19  ;;  %v6893_v58 = vld [vmem:[%s8941_s2 + $0x118] sm:$0xff]   ;;  %v7220_v3 = vld [vmem:[%s8941_s2 + $0x10] sm:$0xff]   ;;  %v6894_v4 = vld [vmem:[%s8941_s2 + $0x120] sm:$0xff]  }
  0x15   : > { %6360 = vmatprep.subr.bf16.mxu1 %v6881_v6  ;;  %s9025_s10 = smov (!%p7228_p6, %s5848_s10), 35  ;;  %p5522_p7 = scmp.ne.s32.totalorder %s7076_s25, 0 }
  0x16   : > { %s7138_s20 = scalar_lea.vmem %s8939_s0, %s6860_s12  ;;  %s6861_s30 = smul.u32 40, %s9025_s10 }
  0x17   : > { %1089 = vmatpush1.bf16.msra.mxu0 %v6876_v5  ;;  %v366_v13 = vld [vmem:[%s7138_s20 + $0x28] sm:$0xff]  ;;  %v367_v14 = vld [vmem:[%s7138_s20 + $0x30] sm:$0xff]  ;;  %v368_v15 = vld [vmem:[%s7138_s20 + $0x38] sm:$0xff] }
  0x18   : > { %1090 = vmatprep.subr.bf16.mxu0 %v7026_v0  ;;  %6361 = vmatpush3.bf16.msra.mxu1 %v6881_v6  ;;  %406 = vst [vmem:[#allocation2 + $0x28] sm:$0xff] %v366_v13  ;;  %407 = vst [vmem:[#allocation2 + $0x30] sm:$0xff] %v367_v14  ;;  %v369_v16 = vld [vmem:[%s7138_s20 + $0x40] sm:$0xff]  ;;  %v370_v17 = vld [vmem:[%s7138_s20 + $0x48] sm:$0xf]  ;;  %s7282_s13 = scalar_lea.vmem %s8940_s1, %s6861_s30 }
  0x19   : > { %6362 = vmatprep.subr.bf16.mxu1 %v6883_v8  ;;  %408 = vst [vmem:[#allocation2 + $0x38] sm:$0xff] %v368_v15  ;;  %409 = vst [vmem:[#allocation2 + $0x40] sm:$0xff] %v369_v16  ;;  %v371_v20 = vld [vmem:[%s7138_s20 + $0x50] sm:$0xff]  ;;  %v372_v21 = vld [vmem:[%s7138_s20 + $0x58] sm:$0xff] }
  0x1a   : > { %410 = vst [vmem:[#allocation2 + $0x48] sm:$0xf] %v370_v17  ;;  %v373_v22 = vld [vmem:[%s7138_s20 + $0x60] sm:$0xff]  ;;  %411 = vst [vmem:[#allocation2 + $0x50] sm:$0xff] %v371_v20  ;;  %v374_v23 = vld [vmem:[%s7138_s20 + $0x68] sm:$0xff] }
  0x1b   : > { %1091 = vmatpush1.bf16.msra.mxu0 %v6878_v7  ;;  %412 = vst [vmem:[#allocation2 + $0x58] sm:$0xff] %v372_v21  ;;  %413 = vst [vmem:[#allocation2 + $0x60] sm:$0xff] %v373_v22  ;;  %v375_v24 = vld [vmem:[%s7138_s20 + $0x70] sm:$0xf]  ;;  %v376_v26 = vld [vmem:[%s7138_s20 + $0x78] sm:$0xff] }
  0x1c   : > { %1092 = vmatprep.subr.bf16.mxu0 %v7026_v0  ;;  %6363 = vmatpush3.bf16.msra.mxu1 %v6883_v8  ;;  %414 = vst [vmem:[#allocation2 + $0x68] sm:$0xff] %v374_v23  ;;  %415 = vst [vmem:[#allocation2 + $0x70] sm:$0xf] %v375_v24  ;;  %v377_v28 = vld [vmem:[%s7138_s20 + $0x80] sm:$0xff]  ;;  %v378_v29 = vld [vmem:[%s7138_s20 + $0x88] sm:$0xff] }
  0x1d   : > { %6364 = vmatprep.subr.bf16.mxu1 %v6885_v10  ;;  %416 = vst [vmem:[#allocation2 + $0x78] sm:$0xff] %v376_v26  ;;  %417 = vst [vmem:[#allocation2 + $0x80] sm:$0xff] %v377_v28  ;;  %v379_v33 = vld [vmem:[%s7138_s20 + $0x90] sm:$0xff]  ;;  %v380_v34 = vld [vmem:[%s7138_s20 + $0x98] sm:$0xf] }
  0x1e   : > { %418 = vst [vmem:[#allocation2 + $0x88] sm:$0xff] %v378_v29  ;;  %419 = vst [vmem:[#allocation2 + $0x90] sm:$0xff] %v379_v33  ;;  %v381_v47 = vld [vmem:[%s7138_s20 + $0xa0] sm:$0xff]  ;;  %v382_v48 = vld [vmem:[%s7138_s20 + $0xa8] sm:$0xff] }
  0x1f   : > { %1093 = vmatpush1.bf16.msra.mxu0 %v6880_v9  ;;  %v831_v27 = vld [vmem:[#allocation2 + $0x2b] sm:$0xff]  ;;  %420 = vst [vmem:[#allocation2 + $0x98] sm:$0xf] %v380_v34  ;;  %421 = vst [vmem:[#allocation2 + $0xa0] sm:$0xff] %v381_v47  ;;  %v384_v52 = vld [vmem:[%s7138_s20 + $0xb8] sm:$0xff] }
  0x20   : > { %1094 = vmatprep.subr.bf16.mxu0 %v7026_v0  ;;  %6365 = vmatpush3.bf16.msra.mxu1 %v6885_v10  ;;  %v832_v31 = vld [vmem:[#allocation2 + $0x33] sm:$0xff]  ;;  %v833_v36 = vld [vmem:[#allocation2 + $0x3b] sm:$0xff]  ;;  %v771_v40 = vld [vmem:[#allocation2 + $0x2a] sm:$0xff]  ;;  %422 = vst [vmem:[#allocation2 + $0xa8] sm:$0xff] %v382_v48 }
  0x21   : > { %6366 = vmatprep.subr.bf16.mxu1 %v6887_v12  ;;  %v871_v32 = vpack.c.bf16 %v832_v31, %v831_v27  ;;  %v834_v37 = vld [vmem:[#allocation2 + $0x43] sm:$0xff]  ;;  %v772_v41 = vld [vmem:[#allocation2 + $0x32] sm:$0xff]  ;;  %424 = vst [vmem:[#allocation2 + $0xb8] sm:$0xff] %v384_v52  ;;  %v773_v34 = vld [vmem:[#allocation2 + $0x3a] sm:$0xff] }
  0x22   : > { %v835_v38 = vld [vmem:[#allocation2 + $0x53] sm:$0xff]  ;;  %v836_v39 = vld [vmem:[#allocation2 + $0x5b] sm:$0xff]  ;;  %v872_v42 = vpack.c.bf16 %v834_v37, %v833_v36  ;;  %v811_v43 = vpack.c.bf16 %v772_v41, %v771_v40  ;;  %v386_v59 = vld [vmem:[%s7138_s20 + $0xc8] sm:$0xff] }
  0x23   : > { %1095 = vmatpush1.bf16.msra.mxu0 %v6882_v11  ;;  %6372 = vmatprep.mubr.bf16.mxu1 %v871_v32  ;;  %v873_v45 = vpack.c.bf16 %v836_v39, %v835_v38  ;;  %v383_v49 = vld [vmem:[%s7138_s20 + $0xb0] sm:$0xff]  ;;  %v837_v51 = vld [vmem:[#allocation2 + $0x63] sm:$0xff]  ;;  %v388_v62 = vld [vmem:[%s7138_s20 + $0xd8] sm:$0xff]  ;;  %426 = vst [vmem:[#allocation2 + $0xc8] sm:$0xff] %v386_v59 }
  0x24   : > { %1096 = vmatprep.subr.bf16.mxu0 %v7026_v0  ;;  %6367 = vmatpush3.bf16.msra.mxu1 %v6887_v12  ;;  %423 = vst [vmem:[#allocation2 + $0xb0] sm:$0xff] %v383_v49  ;;  %v385_v53 = vld [vmem:[%s7138_s20 + $0xc0] sm:$0xf]  ;;  %v838_v54 = vld [vmem:[#allocation2 + $0x6b] sm:$0xff]  ;;  %428 = vst [vmem:[#allocation2 + $0xd8] sm:$0xff] %v388_v62 }
  0x25   : > { %6368 = vmatprep.subr.bf16.mxu1 %v6889_v19  ;;  %1116 = vmatprep.mubr.bf16.mxu0 %v811_v43  ;;  %v839_v55 = vld [vmem:[#allocation2 + $0x7b] sm:$0xff]  ;;  %425 = vst [vmem:[#allocation2 + $0xc0] sm:$0xf] %v385_v53  ;;  %v840_v57 = vld [vmem:[#allocation2 + $0x83] sm:$0xff]  ;;  %v874_v60 = vpack.c.bf16 %v838_v54, %v837_v51  ;;  %v387_v61 = vld [vmem:[%s7138_s20 + $0xd0] sm:$0xff] }
  0x26   : > { %v389_v63 = vld [vmem:[%s7138_s20 + $0xe0] sm:$0xff]  ;;  %v875_v1 = vpack.c.bf16 %v840_v57, %v839_v55  ;;  %427 = vst [vmem:[#allocation2 + $0xd0] sm:$0xff] %v387_v61  ;;  %v390_v2 = vld [vmem:[%s7138_s20 + $0xe8] sm:$0xf]  ;;  %v842_v6 = vld [vmem:[#allocation2 + $0x93] sm:$0xff] }
  0x27   : > { %1097 = vmatpush1.bf16.msra.mxu0 %v6884_v18  ;;  %429 = vst [vmem:[#allocation2 + $0xe0] sm:$0xff] %v389_v63  ;;  %430 = vst [vmem:[#allocation2 + $0xe8] sm:$0xf] %v390_v2  ;;  %v841_v5 = vld [vmem:[#allocation2 + $0x8b] sm:$0xff]  ;;  %v843_v7 = vld [vmem:[#allocation2 + $0xa3] sm:$0xff] }
  0x28   : > { %1098 = vmatprep.subr.bf16.mxu0 %v7026_v0  ;;  %6369 = vmatpush3.bf16.msra.mxu1 %v6889_v19  ;;  %v7235_v9 = vld [vmem:[%s8941_s2 + $0x18] sm:$0xff]   ;;  %v391_v10 = vld [vmem:[%s7138_s20 + $0xf0] sm:$0xff]  ;;  %v393_v12 = vld [vmem:[%s7138_s20 + $0x100] sm:$0xff]  ;;  %v876_v15 = vpack.c.bf16 %v842_v6, %v841_v5 }
  0x29   : > { %6370 = vmatprep.subr.bf16.mxu1 %v6891_v30  ;;  %v392_v11 = vld [vmem:[%s7138_s20 + $0xf8] sm:$0xff]  ;;  %431 = vst [vmem:[#allocation2 + $0xf0] sm:$0xff] %v391_v10  ;;  %433 = vst [vmem:[#allocation2 + $0x100] sm:$0xff] %v393_v12  ;;  %v394_v13 = vld [vmem:[%s7138_s20 + $0x108] sm:$0xff] }
  0x2a   : > { %432 = vst [vmem:[#allocation2 + $0xf8] sm:$0xff] %v392_v11  ;;  %v395_v14 = vld [vmem:[%s7138_s20 + $0x110] sm:$0xf]  ;;  %434 = vst [vmem:[#allocation2 + $0x108] sm:$0xff] %v394_v13  ;;  %v6895_v16 = vld [vmem:[%s8941_s2 + $0x128] sm:$0xff]  }
  0x2b   : > { %1099 = vmatpush1.bf16.msra.mxu0 %v6886_v25  ;;  %v844_v8 = vld [vmem:[#allocation2 + $0xab] sm:$0xff]  ;;  %435 = vst [vmem:[#allocation2 + $0x110] sm:$0xf] %v395_v14  ;;  %v7259_v18 = vld [vmem:[%s8941_s2 + $0x20] sm:$0xff]   ;;  %v845_v20 = vld [vmem:[#allocation2 + $0xb3] sm:$0xff] }
  0x2c   : > { %1100 = vmatprep.subr.bf16.mxu0 %v7026_v0  ;;  %6371 = vmatpush3.bf16.msra.mxu1 %v6891_v30  ;;  %v877_v17 = vpack.c.bf16 %v844_v8, %v843_v7  ;;  %v6896_v19 = vld [vmem:[%s8941_s2 + $0x130] sm:$0xff]   ;;  %v846_v21 = vld [vmem:[#allocation2 + $0xbb] sm:$0xff]  ;;  %v7269_v22 = vld [vmem:[%s8941_s2 + $0x28] sm:$0xff]  }
  0x2d   : > { %6668 = vmatprep.subr.bf16.mxu1 %v7026_v0  ;;  %v396_v23 = vld [vmem:[%s7138_s20 + $0x118] sm:$0xff]  ;;  %v397_v24 = vld [vmem:[%s7138_s20 + $0x120] sm:$0xff]  ;;  %v398_v25 = vld [vmem:[%s7138_s20 + $0x128] sm:$0xff]  ;;  %v878_v33 = vpack.c.bf16 %v846_v21, %v845_v20 }
  0x2e   : > { %436 = vst [vmem:[#allocation2 + $0x118] sm:$0xff] %v396_v23  ;;  %437 = vst [vmem:[#allocation2 + $0x120] sm:$0xff] %v397_v24  ;;  %v399_v26 = vld [vmem:[%s7138_s20 + $0x130] sm:$0xff]  ;;  %v400_v27 = vld [vmem:[%s7138_s20 + $0x138] sm:$0xf] }
  0x2f   : > { %1101 = vmatpush1.bf16.msra.mxu0 %v6888_v35  ;;  %6373 = vmatmul.mubr.bf16.vlgmr.msra.gmra.mrb[0].mxu1 %v872_v42  ;;  %v847_v28 = vld [vmem:[#allocation2 + $0xcb] sm:$0xff]  ;;  %v848_v29 = vld [vmem:[#allocation2 + $0xd3] sm:$0xff]  ;;  %438 = vst [vmem:[#allocation2 + $0x128] sm:$0xff] %v398_v25  ;;  %439 = vst [vmem:[#allocation2 + $0x130] sm:$0xff] %v399_v26 }
  0x30   : > { %1102 = vmatprep.subr.bf16.mxu0 %v7026_v0  ;;  %6376 = vmatprep.mubr.bf16.mxu1 %v873_v45  ;;  %440 = vst [vmem:[#allocation2 + $0x138] sm:$0xf] %v400_v27  ;;  %v6898_v30 = vld [vmem:[%s8941_s2 + $0x138] sm:$0xff]   ;;  %v711_v31 = vld [vmem:[#allocation2 + $0x29] sm:$0xff]  ;;  %v879_v35 = vpack.c.bf16 %v848_v29, %v847_v28  ;;  %v441_v38 = vld [vmem:[%s7282_s13] sm:$0xff] }
  0x31   : > { %6684 = vmatpush1.bf16.msra.mxu1 %v7186_v46  ;;  %v712_v32 = vld [vmem:[#allocation2 + $0x31] sm:$0xff]  ;;  %v774_v36 = vld [vmem:[#allocation2 + $0x42] sm:$0xff]  ;;  %462 = vst [vmem:[#allocation2 + $0x140] sm:$0xff] %v441_v38  ;;  %v713_v51 = vld [vmem:[#allocation2 + $0x39] sm:$0xff] }
  0x32   : > { %6669 = vmatprep.subr.bf16.mxu1 %v7026_v0  ;;  %v7292_v37 = vld [vmem:[%s8941_s2 + $0x30] sm:$0xff]   ;;  %v442_v39 = vld [vmem:[%s7282_s13 + $0x8] sm:$0xff]  ;;  %v444_v41 = vld [vmem:[%s7282_s13 + $0x18] sm:$0xff]  ;;  %v751_v42 = vpack.c.bf16 %v712_v32, %v711_v31 }
  0x33   : > { %1103 = vmatpush1.bf16.msra.mxu0 %v6890_v44  ;;  %v443_v40 = vld [vmem:[%s7282_s13 + $0x10] sm:$0xff]  ;;  %463 = vst [vmem:[#allocation2 + $0x148] sm:$0xff] %v442_v39  ;;  %v445_v43 = vld [vmem:[%s7282_s13 + $0x20] sm:$0xf]  ;;  %465 = vst [vmem:[#allocation2 + $0x158] sm:$0xff] %v444_v41  ;;  %v812_v44 = vpack.c.bf16 %v774_v36, %v773_v34 }
  0x34   : > { %1104 = vmatprep.subr.bf16.mxu0 %v7026_v0  ;;  %464 = vst [vmem:[#allocation2 + $0x150] sm:$0xff] %v443_v40  ;;  %v849_v45 = vld [vmem:[#allocation2 + $0xdb] sm:$0xff]  ;;  %v850_v47 = vld [vmem:[#allocation2 + $0xe3] sm:$0xff]  ;;  %466 = vst [vmem:[#allocation2 + $0x160] sm:$0xf] %v445_v43 }
  0x35   : > { %6685 = vmatpush1.bf16.msra.mxu1 %v7201_v56  ;;  %v7303_v48 = vld [vmem:[%s8941_s2 + $0x38] sm:$0xff]   ;;  %v714_v52 = vld [vmem:[#allocation2 + $0x41] sm:$0xff]  ;;  %v880_v53 = vpack.c.bf16 %v850_v47, %v849_v45  ;;  %v455_v14 = vld [vmem:[%s7282_s13 + $0x70] sm:$0xf] }
  0x36   : > { %6670 = vmatprep.subr.bf16.mxu1 %v7026_v0  ;;  %v851_v49 = vld [vmem:[#allocation2 + $0xf3] sm:$0xff]  ;;  %v7311_v57 = vld [vmem:[%s8941_s2 + $0x40] sm:$0xff]   ;;  %v446_v59 = vld [vmem:[%s7282_s13 + $0x28] sm:$0xff]  ;;  %476 = vst [vmem:[#allocation2 + $0x1b0] sm:$0xf] %v455_v14 }
  0x37   : > { %1105 = vmatpush1.bf16.msra.mxu0 %v6892_v50  ;;  %6377 = vmatmul.mubr.bf16.gmra.mrb[4].mxu1 %v874_v60  ;;  %v852_v50 = vld [vmem:[#allocation2 + $0xfb] sm:$0xff]  ;;  %v775_v54 = vld [vmem:[#allocation2 + $0x52] sm:$0xff]  ;;  %467 = vst [vmem:[#allocation2 + $0x168] sm:$0xff] %v446_v59  ;;  %v450_v63 = vld [vmem:[%s7282_s13 + $0x48] sm:$0xf] }
  0x38   : > { %1106 = vmatprep.subr.bf16.mxu0 %v7026_v0  ;;  %6380 = vmatprep.mubr.bf16.mxu1 %v875_v1  ;;  %v776_v55 = vld [vmem:[#allocation2 + $0x5a] sm:$0xff]  ;;  %v447_v60 = vld [vmem:[%s7282_s13 + $0x30] sm:$0xff]  ;;  %471 = vst [vmem:[#allocation2 + $0x188] sm:$0xf] %v450_v63  ;;  %v853_v1 = vld [vmem:[#allocation2 + $0x103] sm:$0xff] }
  0x39   : > { %6686 = vmatpush1.bf16.msra.mxu1 %v7220_v3  ;;  %v448_v61 = vld [vmem:[%s7282_s13 + $0x38] sm:$0xff]  ;;  %468 = vst [vmem:[#allocation2 + $0x170] sm:$0xff] %v447_v60  ;;  %v449_v62 = vld [vmem:[%s7282_s13 + $0x40] sm:$0xff]  ;;  %v813_v2 = vpack.c.bf16 %v776_v55, %v775_v54  ;;  %v7326_v5 = vld [vmem:[%s8941_s2 + $0x48] sm:$0xff]  }
  0x3a   : > { %6671 = vmatprep.subr.bf16.mxu1 %v7026_v0  ;;  %469 = vst [vmem:[#allocation2 + $0x178] sm:$0xff] %v448_v61  ;;  %470 = vst [vmem:[#allocation2 + $0x180] sm:$0xff] %v449_v62  ;;  %v855_v6 = vld [vmem:[#allocation2 + $0x11b] sm:$0xff]  ;;  %v856_v7 = vld [vmem:[#allocation2 + $0x123] sm:$0xff] }
  0x3b   : > { %1107 = vmatpush1.bf16.msra.mxu0 %v6893_v58  ;;  %v881_v58 = vpack.c.bf16 %v852_v50, %v851_v49  ;;  %v715_v8 = vld [vmem:[#allocation2 + $0x51] sm:$0xff]  ;;  %v453_v12 = vld [vmem:[%s7282_s13 + $0x60] sm:$0xff]  ;;  %v454_v13 = vld [vmem:[%s7282_s13 + $0x68] sm:$0xff] }
  0x3c   : > { %1108 = vmatprep.subr.bf16.mxu0 %v7026_v0  ;;  %v452_v10 = vld [vmem:[%s7282_s13 + $0x58] sm:$0xff]  ;;  %474 = vst [vmem:[#allocation2 + $0x1a0] sm:$0xff] %v453_v12  ;;  %475 = vst [vmem:[#allocation2 + $0x1a8] sm:$0xff] %v454_v13  ;;  %v7342_v20 = vld [vmem:[%s8941_s2 + $0x50] sm:$0xff]  }
  0x3d   : > { %6687 = vmatpush1.bf16.msra.mxu1 %v7235_v9  ;;  %473 = vst [vmem:[#allocation2 + $0x198] sm:$0xff] %v452_v10  ;;  %v857_v23 = vld [vmem:[#allocation2 + $0x12b] sm:$0xff]  ;;  %v858_v24 = vld [vmem:[#allocation2 + $0x133] sm:$0xff]  ;;  %v859_v25 = vld [vmem:[#allocation2 + $0x143] sm:$0xff] }
  0x3e   : > { %6672 = vmatprep.subr.bf16.mxu1 %v7026_v0  ;;  %v860_v26 = vld [vmem:[#allocation2 + $0x14b] sm:$0xff]  ;;  %v7350_v27 = vld [vmem:[%s8941_s2 + $0x58] sm:$0xff]   ;;  %v884_v28 = vpack.c.bf16 %v858_v24, %v857_v23  ;;  %v717_v29 = vld [vmem:[#allocation2 + $0x61] sm:$0xff] }
  0x3f   : > { %1109 = vmatpush1.bf16.msra.mxu0 %v6894_v4  ;;  %6381 = vmatmul.mubr.bf16.gmra.mrb[8].mxu1 %v876_v15  ;;  %v854_v4 = vld [vmem:[#allocation2 + $0x10b] sm:$0xff]  ;;  %v716_v15 = vld [vmem:[#allocation2 + $0x59] sm:$0xff]  ;;  %v885_v31 = vpack.c.bf16 %v860_v26, %v859_v25  ;;  %v780_v32 = vld [vmem:[#allocation2 + $0x82] sm:$0xff] }
  0x40   : > { %1110 = vmatprep.subr.bf16.mxu0 %v7026_v0  ;;  %6384 = vmatprep.mubr.bf16.mxu1 %v877_v17  ;;  %v882_v11 = vpack.c.bf16 %v854_v4, %v853_v1  ;;  %v883_v17 = vpack.c.bf16 %v856_v7, %v855_v6  ;;  %v753_v21 = vpack.c.bf16 %v716_v15, %v715_v8  ;;  %v861_v36 = vld [vmem:[#allocation2 + $0x153] sm:$0xff]  ;;  %v862_v38 = vld [vmem:[#allocation2 + $0x15b] sm:$0xff]  ;;  %v7368_v40 = vld [vmem:[%s8941_s2 + $0x68] sm:$0xff]  }
  0x41   : > { %6688 = vmatpush1.bf16.msra.mxu1 %v7259_v18  ;;  %v864_v39 = vld [vmem:[#allocation2 + $0x173] sm:$0xff]  ;;  %v886_v41 = vpack.c.bf16 %v862_v38, %v861_v36  ;;  %v720_v43 = vld [vmem:[#allocation2 + $0x81] sm:$0xff]  ;;  %v724_v7 = vld [vmem:[#allocation2 + $0xa9] sm:$0xff] }
  0x42   : > { %6673 = vmatprep.subr.bf16.mxu1 %v7026_v0  ;;  %v782_v45 = vld [vmem:[#allocation2 + $0x92] sm:$0xff]  ;;  %v865_v50 = vld [vmem:[#allocation2 + $0x17b] sm:$0xff]  ;;  %v727_v23 = vld [vmem:[#allocation2 + $0xc9] sm:$0xff] }
  0x43   : > { %1111 = vmatpush1.bf16.msra.mxu0 %v6895_v16  ;;  %v777_v16 = vld [vmem:[#allocation2 + $0x62] sm:$0xff]  ;;  %v7377_v47 = vld [vmem:[%s8941_s2 + $0x70] sm:$0xff]   ;;  %v786_v10 = vld [vmem:[#allocation2 + $0xba] sm:$0xff] }
  0x44   : > { %1112 = vmatprep.subr.bf16.mxu0 %v7026_v0  ;;  %v868_v54 = vld [vmem:[#allocation2 + $0x19b] sm:$0xff]  ;;  %v722_v59 = vld [vmem:[#allocation2 + $0x91] sm:$0xff]  ;;  %v869_v63 = vld [vmem:[#allocation2 + $0x1a3] sm:$0xff] }
  0x45   : > { %6689 = vmatpush1.bf16.msra.mxu1 %v7269_v22  ;;  %v783_v61 = vld [vmem:[#allocation2 + $0xa2] sm:$0xff]  ;;  %v870_v1 = vld [vmem:[#allocation2 + $0x1ab] sm:$0xff]  ;;  %v726_v15 = vld [vmem:[#allocation2 + $0xb9] sm:$0xff] }
  0x46   : > { %6674 = vmatprep.subr.bf16.mxu1 %v7026_v0  ;;  %v363_v4 = vld [vmem:[%s7138_s20 + $0x10] sm:$0xff]  ;;  %v723_v6 = vld [vmem:[#allocation2 + $0xa1] sm:$0xff]  ;;  %v890_v8 = vpack.c.bf16 %v870_v1, %v869_v63  ;;  %v6929_v63 = vld [vmem:[%s8941_s2 + $0x1d8] sm:$0xff]  }
  0x47   : > { %1113 = vmatpush1.bf16.msra.mxu0 %v6896_v19  ;;  %6385 = vmatmul.mubr.bf16.gmra.mrb[12].mxu1 %v878_v33  ;;  %v778_v19 = vld [vmem:[#allocation2 + $0x6a] sm:$0xff]  ;;  %v7359_v33 = vld [vmem:[%s8941_s2 + $0x60] sm:$0xff]   ;;  %403 = vst [vmem:[#allocation2 + $0x10] sm:$0xff] %v363_v4  ;;  %v757_v12 = vpack.c.bf16 %v724_v7, %v723_v6 }
  0x48   : > { %1114 = vmatprep.subr.bf16.mxu0 %v7026_v0  ;;  %6388 = vmatprep.mubr.bf16.mxu1 %v879_v35  ;;  %v725_v14 = vld [vmem:[#allocation2 + $0xb1] sm:$0xff]  ;;  %v789_v25 = vld [vmem:[#allocation2 + $0xda] sm:$0xff]  ;;  %v790_v26 = vld [vmem:[#allocation2 + $0xe2] sm:$0xff] }
  0x49   : > { %6690 = vmatpush1.bf16.msra.mxu1 %v7292_v37  ;;  %v728_v24 = vld [vmem:[#allocation2 + $0xd1] sm:$0xff] }
  0x4a   : > { %6675 = vmatprep.subr.bf16.mxu1 %v7026_v0  ;;  %v738_v1 = vld [vmem:[#allocation2 + $0x131] sm:$0xff] }
  0x4b   : > { %1115 = vmatpush1.bf16.msra.mxu0 %v6898_v30  ;;  %v718_v30 = vld [vmem:[#allocation2 + $0x69] sm:$0xff] }
  0x4c   : > { %1614 = vmatprep.subr.bf16.mxu0 %v7026_v0  ;;  %v754_v34 = vpack.c.bf16 %v718_v30, %v717_v29  ;;  %v6917_v29 = vld [vmem:[%s8941_s2 + $0x198] sm:$0xff]   ;;  %v759_v30 = vpack.c.bf16 %v728_v24, %v727_v23  ;;  %v800_v4 = vld [vmem:[#allocation2 + $0x14a] sm:$0xff] }
  0x4d   : > { %6691 = vmatpush1.bf16.msra.mxu1 %v7303_v48  ;;  %v743_v23 = vld [vmem:[#allocation2 + $0x169] sm:$0xff]  ;;  %v744_v24 = vld [vmem:[#allocation2 + $0x171] sm:$0xff] }
  0x4e   : > { %1117 = vmatmul.mubr.bf16.vlgmr.msra.gmra.mrb[0].mxu0 %v751_v42  ;;  %6676 = vmatprep.subr.bf16.mxu1 %v7026_v0  ;;  %v719_v42 = vld [vmem:[#allocation2 + $0x79] sm:$0xff] }
  0x4f   : > { %1615 = vmatpush1.bf16.msra.mxu0 %v7186_v46  ;;  %1124 = vmatprep.mubr.bf16.mxu0 %v812_v44  ;;  %v752_v46 = vpack.c.bf16 %v714_v52, %v713_v51  ;;  %v781_v44 = vld [vmem:[#allocation2 + $0x8a] sm:$0xff]  ;;  %v755_v49 = vpack.c.bf16 %v720_v43, %v719_v42  ;;  %v793_v42 = vld [vmem:[#allocation2 + $0x102] sm:$0xff] }
  0x50   : > { %1616 = vmatprep.subr.bf16.mxu0 %v7026_v0  ;;  %6389 = vmatmul.mubr.bf16.gmra.mrb[16].mxu1 %v880_v53  ;;  %v816_v51 = vpack.c.bf16 %v782_v45, %v781_v44  ;;  %v866_v52 = vld [vmem:[#allocation2 + $0x183] sm:$0xff]  ;;  %v6922_v45 = vld [vmem:[%s8941_s2 + $0x1b8] sm:$0xff]  }
  0x51   : > { %6392 = vmatprep.mubr.bf16.mxu1 %v881_v58  ;;  %6692 = vmatpush1.bf16.msra.mxu1 %v7311_v57  ;;  %v888_v55 = vpack.c.bf16 %v866_v52, %v865_v50  ;;  %v721_v58 = vld [vmem:[#allocation2 + $0x89] sm:$0xff]  ;;  %v6923_v50 = vld [vmem:[%s8941_s2 + $0x1c0] sm:$0xff]  }
  0x52   : > { %6677 = vmatprep.subr.bf16.mxu1 %v7026_v0  ;;  %v756_v62 = vpack.c.bf16 %v722_v59, %v721_v58  ;;  %v794_v43 = vld [vmem:[#allocation2 + $0x10a] sm:$0xff]  ;;  %v796_v52 = vld [vmem:[#allocation2 + $0x122] sm:$0xff] }
  0x53   : > { %1617 = vmatpush1.bf16.msra.mxu0 %v7201_v56  ;;  %v451_v56 = vld [vmem:[%s7282_s13 + $0x50] sm:$0xff]  ;;  %v736_v58 = vld [vmem:[#allocation2 + $0x121] sm:$0xff] }
  0x54   : > { %1618 = vmatprep.subr.bf16.mxu0 %v7026_v0  ;;  %472 = vst [vmem:[#allocation2 + $0x190] sm:$0xff] %v451_v56  ;;  %v785_v56 = vld [vmem:[#allocation2 + $0xb2] sm:$0xff] }
  0x55   : > { %6693 = vmatpush1.bf16.msra.mxu1 %v7326_v5  ;;  %v818_v13 = vpack.c.bf16 %v786_v10, %v785_v56  ;;  %v6927_v59 = vld [vmem:[%s8941_s2 + $0x1d0] sm:$0xff]   ;;  %v739_v56 = vld [vmem:[#allocation2 + $0x141] sm:$0xff] }
  0x56   : > { %1125 = vmatmul.mubr.bf16.gmra.mrb[4].mxu0 %v752_v46  ;;  %6678 = vmatprep.subr.bf16.mxu1 %v7026_v0  ;;  %v740_v10 = vld [vmem:[#allocation2 + $0x149] sm:$0xff] }
  0x57   : > { %1132 = vmatprep.mubr.bf16.mxu0 %v813_v2  ;;  %1619 = vmatpush1.bf16.msra.mxu0 %v7220_v3  ;;  %v814_v3 = vpack.c.bf16 %v778_v19, %v777_v16  ;;  %v362_v2 = vld [vmem:[%s7138_s20 + $0x8] sm:$0xff]  ;;  %v6914_v16 = vld [vmem:[%s8941_s2 + $0x180] sm:$0xff]   ;;  %v788_v19 = vld [vmem:[#allocation2 + $0xd2] sm:$0xff] }
  0x58   : > { %1620 = vmatprep.subr.bf16.mxu0 %v7026_v0  ;;  %6393 = vmatmul.mubr.bf16.gmra.mrb[20].mxu1 %v882_v11  ;;  %402 = vst [vmem:[#allocation2 + $0x8] sm:$0xff] %v362_v2  ;;  %v365_v11 = vld [vmem:[%s7138_s20 + $0x20] sm:$0xf] }
  0x59   : > { %6396 = vmatprep.mubr.bf16.mxu1 %v883_v17  ;;  %6694 = vmatpush1.bf16.msra.mxu1 %v7342_v20  ;;  %405 = vst [vmem:[#allocation2 + $0x20] sm:$0xf] %v365_v11  ;;  %v787_v17 = vld [vmem:[#allocation2 + $0xca] sm:$0xff]  ;;  %v799_v2 = vld [vmem:[#allocation2 + $0x142] sm:$0xff]  ;;  %v801_v11 = vld [vmem:[#allocation2 + $0x152] sm:$0xff] }
  0x5a   : > { %6679 = vmatprep.subr.bf16.mxu1 %v7026_v0  ;;  %v825_v7 = vpack.c.bf16 %v800_v4, %v799_v2 }
  0x5b   : > { %1621 = vmatpush1.bf16.msra.mxu0 %v7235_v9  ;;  %v779_v9 = vld [vmem:[#allocation2 + $0x7a] sm:$0xff] }
  0x5c   : > { %1622 = vmatprep.subr.bf16.mxu0 %v7026_v0  ;;  %v815_v35 = vpack.c.bf16 %v780_v32, %v779_v9  ;;  %v867_v53 = vld [vmem:[#allocation2 + $0x193] sm:$0xff]  ;;  %v730_v32 = vld [vmem:[#allocation2 + $0xe1] sm:$0xff] }
  0x5d   : > { %6695 = vmatpush1.bf16.msra.mxu1 %v7350_v27  ;;  %v889_v60 = vpack.c.bf16 %v868_v54, %v867_v53  ;;  %v729_v9 = vld [vmem:[#allocation2 + $0xd9] sm:$0xff]  ;;  %v6925_v54 = vld [vmem:[%s8941_s2 + $0x1c8] sm:$0xff]  }
  0x5e   : > { %1133 = vmatmul.mubr.bf16.gmra.mrb[8].mxu0 %v753_v21  ;;  %6680 = vmatprep.subr.bf16.mxu1 %v7026_v0  ;;  %v6915_v21 = vld [vmem:[%s8941_s2 + $0x188] sm:$0xff]   ;;  %v760_v36 = vpack.c.bf16 %v730_v32, %v729_v9  ;;  %v808_v9 = vld [vmem:[#allocation2 + $0x19a] sm:$0xff] }
  0x5f   : > { %1140 = vmatprep.mubr.bf16.mxu0 %v814_v3  ;;  %1623 = vmatpush1.bf16.msra.mxu0 %v7259_v18  ;;  %v863_v18 = vld [vmem:[#allocation2 + $0x16b] sm:$0xff]  ;;  %v819_v3 = vpack.c.bf16 %v788_v19, %v787_v17  ;;  %v742_v17 = vld [vmem:[#allocation2 + $0x159] sm:$0xff] }
  0x60   : > { %1624 = vmatprep.subr.bf16.mxu0 %v7026_v0  ;;  %6397 = vmatmul.mubr.bf16.gmra.mrb[24].mxu1 %v884_v28  ;;  %v7422_v28 = vld [vmem:[%s8941_s2 + $0x80] sm:$0xff]   ;;  %v803_v19 = vld [vmem:[#allocation2 + $0x16a] sm:$0xff] }
  0x61   : > { %6400 = vmatprep.mubr.bf16.mxu1 %v885_v31  ;;  %6696 = vmatpush1.bf16.msra.mxu1 %v7359_v33  ;;  %v820_v31 = vpack.c.bf16 %v790_v26, %v789_v25  ;;  %v805_v25 = vld [vmem:[#allocation2 + $0x17a] sm:$0xff]  ;;  %v806_v26 = vld [vmem:[#allocation2 + $0x182] sm:$0xff] }
  0x62   : > { %6681 = vmatprep.subr.bf16.mxu1 %v7026_v0 }
  0x63   : > { %1625 = vmatpush1.bf16.msra.mxu0 %v7269_v22  ;;  %v887_v22 = vpack.c.bf16 %v864_v39, %v863_v18  ;;  %v6919_v18 = vld [vmem:[%s8941_s2 + $0x1a8] sm:$0xff]   ;;  %v731_v39 = vld [vmem:[#allocation2 + $0xf1] sm:$0xff] }
  0x64   : > { %1626 = vmatprep.subr.bf16.mxu0 %v7026_v0 }
  0x65   : > { %6697 = vmatpush1.bf16.msra.mxu1 %v7368_v40 }
  0x66   : > { %1141 = vmatmul.mubr.bf16.gmra.mrb[12].mxu0 %v754_v34  ;;  %6682 = vmatprep.subr.bf16.mxu1 %v7026_v0  ;;  %v6918_v34 = vld [vmem:[%s8941_s2 + $0x1a0] sm:$0xff]  }
  0x67   : > { %1148 = vmatprep.mubr.bf16.mxu0 %v815_v35  ;;  %1627 = vmatpush1.bf16.msra.mxu0 %v7292_v37  ;;  %v7384_v37 = vld [vmem:[%s8941_s2 + $0x78] sm:$0xff]  }
  0x68   : > { %1628 = vmatprep.subr.bf16.mxu0 %v7026_v0  ;;  %6401 = vmatmul.mubr.bf16.gmra.mrb[28].mxu1 %v886_v41  ;;  %v792_v35 = vld [vmem:[#allocation2 + $0xfa] sm:$0xff]  ;;  %v6920_v41 = vld [vmem:[%s8941_s2 + $0x1b0] sm:$0xff]  }
  0x69   : > { %6404 = vmatprep.mubr.bf16.mxu1 %v887_v22  ;;  %6698 = vmatpush1.bf16.msra.mxu1 %v7377_v47  ;;  %v822_v22 = vpack.c.bf16 %v794_v43, %v793_v42  ;;  %v749_v42 = vld [vmem:[#allocation2 + $0x1a1] sm:$0xff]  ;;  %v750_v43 = vld [vmem:[#allocation2 + $0x1a9] sm:$0xff] }
  0x6a   : > { %6683 = vmatprep.subr.bf16.mxu1 %v7026_v0 }
  0x6b   : > { %1629 = vmatpush1.bf16.msra.mxu0 %v7303_v48  ;;  %v784_v48 = vld [vmem:[#allocation2 + $0xaa] sm:$0xff] }
  0x6c   : > { %1630 = vmatprep.subr.bf16.mxu0 %v7026_v0  ;;  %v817_v46 = vpack.c.bf16 %v784_v48, %v783_v61  ;;  %v798_v61 = vld [vmem:[#allocation2 + $0x132] sm:$0xff] }
  0x6d   : > { %6699 = vmatpush1.bf16.msra.mxu1 %v7384_v37 }
  0x6e   : > { %1149 = vmatmul.mubr.bf16.gmra.mrb[16].mxu0 %v755_v49  ;;  %2374 = vmatprep.subr.bf16.mxu1 %v7026_v0  ;;  %v734_v49 = vld [vmem:[#allocation2 + $0x109] sm:$0xff] }
  0x6f   : > { %1156 = vmatprep.mubr.bf16.mxu0 %v816_v51  ;;  %1631 = vmatpush1.bf16.msra.mxu0 %v7311_v57  ;;  %v361_v57 = vld [vmem:[%s7138_s20] sm:$0xff] }
  0x70   : > { %1632 = vmatprep.subr.bf16.mxu0 %v7026_v0  ;;  %6405 = vmatmul.mubr.bf16.gmra.mrb[32].mxu1 %v888_v55  ;;  %401 = vst [vmem:[#allocation2] sm:$0xff] %v361_v57  ;;  %v735_v55 = vld [vmem:[#allocation2 + $0x119] sm:$0xff] }
  0x71   : > { %6408 = vmatprep.mubr.bf16.mxu1 %v889_v60  ;;  %v797_v60 = vld [vmem:[#allocation2 + $0x12a] sm:$0xff]  ;;  %v763_v48 = vpack.c.bf16 %v736_v58, %v735_v55  ;;  %v6931_v57 = vld [vmem:[%s8941_s2 + $0x1e0] sm:$0xff]  }
  0x73   : > { %1633 = vmatpush1.bf16.msra.mxu0 %v7326_v5  ;;  %v364_v5 = vld [vmem:[%s7138_s20 + $0x18] sm:$0xff] }
  0x74   : > { %1634 = vmatprep.subr.bf16.mxu0 %v7026_v0  ;;  %404 = vst [vmem:[#allocation2 + $0x18] sm:$0xff] %v364_v5  ;;  %v6935_v5 = vld [vmem:[%s8941_s2 + $0x1f0] sm:$0xff]  }
  0x76   : > { %1157 = vmatmul.mubr.bf16.gmra.mrb[20].mxu0 %v756_v62 }
  0x77   : > { %1164 = vmatprep.mubr.bf16.mxu0 %v817_v46  ;;  %1635 = vmatpush1.bf16.msra.mxu0 %v7342_v20  ;;  %v758_v20 = vpack.c.bf16 %v726_v15, %v725_v14  ;;  %v6937_v15 = vld [vmem:[%s8941_s2 + $0x1f8] sm:$0xff]  }
  0x78   : > { %1636 = vmatprep.subr.bf16.mxu0 %v7026_v0  ;;  %6409 = vmatmul.mubr.bf16.gmra.mrb[36].mxu1 %v890_v8  ;;  %v6933_v8 = vld [vmem:[%s8941_s2 + $0x1e8] sm:$0xff]  }
  0x79   : > { %1702 = vmatprep.mubr.bf16.mxu1 %v816_v51  ;;  %v795_v51 = vld [vmem:[#allocation2 + $0x11a] sm:$0xff] }
  0x7b   : > { %1637 = vmatpush1.bf16.msra.mxu0 %v7350_v27  ;;  %v6916_v27 = vld [vmem:[%s8941_s2 + $0x190] sm:$0xff]   ;;  %v545_v58 = vld [vmem:[#allocation2 + $0x1a] sm:$0xff] }
  0x7c   : > { %1638 = vmatprep.subr.bf16.mxu0 %v7026_v0  ;;  %v544_v55 = vld [vmem:[#allocation2 + $0x12] sm:$0xff] }
  0x7d   : > { %v484_v2 = vld [vmem:[#allocation2 + $0x11] sm:$0xff]  ;;  %v485_v4 = vld [vmem:[#allocation2 + $0x19] sm:$0xff] }
  0x7e   : > { %1165 = vmatmul.mubr.bf16.gmra.mrb[24].mxu0 %v757_v12 }
  0x7f   : > { %1172 = vmatprep.mubr.bf16.mxu0 %v818_v13  ;;  %1639 = vmatpush1.bf16.msra.mxu0 %v7359_v33  ;;  %v791_v33 = vld [vmem:[#allocation2 + $0xf2] sm:$0xff] }
  0x80   : > { %1640 = vmatprep.subr.bf16.mxu0 %v7026_v0  ;;  %1703 = vmatmul.mubr.bf16.vlgmr.msra.gmra.mrb[40].mxu1 %v756_v62  ;;  %v821_v38 = vpack.c.bf16 %v792_v35, %v791_v33  ;;  %v824_v62 = vpack.c.bf16 %v798_v61, %v797_v60  ;;  %v748_v35 = vld [vmem:[#allocation2 + $0x199] sm:$0xff] }
  0x81   : > { %1710 = vmatprep.mubr.bf16.mxu1 %v817_v46  ;;  %2375 = vmatpush1.bf16.msra.mxu1 %v6914_v16  ;;  %v737_v46 = vld [vmem:[#allocation2 + $0x129] sm:$0xff]  ;;  %v741_v16 = vld [vmem:[#allocation2 + $0x151] sm:$0xff] }
  0x82   : > { %2376 = vmatprep.subr.bf16.mxu1 %v7026_v0  ;;  %v764_v6 = vpack.c.bf16 %v738_v1, %v737_v46  ;;  %v493_v46 = vld [vmem:[#allocation2 + $0x69] sm:$0xff]  ;;  %v554_v1 = vld [vmem:[#allocation2 + $0x7a] sm:$0xff] }
  0x83   : > { %1641 = vmatpush1.bf16.msra.mxu0 %v7368_v40  ;;  %v732_v40 = vld [vmem:[#allocation2 + $0xf9] sm:$0xff] }
  0x84   : > { %1642 = vmatprep.subr.bf16.mxu0 %v7026_v0  ;;  %v761_v44 = vpack.c.bf16 %v732_v40, %v731_v39  ;;  %v550_v40 = vld [vmem:[#allocation2 + $0x52] sm:$0xff] }
  0x85   : > { %2377 = vmatpush1.bf16.msra.mxu1 %v6915_v21  ;;  %v766_v21 = vpack.c.bf16 %v742_v17, %v741_v16  ;;  %v486_v16 = vld [vmem:[#allocation2 + $0x29] sm:$0xff]  ;;  %v487_v17 = vld [vmem:[#allocation2 + $0x31] sm:$0xff] }
  0x86   : > { %1173 = vmatmul.mubr.bf16.gmra.mrb[28].mxu0 %v758_v20  ;;  %2378 = vmatprep.subr.bf16.mxu1 %v7026_v0 }
  0x87   : > { %1180 = vmatprep.mubr.bf16.mxu0 %v819_v3  ;;  %1643 = vmatpush1.bf16.msra.mxu0 %v7377_v47  ;;  %v733_v47 = vld [vmem:[#allocation2 + $0x101] sm:$0xff] }
  0x88   : > { %1644 = vmatprep.subr.bf16.mxu0 %v7026_v0  ;;  %1711 = vmatmul.mubr.bf16.gmra.mrb[44].mxu1 %v757_v12  ;;  %v762_v53 = vpack.c.bf16 %v734_v49, %v733_v47  ;;  %v802_v12 = vld [vmem:[#allocation2 + $0x15a] sm:$0xff]  ;;  %v770_v47 = vpack.c.bf16 %v750_v43, %v749_v42 }
  0x89   : > { %1718 = vmatprep.mubr.bf16.mxu1 %v818_v13  ;;  %2379 = vmatpush1.bf16.msra.mxu1 %v6916_v27  ;;  %v765_v13 = vpack.c.bf16 %v740_v10, %v739_v56  ;;  %v826_v14 = vpack.c.bf16 %v802_v12, %v801_v11  ;;  %v767_v27 = vpack.c.bf16 %v744_v24, %v743_v23  ;;  %v2067_v12 = vld [vmem:[#allocation2 + $0x8a] sm:$0xff] }
  0x8a   : > { %2380 = vmatprep.subr.bf16.mxu1 %v7026_v0  ;;  %v524_v24 = vpack.c.bf16 %v487_v17, %v486_v16 }
  0x8b   : > { %1645 = vmatpush1.bf16.msra.mxu0 %v7384_v37  ;;  %v823_v37 = vpack.c.bf16 %v796_v52, %v795_v51  ;;  %v491_v51 = vld [vmem:[#allocation2 + $0x59] sm:$0xff]  ;;  %v552_v52 = vld [vmem:[#allocation2 + $0x62] sm:$0xff] }
  0x8c   : > { %6412 = vmatprep.subr.bf16.mxu0 %v7422_v28 }
  0x8d   : > { %2381 = vmatpush1.bf16.msra.mxu1 %v6917_v29  ;;  %v745_v29 = vld [vmem:[#allocation2 + $0x179] sm:$0xff] }
  0x8e   : > { %1181 = vmatmul.mubr.bf16.gmra.mrb[32].mxu0 %v759_v30  ;;  %2382 = vmatprep.subr.bf16.mxu1 %v7026_v0 }
  0x8f   : > { %1188 = vmatprep.mubr.bf16.mxu0 %v820_v31 }
  0x90   : > { %1719 = vmatmul.mubr.bf16.gmra.mrb[48].mxu1 %v758_v20  ;;  %v804_v20 = vld [vmem:[#allocation2 + $0x172] sm:$0xff] }
  0x91   : > { %1726 = vmatprep.mubr.bf16.mxu1 %v819_v3  ;;  %2383 = vmatpush1.bf16.msra.mxu1 %v6918_v34  ;;  %v827_v3 = vpack.c.bf16 %v804_v20, %v803_v19  ;;  %v747_v34 = vld [vmem:[#allocation2 + $0x191] sm:$0xff]  ;;  %v548_v20 = vld [vmem:[#allocation2 + $0x3a] sm:$0xff] }
  0x92   : > { %2384 = vmatprep.subr.bf16.mxu1 %v7026_v0 }
  0x95   : > { %2385 = vmatpush1.bf16.msra.mxu1 %v6919_v18  ;;  %v769_v18 = vpack.c.bf16 %v748_v35, %v747_v34  ;;  %v6934_v34 = vld [vmem:[%s8941_s2 + $0xb0] sm:$0xff]  }
  0x96   : > { %1189 = vmatmul.mubr.bf16.gmra.mrb[36].mxu0 %v760_v36  ;;  %2386 = vmatprep.subr.bf16.mxu1 %v7026_v0 }
  0x97   : > { %1196 = vmatprep.mubr.bf16.mxu0 %v821_v38 }
  0x98   : > { %1727 = vmatmul.mubr.bf16.gmra.mrb[52].mxu1 %v759_v30  ;;  %v746_v30 = vld [vmem:[#allocation2 + $0x181] sm:$0xff] }
  0x99   : > { %1734 = vmatprep.mubr.bf16.mxu1 %v820_v31  ;;  %2387 = vmatpush1.bf16.msra.mxu1 %v6920_v41  ;;  %v807_v31 = vld [vmem:[#allocation2 + $0x192] sm:$0xff]  ;;  %v768_v32 = vpack.c.bf16 %v746_v30, %v745_v29  ;;  %v551_v41 = vld [vmem:[#allocation2 + $0x5a] sm:$0xff]  ;;  %v2069_v29 = vld [vmem:[#allocation2 + $0xa2] sm:$0xff] }
  0x9a   : > { %2388 = vmatprep.subr.bf16.mxu1 %v7026_v0  ;;  %v829_v33 = vpack.c.bf16 %v808_v9, %v807_v31  ;;  %v2070_v30 = vld [vmem:[#allocation2 + $0xaa] sm:$0xff]  ;;  %v488_v9 = vld [vmem:[#allocation2 + $0x39] sm:$0xff] }
  0x9d   : > { %2389 = vmatpush1.bf16.msra.mxu1 %v6922_v45  ;;  %v7481_v45 = vpack.c.bf16 %v551_v41, %v550_v40  ;;  %v2072_v40 = vld [vmem:[#allocation2 + $0xba] sm:$0xff] }
  0x9e   : > { %1197 = vmatmul.mubr.bf16.gmra.mrb[40].mxu0 %v761_v44  ;;  %2390 = vmatprep.subr.bf16.mxu1 %v7026_v0 }
  0x9f   : > { %1204 = vmatprep.mubr.bf16.mxu0 %v822_v22 }
  0xa0   : > { %1735 = vmatmul.mubr.bf16.gmra.mrb[56].mxu1 %v760_v36  ;;  %v809_v36 = vld [vmem:[#allocation2 + $0x1a2] sm:$0xff] }
  0xa1   : > { %1742 = vmatprep.mubr.bf16.mxu1 %v821_v38  ;;  %2391 = vmatpush1.bf16.msra.mxu1 %v6923_v50  ;;  %v810_v38 = vld [vmem:[#allocation2 + $0x1aa] sm:$0xff] }
  0xa2   : > { %2392 = vmatprep.subr.bf16.mxu1 %v7026_v0  ;;  %v830_v39 = vpack.c.bf16 %v810_v38, %v809_v36  ;;  %v490_v50 = vld [vmem:[#allocation2 + $0x51] sm:$0xff]  ;;  %v2009_v36 = vld [vmem:[#allocation2 + $0xa1] sm:$0xff]  ;;  %v2010_v38 = vld [vmem:[#allocation2 + $0xa9] sm:$0xff] }
  0xa3   : > { %v2045_v43 = vpack.c.bf16 %v2010_v38, %v2009_v36  ;;  %v608_v38 = vld [vmem:[#allocation2 + $0x3b] sm:$0xff] }
  0xa5   : > { %2393 = vmatpush1.bf16.msra.mxu1 %v6925_v54  ;;  %v483_v54 = vld [vmem:[#allocation2 + $0x9] sm:$0xff] }
  0xa6   : > { %1205 = vmatmul.mubr.bf16.gmra.mrb[44].mxu0 %v762_v53  ;;  %2394 = vmatprep.subr.bf16.mxu1 %v7026_v0 }
  0xa7   : > { %1212 = vmatprep.mubr.bf16.mxu0 %v823_v37 }
  0xa8   : > { %1743 = vmatmul.mubr.bf16.gmra.mrb[60].mxu1 %v761_v44  ;;  %v542_v44 = vld [vmem:[#allocation2 + $0x2] sm:$0xff] }
  0xa9   : > { %1750 = vmatprep.mubr.bf16.mxu1 %v822_v22  ;;  %2395 = vmatpush1.bf16.msra.mxu1 %v6927_v59  ;;  %v543_v22 = vld [vmem:[#allocation2 + $0xa] sm:$0xff]  ;;  %v7484_v59 = vpack.c.bf16 %v491_v51, %v490_v50  ;;  %v2012_v51 = vld [vmem:[#allocation2 + $0xb9] sm:$0xff] }
  0xaa   : > { %2396 = vmatprep.subr.bf16.mxu1 %v7026_v0  ;;  %v582_v49 = vpack.c.bf16 %v543_v22, %v542_v44  ;;  %v2011_v50 = vld [vmem:[#allocation2 + $0xb1] sm:$0xff] }
  0xad   : > { %2397 = vmatpush1.bf16.msra.mxu1 %v6929_v63  ;;  %v492_v63 = vld [vmem:[#allocation2 + $0x61] sm:$0xff] }
  0xae   : > { %1213 = vmatmul.mubr.bf16.gmra.mrb[48].mxu0 %v763_v48  ;;  %2398 = vmatprep.subr.bf16.mxu1 %v7026_v0  ;;  %v7497_v56 = vpack.c.bf16 %v493_v46, %v492_v63  ;;  %v2075_v63 = vld [vmem:[#allocation2 + $0xda] sm:$0xff]  ;;  %v2076_v46 = vld [vmem:[#allocation2 + $0xe2] sm:$0xff] }
  0xaf   : > { %1220 = vmatprep.mubr.bf16.mxu0 %v824_v62 }
  0xb0   : > { %1751 = vmatmul.mubr.bf16.gmra.mrb[64].mxu1 %v762_v53  ;;  %v553_v53 = vld [vmem:[#allocation2 + $0x6a] sm:$0xff] }
  0xb1   : > { %1758 = vmatprep.mubr.bf16.mxu1 %v823_v37  ;;  %2399 = vmatpush1.bf16.msra.mxu1 %v6931_v57  ;;  %v482_v37 = vld [vmem:[#allocation2 + $0x1] sm:$0xff]  ;;  %v7486_v60 = vpack.c.bf16 %v553_v53, %v552_v52  ;;  %v2074_v52 = vld [vmem:[#allocation2 + $0xd2] sm:$0xff] }
  0xb2   : > { %2400 = vmatprep.subr.bf16.mxu1 %v7026_v0  ;;  %v522_v61 = vpack.c.bf16 %v483_v54, %v482_v37  ;;  %v555_v57 = vld [vmem:[#allocation2 + $0x82] sm:$0xff]  ;;  %v2046_v54 = vpack.c.bf16 %v2012_v51, %v2011_v50  ;;  %v456_v50 = vld [vmem:[%s7282_s13 + $0x78] sm:$0xff] }
  0xb3   : > { %v7499_v10 = vpack.c.bf16 %v555_v57, %v554_v1  ;;  %477 = vst [vmem:[#allocation2 + $0x1b8] sm:$0xff] %v456_v50 }
  0xb5   : > { %2401 = vmatpush1.bf16.msra.mxu1 %v6933_v8  ;;  %v547_v8 = vld [vmem:[#allocation2 + $0x32] sm:$0xff] }
  0xb6   : > { %1221 = vmatmul.mubr.bf16.gmra.mrb[52].mxu0 %v764_v6  ;;  %2402 = vmatprep.subr.bf16.mxu1 %v7026_v0 }
  0xb7   : > { %1228 = vmatprep.mubr.bf16.mxu0 %v825_v7 }
  0xb8   : > { %1759 = vmatmul.mubr.bf16.gmra.mrb[68].mxu1 %v763_v48  ;;  %v583_v48 = vpack.c.bf16 %v545_v58, %v544_v55 }
  0xb9   : > { %1766 = vmatprep.mubr.bf16.mxu1 %v824_v62  ;;  %2403 = vmatpush1.bf16.msra.mxu1 %v6935_v5  ;;  %v6924_v62 = vld [vmem:[%s8941_s2 + $0x88] sm:$0xff]   ;;  %v523_v5 = vpack.c.bf16 %v485_v4, %v484_v2  ;;  %v2108_v2 = vpack.c.bf16 %v2076_v46, %v2075_v63 }
  0xba   : > { %2404 = vmatprep.subr.bf16.mxu1 %v7026_v0  ;;  %v828_v0 = vpack.c.bf16 %v806_v26, %v805_v25  ;;  %v2007_v26 = vld [vmem:[#allocation2 + $0x89] sm:$0xff]  ;;  %v2019_v63 = vld [vmem:[#allocation2 + $0x101] sm:$0xff] }
  0xbb   : > { %v602_v4 = vld [vmem:[#allocation2 + $0x3] sm:$0xff] }
  0xbc   : > { %v2020_v46 = vld [vmem:[#allocation2 + $0x109] sm:$0xff] }
  0xbd   : > { %2405 = vmatpush1.bf16.msra.mxu1 %v6937_v15  ;;  %v495_v15 = vld [vmem:[#allocation2 + $0x81] sm:$0xff] }
  0xbe   : > { %1229 = vmatmul.mubr.bf16.gmra.mrb[56].mxu0 %v765_v13 }
  0xbf   : > { %1236 = vmatprep.mubr.bf16.mxu0 %v826_v14 }
  0xc0   : > { %1767 = vmatmul.mubr.bf16.gmra.mrb[72].mxu1 %v764_v6  ;;  %v6926_v6 = vld [vmem:[%s8941_s2 + $0x90] sm:$0xff]  }
  0xc1   : > { %1774 = vmatprep.mubr.bf16.mxu1 %v825_v7  ;;  %v546_v7 = vld [vmem:[#allocation2 + $0x2a] sm:$0xff] }
  0xc2   : > { %v584_v11 = vpack.c.bf16 %v547_v8, %v546_v7 }
  0xc6   : > { %1237 = vmatmul.mubr.bf16.gmra.mrb[60].mxu0 %v766_v21 }
  0xc7   : > { %1244 = vmatprep.mubr.bf16.mxu0 %v827_v3 }
  0xc8   : > { %1775 = vmatmul.mubr.bf16.gmra.mrb[76].mxu1 %v765_v13  ;;  %v2068_v13 = vld [vmem:[#allocation2 + $0x92] sm:$0xff] }
  0xc9   : > { %1782 = vmatprep.mubr.bf16.mxu1 %v826_v14  ;;  %v494_v14 = vld [vmem:[#allocation2 + $0x79] sm:$0xff]  ;;  %v2104_v19 = vpack.c.bf16 %v2068_v13, %v2067_v12 }
  0xca   : > { %v7509_v23 = vpack.c.bf16 %v495_v15, %v494_v14  ;;  %v2078_v12 = vld [vmem:[#allocation2 + $0xfa] sm:$0xff] }
  0xcb   : > { %v604_v14 = vld [vmem:[#allocation2 + $0x13] sm:$0xff]  ;;  %v605_v15 = vld [vmem:[#allocation2 + $0x1b] sm:$0xff] }
  0xce   : > { %1245 = vmatmul.mubr.bf16.gmra.mrb[64].mxu0 %v767_v27 }
  0xcf   : > { %1252 = vmatprep.mubr.bf16.mxu0 %v828_v0 }
  0xd0   : > { %1783 = vmatmul.mubr.bf16.gmra.mrb[80].mxu1 %v766_v21  ;;  %v549_v21 = vld [vmem:[#allocation2 + $0x42] sm:$0xff] }
  0xd1   : > { %1790 = vmatprep.mubr.bf16.mxu1 %v827_v3  ;;  %v6930_v3 = vld [vmem:[%s8941_s2 + $0xa0] sm:$0xff]   ;;  %v585_v25 = vpack.c.bf16 %v549_v21, %v548_v20  ;;  %v607_v20 = vld [vmem:[#allocation2 + $0x33] sm:$0xff] }
  0xd6   : > { %1253 = vmatmul.mubr.bf16.gmra.mrb[68].mxu0 %v768_v32 }
  0xd7   : > { %1260 = vmatprep.mubr.bf16.mxu0 %v829_v33  ;;  %v2105_v33 = vpack.c.bf16 %v2070_v30, %v2069_v29  ;;  %v2018_v29 = vld [vmem:[#allocation2 + $0xf9] sm:$0xff] }
  0xd8   : > { %1791 = vmatmul.mubr.bf16.gmra.mrb[84].mxu1 %v767_v27  ;;  %v2008_v27 = vld [vmem:[#allocation2 + $0x91] sm:$0xff] }
  0xd9   : > { %1798 = vmatprep.mubr.bf16.mxu1 %v828_v0  ;;  %v6932_v0 = vld [vmem:[%s8941_s2 + $0xa8] sm:$0xff]   ;;  %v2044_v31 = vpack.c.bf16 %v2008_v27, %v2007_v26  ;;  %v643_v26 = vpack.c.bf16 %v605_v15, %v604_v14 }
  0xde   : > { %1261 = vmatmul.mubr.bf16.gmra.mrb[72].mxu0 %v769_v18  ;;  %v6936_v18 = vld [vmem:[%s8941_s2 + $0xb8] sm:$0xff]  }
  0xdf   : > { %1268 = vmatprep.mubr.bf16.mxu0 %v830_v39  ;;  %v2071_v39 = vld [vmem:[#allocation2 + $0xb2] sm:$0xff] }
  0xe0   : > { %1799 = vmatmul.mubr.bf16.gmra.mrb[88].mxu1 %v768_v32  ;;  %v489_v32 = vld [vmem:[#allocation2 + $0x41] sm:$0xff]  ;;  %v2106_v22 = vpack.c.bf16 %v2072_v40, %v2071_v39  ;;  %v610_v39 = vld [vmem:[#allocation2 + $0x53] sm:$0xff] }
  0xe1   : > { %2406 = vmatprep.mubr.bf16.mxu1 %v7481_v45  ;;  %v525_v35 = vpack.c.bf16 %v489_v32, %v488_v9  ;;  %v6939_v9 = vld [vmem:[%s8941_s2 + $0x208] sm:$0xff]  }
  0xe2   : > { %v2079_v32 = vld [vmem:[#allocation2 + $0x102] sm:$0xff] }
  0xe6   : > { %1269 = vmatmul.mubr.bf16.gmra.mrb[76].mxu0 %v770_v47 }
  0xe7   : > { %1646 = vmatprep.mubr.bf16.mxu0 %v582_v49  ;;  %v7531_v49 = vld [vmem:[%s8941_s2 + $0x200] sm:$0xff]  }
  0xe8   : > { %2407 = vmatmul.mubr.bf16.vlgmr.msra.gmra.mrb[92].mxu1 %v7484_v59 }
  0xe9   : > { %2414 = vmatprep.mubr.bf16.mxu1 %v7486_v60 }
  0xee   : > { %1647 = vmatmul.mubr.bf16.vlgmr.msra.gmra.mrb[80].mxu0 %v522_v61 }
  0xef   : > { %6413 = vmatpush3.bf16.msra.mxu0 %v7422_v28  ;;  %1654 = vmatprep.mubr.bf16.mxu0 %v583_v48  ;;  %v6928_v28 = vld [vmem:[%s8941_s2 + $0x98] sm:$0xff]   ;;  %v2013_v48 = vld [vmem:[#allocation2 + $0xc9] sm:$0xff] }
  0xf0   : > { %6414 = vmatprep.subr.bf16.mxu0 %v6924_v62  ;;  %2415 = vmatmul.mubr.bf16.gmra.mrb[96].mxu1 %v7497_v56 }
  0xf1   : > { %2422 = vmatprep.mubr.bf16.mxu1 %v7499_v10 }
  0xf3   : > { %6415 = vmatpush3.bf16.msra.mxu0 %v6924_v62  ;;  %v2014_v62 = vld [vmem:[#allocation2 + $0xd1] sm:$0xff] }
  0xf4   : > { %6416 = vmatprep.subr.bf16.mxu0 %v6926_v6  ;;  %v2047_v57 = vpack.c.bf16 %v2014_v62, %v2013_v48 }
  0xf6   : > { %1655 = vmatmul.mubr.bf16.gmra.mrb[84].mxu0 %v523_v5  ;;  %v2015_v5 = vld [vmem:[#allocation2 + $0xd9] sm:$0xff] }
  0xf7   : > { %1662 = vmatprep.mubr.bf16.mxu0 %v584_v11  ;;  %6417 = vmatpush3.bf16.msra.mxu0 %v6926_v6  ;;  %v603_v6 = vld [vmem:[#allocation2 + $0xb] sm:$0xff]  ;;  %v2016_v11 = vld [vmem:[#allocation2 + $0xe1] sm:$0xff] }
  0xf8   : > { %6418 = vmatprep.subr.bf16.mxu0 %v6928_v28  ;;  %2423 = vmatmul.mubr.bf16.gmra.mrb[100].mxu1 %v7509_v23  ;;  %v642_v8 = vpack.c.bf16 %v603_v6, %v602_v4  ;;  %v2081_v4 = vld [vmem:[#allocation2 + $0x11a] sm:$0xff]  ;;  %v2082_v6 = vld [vmem:[#allocation2 + $0x122] sm:$0xff] }
  0xf9   : > { %2430 = vmatprep.mubr.bf16.mxu1 %v2104_v19  ;;  %v606_v19 = vld [vmem:[#allocation2 + $0x2b] sm:$0xff]  ;;  %v2111_v15 = vpack.c.bf16 %v2082_v6, %v2081_v4 }
  0xfa   : > { %v644_v27 = vpack.c.bf16 %v607_v20, %v606_v19  ;;  %v6942_v19 = vld [vmem:[%s8941_s2 + $0x220] sm:$0xff]   ;;  %v459_v20 = vld [vmem:[%s7282_s13 + $0x90] sm:$0xff] }
  0xfb   : > { %6419 = vmatpush3.bf16.msra.mxu0 %v6928_v28  ;;  %v2077_v28 = vld [vmem:[#allocation2 + $0xf2] sm:$0xff]  ;;  %480 = vst [vmem:[#allocation2 + $0x1d0] sm:$0xff] %v459_v20  ;;  %v2023_v4 = vld [vmem:[#allocation2 + $0x129] sm:$0xff] }
  0xfc   : > { %6420 = vmatprep.subr.bf16.mxu0 %v6930_v3  ;;  %v2109_v17 = vpack.c.bf16 %v2078_v12, %v2077_v28  ;;  %v2050_v28 = vpack.c.bf16 %v2020_v46, %v2019_v63  ;;  %v614_v12 = vld [vmem:[#allocation2 + $0x7b] sm:$0xff]  ;;  %v2024_v6 = vld [vmem:[#allocation2 + $0x131] sm:$0xff] }
  0xfd   : > { %v620_v20 = vld [vmem:[#allocation2 + $0xb3] sm:$0xff] }
  0xfe   : > { %1663 = vmatmul.mubr.bf16.gmra.mrb[88].mxu0 %v524_v24 }
  0xff   : > { %1670 = vmatprep.mubr.bf16.mxu0 %v585_v25  ;;  %6421 = vmatpush3.bf16.msra.mxu0 %v6930_v3 }
 0x100   : > { %6422 = vmatprep.subr.bf16.mxu0 %v6932_v0  ;;  %2431 = vmatmul.mubr.bf16.gmra.mrb[104].mxu1 %v2044_v31 }
 0x101   : > { %2438 = vmatprep.mubr.bf16.mxu1 %v2105_v33  ;;  %v2080_v33 = vld [vmem:[#allocation2 + $0x10a] sm:$0xff] }
 0x102   : > { %v7521_v41 = vpop.f32.mrb[0].mxu1 }
 0x103   : > { %6423 = vmatpush3.bf16.msra.mxu0 %v6932_v0  ;;  %v1311_v42 = vpop.f32.mrb[1].mxu1  ;;  %v2017_v0 = vld [vmem:[#allocation2 + $0xf1] sm:$0xff] }
 0x104   : > { %6424 = vmatprep.subr.bf16.mxu0 %v6934_v34  ;;  %v7524_v44 = vpop.f32.mrb[2].mxu1  ;;  %v2049_v36 = vpack.c.bf16 %v2018_v29, %v2017_v0 }
 0x105   : > { %v7526_v47 = vpop.f32.mrb[3].mxu1 }
 0x106   : > { %1671 = vmatmul.mubr.bf16.gmra.mrb[92].mxu0 %v525_v35 }
 0x107   : > { %1678 = vmatprep.mubr.bf16.mxu0 %v7481_v45  ;;  %6425 = vmatpush3.bf16.msra.mxu0 %v6934_v34  ;;  %v2073_v45 = vld [vmem:[#allocation2 + $0xca] sm:$0xff] }
 0x108   : > { %6426 = vmatprep.subr.bf16.mxu0 %v6936_v18  ;;  %2439 = vmatmul.mubr.bf16.gmra.mrb[108].mxu1 %v2045_v43  ;;  %v2107_v58 = vpack.c.bf16 %v2074_v52, %v2073_v45  ;;  %v611_v43 = vld [vmem:[#allocation2 + $0x5b] sm:$0xff] }
 0x109   : > { %2446 = vmatprep.mubr.bf16.mxu1 %v2106_v22  ;;  %v6940_v22 = vld [vmem:[%s8941_s2 + $0x210] sm:$0xff]   ;;  %v457_v45 = vld [vmem:[%s7282_s13 + $0x80] sm:$0xff]  ;;  %v7589_v62 = vpack.c.bf16 %v611_v43, %v610_v39 }
 0x10a   : > { %v7534_v53 = vpop.f32.mrb[4].mxu1  ;;  %478 = vst [vmem:[#allocation2 + $0x1c0] sm:$0xff] %v457_v45  ;;  %v616_v43 = vld [vmem:[#allocation2 + $0x8b] sm:$0xff] }
 0x10b   : > { %6427 = vmatpush3.bf16.msra.mxu0 %v6936_v18  ;;  %v7537_v37 = vpop.f32.mrb[5].mxu1  ;;  %v609_v18 = vld [vmem:[#allocation2 + $0x43] sm:$0xff]  ;;  %v619_v45 = vld [vmem:[#allocation2 + $0xab] sm:$0xff] }
 0x10c   : > { %6468 = vmatprep.subr.bf16.mxu0 %v7531_v49  ;;  %v7540_v55 = vpop.f32.mrb[6].mxu1 }
 0x10d   : > { %v7542_v61 = vpop.f32.mrb[7].mxu1 }
 0x10e   : > { %1679 = vmatmul.mubr.bf16.gmra.mrb[96].mxu0 %v7484_v59 }
 0x10f   : > { %1686 = vmatprep.mubr.bf16.mxu0 %v7486_v60 }
 0x110   : > { %2447 = vmatmul.mubr.bf16.gmra.mrb[112].mxu1 %v2046_v54  ;;  %v645_v54 = vpack.c.bf16 %v609_v18, %v608_v38  ;;  %v2084_v38 = vld [vmem:[#allocation2 + $0x132] sm:$0xff] }
 0x111   : > { %2454 = vmatprep.mubr.bf16.mxu1 %v2107_v58  ;;  %v458_v58 = vld [vmem:[%s7282_s13 + $0x88] sm:$0xff] }
 0x112   : > { %v7544_v1 = vpop.f32.mrb[8].mxu1  ;;  %479 = vst [vmem:[#allocation2 + $0x1c8] sm:$0xff] %v458_v58 }
 0x113   : > { %v7547_v59 = vpop.f32.mrb[9].mxu1 }
 0x114   : > { %v7550_v60 = vpop.f32.mrb[10].mxu1 }
 0x115   : > { %v7552_v7 = vpop.f32.mrb[11].mxu1 }
 0x116   : > { %1687 = vmatmul.mubr.bf16.gmra.mrb[100].mxu0 %v7497_v56 }
 0x117   : > { %1694 = vmatprep.mubr.bf16.mxu0 %v7499_v10  ;;  %v2048_v10 = vpack.c.bf16 %v2016_v11, %v2015_v5  ;;  %v612_v5 = vld [vmem:[#allocation2 + $0x63] sm:$0xff] }
 0x118   : > { %2455 = vmatmul.mubr.bf16.gmra.mrb[116].mxu1 %v2047_v57 }
 0x119   : > { %2462 = vmatprep.mubr.bf16.mxu1 %v2108_v2 }
 0x11a   : > { %v7554_v56 = vpop.f32.mrb[12].mxu1 }
 0x11b   : > { %v7557_v13 = vpop.f32.mrb[13].mxu1 }
 0x11c   : > { %v7559_v16 = vpop.f32.mrb[14].mxu1 }
 0x11d   : > { %v7561_v21 = vpop.f32.mrb[15].mxu1 }
 0x11e   : > { %1695 = vmatmul.mubr.bf16.gmra.mrb[104].mxu0 %v7509_v23 }
 0x11f   : > { %6428 = vmatprep.mubr.bf16.mxu0 %v642_v8 }
 0x120   : > { %2463 = vmatmul.mubr.bf16.gmra.mrb[120].mxu1 %v2048_v10  ;;  %v615_v10 = vld [vmem:[#allocation2 + $0x83] sm:$0xff] }
 0x121   : > { %v1118_v3 = vpop.f32.mrb[0].mxu0  ;;  %2470 = vmatprep.mubr.bf16.mxu1 %v2109_v17  ;;  %v7616_v29 = vpack.c.bf16 %v615_v10, %v614_v12  ;;  %v2086_v12 = vld [vmem:[#allocation2 + $0x14a] sm:$0xff] }
 0x122   : > { %v7563_v24 = vadd.f32 %v1311_v42, %v1118_v3  ;;  %v1120_v25 = vpop.f32.mrb[1].mxu0  ;;  %v2110_v42 = vpack.c.bf16 %v2080_v33, %v2079_v32  ;;  %v460_v3 = vld [vmem:[%s7282_s13 + $0x98] sm:$0xf] }
 0x123   : > { %v1121_v23 = vpop.f32.mrb[2].mxu0  ;;  %v7571_v34 = vpop.f32.mrb[16].mxu1  ;;  %481 = vst [vmem:[#allocation2 + $0x1d8] sm:$0xf] %v460_v3 }
 0x124   : > { %v7566_v30 = vadd.f32 %v7526_v47, %v1121_v23  ;;  %v1123_v31 = vpop.f32.mrb[3].mxu0  ;;  %v7573_v35 = vpop.f32.mrb[17].mxu1 }
 0x125   : > { %v7576_v40 = vpop.f32.mrb[18].mxu1  ;;  %v2021_v31 = vld [vmem:[#allocation2 + $0x119] sm:$0xff] }
 0x126   : > { %6429 = vmatmul.mubr.bf16.vlgmr.msra.gmra.mrb[108].mxu0 %v643_v26  ;;  %v7581_v47 = vpop.f32.mrb[19].mxu1 }
 0x127   : > { %6469 = vmatpush3.bf16.msra.mxu0 %v7531_v49  ;;  %6432 = vmatprep.mubr.bf16.mxu0 %v644_v27 }
 0x128   : > { %6470 = vmatprep.subr.bf16.mxu0 %v6939_v9  ;;  %2471 = vmatmul.mubr.bf16.gmra.mrb[124].mxu1 %v2049_v36  ;;  %v2083_v36 = vld [vmem:[#allocation2 + $0x12a] sm:$0xff] }
 0x129   : > { %v1126_v51 = vpop.f32.mrb[4].mxu0  ;;  %2478 = vmatprep.mubr.bf16.mxu1 %v2110_v42  ;;  %v2112_v50 = vpack.c.bf16 %v2084_v38, %v2083_v36 }
 0x12a   : > { %v7586_v49 = vadd.f32 %v7521_v41, %v1126_v51  ;;  %v1128_v52 = vpop.f32.mrb[5].mxu0  ;;  %v6941_v41 = vld [vmem:[%s8941_s2 + $0x218] sm:$0xff]   ;;  %v618_v51 = vld [vmem:[#allocation2 + $0xa3] sm:$0xff] }
 0x12b   : > { %v1129_v48 = vpop.f32.mrb[6].mxu0  ;;  %6471 = vmatpush3.bf16.msra.mxu0 %v6939_v9  ;;  %v7597_v8 = vpop.f32.mrb[20].mxu1  ;;  %v2022_v9 = vld [vmem:[#allocation2 + $0x121] sm:$0xff] }
 0x12c   : > { %v7592_v57 = vadd.f32 %v7524_v44, %v1129_v48  ;;  %v1131_v2 = vpop.f32.mrb[7].mxu0  ;;  %6472 = vmatprep.subr.bf16.mxu0 %v6940_v22  ;;  %v7599_v11 = vpop.f32.mrb[21].mxu1  ;;  %v613_v44 = vld [vmem:[#allocation2 + $0x6b] sm:$0xff]  ;;  %v2051_v42 = vpack.c.bf16 %v2022_v9, %v2021_v31 }
 0x12d   : > { %v7602_v14 = vpop.f32.mrb[22].mxu1  ;;  %v7614_v27 = vpack.c.bf16 %v613_v44, %v612_v5  ;;  %v2085_v44 = vld [vmem:[#allocation2 + $0x142] sm:$0xff] }
 0x12e   : > { %6433 = vmatmul.mubr.bf16.gmra.mrb[112].mxu0 %v645_v54  ;;  %v7604_v17 = vpop.f32.mrb[23].mxu1  ;;  %v6944_v54 = vld [vmem:[%s8941_s2 + $0x230] sm:$0xff]  }
 0x12f   : > { %6436 = vmatprep.mubr.bf16.mxu0 %v7589_v62  ;;  %6473 = vmatpush3.bf16.msra.mxu0 %v6940_v22 }
 0x130   : > { %6474 = vmatprep.subr.bf16.mxu0 %v6941_v41  ;;  %2479 = vmatmul.mubr.bf16.gmra.mrb[128].mxu1 %v2050_v28 }
 0x131   : > { %v1134_v25 = vpop.f32.mrb[8].mxu0  ;;  %2486 = vmatprep.mubr.bf16.mxu1 %v2111_v15 }
 0x132   : > { %v7612_v26 = vadd.f32 %v7537_v37, %v1134_v25  ;;  %v1136_v23 = vpop.f32.mrb[9].mxu0  ;;  %v6943_v37 = vld [vmem:[%s8941_s2 + $0x228] sm:$0xff]   ;;  %v2113_v25 = vpack.c.bf16 %v2086_v12, %v2085_v44 }
 0x133   : > { %v1137_v0 = vpop.f32.mrb[10].mxu0  ;;  %6475 = vmatpush3.bf16.msra.mxu0 %v6941_v41  ;;  %v7624_v18 = vpop.f32.mrb[24].mxu1  ;;  %v7642_v41 = vpack.c.bf16 %v619_v45, %v618_v51  ;;  %v622_v23 = vld [vmem:[#allocation2 + $0xcb] sm:$0xff] }
 0x134   : > { %8948 = vst [vmem:[#allocation4_spill] sm:$0xff] %v7612_v26  ;;  %v7619_v32 = vadd.f32 %v7542_v61, %v1137_v0  ;;  %v1139_v33 = vpop.f32.mrb[11].mxu0  ;;  %6476 = vmatprep.subr.bf16.mxu0 %v6942_v19  ;;  %v7627_v39 = vpop.f32.mrb[25].mxu1  ;;  %v617_v61 = vld [vmem:[#allocation2 + $0x93] sm:$0xff] }
 0x135   : > { %v7630_v22 = vpop.f32.mrb[26].mxu1  ;;  %v7640_v46 = vpack.c.bf16 %v617_v61, %v616_v43  ;;  %v623_v0 = vld [vmem:[#allocation2 + $0xd3] sm:$0xff]  ;;  %v2025_v43 = vld [vmem:[#allocation2 + $0x141] sm:$0xff]  ;;  %v2026_v61 = vld [vmem:[#allocation2 + $0x149] sm:$0xff] }
 0x136   : > { %8949 = vst [vmem:[#allocation5_spill] sm:$0xff] %v7619_v32  ;;  %6437 = vmatmul.mubr.bf16.gmra.mrb[116].mxu0 %v7614_v27  ;;  %v7632_v52 = vpop.f32.mrb[27].mxu1  ;;  %v2087_v45 = vld [vmem:[#allocation2 + $0x152] sm:$0xff] }
 0x137   : > { %6440 = vmatprep.mubr.bf16.mxu0 %v7616_v29  ;;  %6477 = vmatpush3.bf16.msra.mxu0 %v6942_v19  ;;  %v2052_v19 = vpack.c.bf16 %v2024_v6, %v2023_v4  ;;  %v625_v4 = vld [vmem:[#allocation2 + $0xe3] sm:$0xff] }
 0x138   : > { %6478 = vmatprep.subr.bf16.mxu0 %v6943_v37  ;;  %2487 = vmatmul.mubr.bf16.gmra.mrb[132].mxu1 %v2051_v42  ;;  %v7665_v42 = vpack.c.bf16 %v623_v0, %v622_v23  ;;  %v2027_v0 = vld [vmem:[#allocation2 + $0x151] sm:$0xff] }
 0x139   : > { %v1142_v58 = vpop.f32.mrb[12].mxu0  ;;  %2494 = vmatprep.mubr.bf16.mxu1 %v2112_v50 }
 0x13a   : > { %v7638_v48 = vadd.f32 %v7534_v53, %v1142_v58  ;;  %v1144_v63 = vpop.f32.mrb[13].mxu0  ;;  %v6945_v53 = vld [vmem:[%s8941_s2 + $0x238] sm:$0xff]  }
 0x13b   : > { %v1145_v2 = vpop.f32.mrb[14].mxu0  ;;  %6479 = vmatpush3.bf16.msra.mxu0 %v6943_v37  ;;  %v7650_v10 = vpop.f32.mrb[28].mxu1  ;;  %v2053_v63 = vpack.c.bf16 %v2026_v61, %v2025_v43  ;;  %v2089_v43 = vld [vmem:[#allocation2 + $0x16a] sm:$0xff]  ;;  %v2090_v61 = vld [vmem:[#allocation2 + $0x172] sm:$0xff] }
 0x13c   : > { %8950 = vst [vmem:[#allocation6_spill] sm:$0xff] %v7638_v48  ;;  %v7645_v5 = vadd.f32 %v7540_v55, %v1145_v2  ;;  %v1147_v28 = vpop.f32.mrb[15].mxu0  ;;  %6480 = vmatprep.subr.bf16.mxu0 %v6944_v54  ;;  %v7653_v15 = vpop.f32.mrb[29].mxu1  ;;  %v621_v55 = vld [vmem:[#allocation2 + $0xbb] sm:$0xff] }
 0x13d   : > { %v7656_v3 = vpop.f32.mrb[30].mxu1  ;;  %v7663_v36 = vpack.c.bf16 %v621_v55, %v620_v20  ;;  %v624_v2 = vld [vmem:[#allocation2 + $0xdb] sm:$0xff] }
 0x13e   : > { %8951 = vst [vmem:[#allocation7_spill] sm:$0xff] %v7645_v5  ;;  %6441 = vmatmul.mubr.bf16.gmra.mrb[120].mxu0 %v7640_v46  ;;  %v7658_v31 = vpop.f32.mrb[31].mxu1  ;;  %v7683_v55 = vpack.c.bf16 %v625_v4, %v624_v2  ;;  %v2115_v4 = vpack.c.bf16 %v2090_v61, %v2089_v43 }
 0x13f   : > { %6444 = vmatprep.mubr.bf16.mxu0 %v7642_v41  ;;  %6481 = vmatpush3.bf16.msra.mxu0 %v6944_v54  ;;  %v2088_v54 = vld [vmem:[#allocation2 + $0x15a] sm:$0xff] }
 0x140   : > { %6482 = vmatprep.subr.bf16.mxu0 %v6945_v53  ;;  %2495 = vmatmul.mubr.bf16.gmra.mrb[136].mxu1 %v2052_v19  ;;  %v2114_v28 = vpack.c.bf16 %v2088_v54, %v2087_v45  ;;  %v628_v54 = vld [vmem:[#allocation2 + $0x103] sm:$0xff] }
 0x141   : > { %v1150_v9 = vpop.f32.mrb[16].mxu0  ;;  %2502 = vmatprep.mubr.bf16.mxu1 %v2113_v25 }
 0x142   : > { %v7661_v33 = vadd.f32 %v7547_v59, %v1150_v9  ;;  %v1152_v37 = vpop.f32.mrb[17].mxu0  ;;  %v2028_v9 = vld [vmem:[#allocation2 + $0x159] sm:$0xff] }
 0x143   : > { %v1153_v38 = vpop.f32.mrb[18].mxu0  ;;  %6483 = vmatpush3.bf16.msra.mxu0 %v6945_v53  ;;  %v7670_v58 = vpop.f32.mrb[32].mxu1  ;;  %v626_v53 = vld [vmem:[#allocation2 + $0xf3] sm:$0xff]  ;;  %v2054_v45 = vpack.c.bf16 %v2028_v9, %v2027_v0 }
 0x144   : > { %8952 = vst [vmem:[#allocation8_spill] sm:$0xff] %v7661_v33  ;;  %v7668_v50 = vadd.f32 %v7552_v7, %v1153_v38  ;;  %v1155_v51 = vpop.f32.mrb[19].mxu0  ;;  %v7673_v59 = vpop.f32.mrb[33].mxu1  ;;  %v627_v7 = vld [vmem:[#allocation2 + $0xfb] sm:$0xff] }
 0x145   : > { %v7676_v6 = vpop.f32.mrb[34].mxu1  ;;  %v7685_v23 = vpack.c.bf16 %v627_v7, %v626_v53  ;;  %v631_v53 = vld [vmem:[#allocation2 + $0x123] sm:$0xff] }
 0x146   : > { %8953 = vst [vmem:[#allocation9_spill] sm:$0xff] %v7668_v50  ;;  %6445 = vmatmul.mubr.bf16.gmra.mrb[124].mxu0 %v7663_v36  ;;  %v7678_v44 = vpop.f32.mrb[35].mxu1  ;;  %v2092_v50 = vld [vmem:[#allocation2 + $0x182] sm:$0xff] }
 0x147   : > { %6448 = vmatprep.mubr.bf16.mxu0 %v7665_v42 }
 0x148   : > { %2503 = vmatmul.mubr.bf16.gmra.mrb[140].mxu1 %v2053_v63  ;;  %v629_v63 = vld [vmem:[#allocation2 + $0x10b] sm:$0xff] }
 0x149   : > { %v1158_v12 = vpop.f32.mrb[20].mxu0  ;;  %2510 = vmatprep.mubr.bf16.mxu1 %v2114_v28 }
 0x14a   : > { %v7681_v19 = vadd.f32 %v7544_v1, %v1158_v12  ;;  %v1160_v20 = vpop.f32.mrb[21].mxu0 }
 0x14b   : > { %v1161_v25 = vpop.f32.mrb[22].mxu0  ;;  %v7690_v51 = vpop.f32.mrb[36].mxu1 }
 0x14c   : > { %8954 = vst [vmem:[#allocation10_spill] sm:$0xff] %v7681_v19  ;;  %v7688_v37 = vadd.f32 %v7550_v60, %v1161_v25  ;;  %v1163_v38 = vpop.f32.mrb[23].mxu0  ;;  %v7693_v1 = vpop.f32.mrb[37].mxu1  ;;  %v630_v60 = vld [vmem:[#allocation2 + $0x11b] sm:$0xff]  ;;  %v7703_v25 = vpack.c.bf16 %v629_v63, %v628_v54  ;;  %v633_v63 = vld [vmem:[#allocation2 + $0x133] sm:$0xff] }
 0x14d   : > { %v7696_v2 = vpop.f32.mrb[38].mxu1  ;;  %v7705_v9 = vpack.c.bf16 %v631_v53, %v630_v60  ;;  %v2029_v38 = vld [vmem:[#allocation2 + $0x169] sm:$0xff]  ;;  %v2091_v19 = vld [vmem:[#allocation2 + $0x17a] sm:$0xff] }
 0x14e   : > { %8955 = vst [vmem:[#allocation11_spill] sm:$0xff] %v7688_v37  ;;  %6449 = vmatmul.mubr.bf16.gmra.mrb[128].mxu0 %v7683_v55  ;;  %v7698_v28 = vpop.f32.mrb[39].mxu1  ;;  %v2030_v37 = vld [vmem:[#allocation2 + $0x171] sm:$0xff]  ;;  %v2116_v60 = vpack.c.bf16 %v2092_v50, %v2091_v19  ;;  %v634_v53 = vld [vmem:[#allocation2 + $0x143] sm:$0xff] }
 0x14f   : > { %6452 = vmatprep.mubr.bf16.mxu0 %v7685_v23  ;;  %v2093_v19 = vld [vmem:[#allocation2 + $0x192] sm:$0xff] }
 0x150   : > { %2511 = vmatmul.mubr.bf16.gmra.mrb[144].mxu1 %v2054_v45  ;;  %v632_v45 = vld [vmem:[#allocation2 + $0x12b] sm:$0xff] }
 0x151   : > { %v1166_v7 = vpop.f32.mrb[24].mxu0  ;;  %2518 = vmatprep.mubr.bf16.mxu1 %v2115_v4 }
 0x152   : > { %v7701_v12 = vadd.f32 %v7557_v13, %v1166_v7  ;;  %v1168_v20 = vpop.f32.mrb[25].mxu0  ;;  %v2055_v7 = vpack.c.bf16 %v2030_v37, %v2029_v38  ;;  %v2031_v37 = vld [vmem:[#allocation2 + $0x179] sm:$0xff]  ;;  %v2032_v38 = vld [vmem:[#allocation2 + $0x181] sm:$0xff] }
 0x153   : > { %v1169_v0 = vpop.f32.mrb[26].mxu0  ;;  %v1704_v33 = vpop.f32.mrb[40].mxu1  ;;  %v635_v20 = vld [vmem:[#allocation2 + $0x14b] sm:$0xff] }
 0x154   : > { %8956 = vst [vmem:[#allocation12_spill] sm:$0xff] %v7701_v12  ;;  %v7708_v43 = vadd.f32 %v7561_v21, %v1169_v0  ;;  %v1171_v61 = vpop.f32.mrb[27].mxu0  ;;  %v1706_v13 = vpop.f32.mrb[41].mxu1  ;;  %v7715_v5 = vpack.c.bf16 %v635_v20, %v634_v53 }
 0x155   : > { %v1707_v54 = vpop.f32.mrb[42].mxu1  ;;  %v7713_v61 = vpack.c.bf16 %v633_v63, %v632_v45  ;;  %v636_v45 = vld [vmem:[#allocation2 + $0x153] sm:$0xff]  ;;  %v637_v63 = vld [vmem:[#allocation2 + $0x15b] sm:$0xff] }
 0x156   : > { %8957 = vst [vmem:[#allocation13_spill] sm:$0xff] %v7708_v43  ;;  %6453 = vmatmul.mubr.bf16.gmra.mrb[132].mxu0 %v7703_v25  ;;  %v1709_v4 = vpop.f32.mrb[43].mxu1 }
 0x157   : > { %6456 = vmatprep.mubr.bf16.mxu0 %v7705_v9  ;;  %v2094_v4 = vld [vmem:[#allocation2 + $0x19a] sm:$0xff] }
 0x158   : > { %2519 = vmatmul.mubr.bf16.gmra.mrb[148].mxu1 %v2055_v7 }
 0x159   : > { %v1174_v12 = vpop.f32.mrb[28].mxu0  ;;  %2526 = vmatprep.mubr.bf16.mxu1 %v2116_v60  ;;  %v2117_v60 = vpack.c.bf16 %v2094_v4, %v2093_v19  ;;  %v2095_v4 = vld [vmem:[#allocation2 + $0x1a2] sm:$0xff] }
 0x15a   : > { %v1368_v21 = vadd.f32 %v7554_v56, %v1174_v12  ;;  %v1176_v0 = vpop.f32.mrb[29].mxu0  ;;  %v2056_v12 = vpack.c.bf16 %v2032_v38, %v2031_v37  ;;  %v2033_v37 = vld [vmem:[#allocation2 + $0x191] sm:$0xff]  ;;  %v2034_v38 = vld [vmem:[#allocation2 + $0x199] sm:$0xff] }
 0x15b   : > { %v1177_v43 = vpop.f32.mrb[30].mxu0  ;;  %v1712_v32 = vpop.f32.mrb[44].mxu1  ;;  %v7725_v0 = vpack.c.bf16 %v637_v63, %v636_v45  ;;  %v640_v63 = vld [vmem:[#allocation2 + $0x17b] sm:$0xff] }
 0x15c   : > { %v1371_v13 = vadd.f32 %v7559_v16, %v1177_v43  ;;  %v7718_v48 = vadd.f32 %v1704_v33, %v1368_v21  ;;  %v1179_v50 = vpop.f32.mrb[31].mxu0  ;;  %v1714_v56 = vpop.f32.mrb[45].mxu1  ;;  %v638_v16 = vld [vmem:[#allocation2 + $0x16b] sm:$0xff]  ;;  %v639_v33 = vld [vmem:[#allocation2 + $0x173] sm:$0xff] }
 0x15d   : > { %v1715_v7 = vpop.f32.mrb[46].mxu1 }
 0x15e   : > { %8958 = vst [vmem:[#allocation14_spill] sm:$0xff] %v7718_v48  ;;  %v7720_v26 = vadd.f32 %v1707_v54, %v1371_v13  ;;  %6457 = vmatmul.mubr.bf16.gmra.mrb[136].mxu0 %v7713_v61  ;;  %v1717_v53 = vpop.f32.mrb[47].mxu1  ;;  %v7727_v13 = vpack.c.bf16 %v639_v33, %v638_v16 }
 0x15f   : > { %6460 = vmatprep.mubr.bf16.mxu0 %v7715_v5  ;;  %v2096_v53 = vld [vmem:[#allocation2 + $0x1aa] sm:$0xff] }
 0x160   : > { %8959 = vst [vmem:[#allocation15_spill] sm:$0xff] %v7720_v26  ;;  %2527 = vmatmul.mubr.bf16.gmra.mrb[152].mxu1 %v2056_v12  ;;  %v2057_v12 = vpack.c.bf16 %v2034_v38, %v2033_v37  ;;  %v2118_v16 = vpack.c.bf16 %v2096_v53, %v2095_v4 }
 0x161   : > { %v1182_v43 = vpop.f32.mrb[32].mxu0  ;;  %2534 = vmatprep.mubr.bf16.mxu1 %v2117_v60  ;;  %v641_v60 = vld [vmem:[#allocation2 + $0x183] sm:$0xff] }
 0x162   : > { %v1376_v20 = vadd.f32 %v7573_v35, %v1182_v43  ;;  %v1184_v21 = vpop.f32.mrb[33].mxu0 }
 0x163   : > { %v1185_v54 = vpop.f32.mrb[34].mxu0  ;;  %v1720_v26 = vpop.f32.mrb[48].mxu1  ;;  %v2035_v21 = vld [vmem:[#allocation2 + $0x1a1] sm:$0xff] }
 0x164   : > { %v1379_v50 = vadd.f32 %v7581_v47, %v1185_v54  ;;  %v7730_v56 = vadd.f32 %v1712_v32, %v1376_v20  ;;  %v1187_v19 = vpop.f32.mrb[35].mxu0  ;;  %v1722_v35 = vpop.f32.mrb[49].mxu1  ;;  %v7737_v20 = vpack.c.bf16 %v641_v60, %v640_v63  ;;  %v2036_v54 = vld [vmem:[#allocation2 + $0x1a9] sm:$0xff] }
 0x165   : > { %v1723_v45 = vpop.f32.mrb[50].mxu1  ;;  %v2097_v19 = vld [vmem:[#allocation2 + $0x1ba] sm:$0xff]  ;;  %v2098_v35 = vld [vmem:[#allocation2 + $0x1c2] sm:$0xff]  ;;  %v2058_v63 = vpack.c.bf16 %v2036_v54, %v2035_v21  ;;  %v2099_v21 = vld [vmem:[#allocation2 + $0x1ca] sm:$0xff] }
 0x166   : > { %v7732_v48 = vadd.f32 %v1715_v7, %v1379_v50  ;;  %6461 = vmatmul.mubr.bf16.gmra.mrb[140].mxu0 %v7725_v0  ;;  %v1725_v33 = vpop.f32.mrb[51].mxu1  ;;  %v2100_v54 = vld [vmem:[#allocation2 + $0x1d2] sm:$0xff] }
 0x167   : > { %6464 = vmatprep.mubr.bf16.mxu0 %v7727_v13 }
 0x168   : > { %2535 = vmatmul.mubr.bf16.gmra.mrb[156].mxu1 %v2057_v12  ;;  %v2119_v12 = vpack.c.bf16 %v2098_v35, %v2097_v19 }
 0x169   : > { %v1190_v47 = vpop.f32.mrb[36].mxu0  ;;  %2542 = vmatprep.mubr.bf16.mxu1 %v2118_v16 }
 0x16a   : > { %v1384_v32 = vadd.f32 %v7571_v34, %v1190_v47  ;;  %v1192_v43 = vpop.f32.mrb[37].mxu0 }
 0x16b   : > { %v1193_v7 = vpop.f32.mrb[38].mxu0  ;;  %v1728_v4 = vpop.f32.mrb[52].mxu1  ;;  %v2038_v43 = vld [vmem:[#allocation2 + $0x1c1] sm:$0xff] }
 0x16c   : > { %v1387_v37 = vadd.f32 %v7576_v40, %v1193_v7  ;;  %v7740_v38 = vadd.f32 %v1720_v26, %v1384_v32  ;;  %v1195_v50 = vpop.f32.mrb[39].mxu0  ;;  %v1730_v34 = vpop.f32.mrb[53].mxu1  ;;  %v2037_v32 = vld [vmem:[#allocation2 + $0x1b9] sm:$0xff] }
 0x16d   : > { %v1731_v60 = vpop.f32.mrb[54].mxu1  ;;  %v2120_v34 = vpack.c.bf16 %v2100_v54, %v2099_v21 }
 0x16e   : > { %v7742_v53 = vadd.f32 %v1723_v45, %v1387_v37  ;;  %6465 = vmatmul.mubr.bf16.gmra.mrb[144].mxu0 %v7737_v20  ;;  %v1733_v16 = vpop.f32.mrb[55].mxu1 }
 0x16f   : > { %6484 = vmatprep.mubr.bf16.mxu0 %v7589_v62 }
 0x170   : > { %2543 = vmatmul.mubr.bf16.gmra.mrb[160].mxu1 %v2058_v63 }
 0x171   : > { %v1198_v33 = vpop.f32.mrb[40].mxu0  ;;  %2550 = vmatprep.mubr.bf16.mxu1 %v2119_v12 }
 0x172   : > { %v1392_v40 = vadd.f32 %v7599_v11, %v1198_v33  ;;  %v1200_v26 = vpop.f32.mrb[41].mxu0  ;;  %v2059_v11 = vpack.c.bf16 %v2038_v43, %v2037_v32  ;;  %v2039_v33 = vld [vmem:[#allocation2 + $0x1c9] sm:$0xff] }
 0x173   : > { %v1201_v47 = vpop.f32.mrb[42].mxu0  ;;  %v1736_v50 = vpop.f32.mrb[56].mxu1 }
 0x174   : > { %v1395_v45 = vadd.f32 %v7604_v17, %v1201_v47  ;;  %v7748_v7 = vadd.f32 %v1728_v4, %v1392_v40  ;;  %v1203_v37 = vpop.f32.mrb[43].mxu0  ;;  %v1738_v19 = vpop.f32.mrb[57].mxu1  ;;  %v2040_v40 = vld [vmem:[#allocation2 + $0x1d1] sm:$0xff] }
 0x175   : > { %v1739_v35 = vpop.f32.mrb[58].mxu1  ;;  %v2060_v43 = vpack.c.bf16 %v2040_v40, %v2039_v33 }
 0x176   : > { %v7750_v62 = vadd.f32 %v1731_v60, %v1395_v45  ;;  %6485 = vmatmul.mubr.bf16.vlgmr.msra.gmra.mrb[148].mxu0 %v7614_v27  ;;  %v1741_v63 = vpop.f32.mrb[59].mxu1 }
 0x177   : > { %6488 = vmatprep.mubr.bf16.mxu0 %v7616_v29 }
 0x178   : > { %2551 = vmatmul.mubr.bf16.gmra.mrb[164].mxu1 %v2059_v11 }
 0x179   : > { %v1206_v12 = vpop.f32.mrb[44].mxu0  ;;  %2558 = vmatprep.mubr.bf16.mxu1 %v2120_v34 }
 0x17a   : > { %v1400_v17 = vadd.f32 %v7597_v8, %v1206_v12  ;;  %v1208_v4 = vpop.f32.mrb[45].mxu0 }
 0x17b   : > { %v1209_v16 = vpop.f32.mrb[46].mxu0  ;;  %v1744_v47 = vpop.f32.mrb[60].mxu1 }
 0x17c   : > { %v1403_v60 = vadd.f32 %v7602_v14, %v1209_v16  ;;  %v7756_v26 = vadd.f32 %v1736_v50, %v1400_v17  ;;  %v1211_v27 = vpop.f32.mrb[47].mxu0  ;;  %v1746_v29 = vpop.f32.mrb[61].mxu1 }
 0x17d   : > { %v1747_v45 = vpop.f32.mrb[62].mxu1 }
 0x17e   : > { %v7758_v32 = vadd.f32 %v1739_v35, %v1403_v60  ;;  %6489 = vmatmul.mubr.bf16.gmra.mrb[152].mxu0 %v7640_v46  ;;  %v1749_v8 = vpop.f32.mrb[63].mxu1 }
 0x17f   : > { %6492 = vmatprep.mubr.bf16.mxu0 %v7642_v41 }
 0x180   : > { %2559 = vmatmul.mubr.bf16.gmra.mrb[168].mxu1 %v2060_v43 }
 0x181   : > { %v1214_v37 = vpop.f32.mrb[48].mxu0 }
 0x182   : > { %v1408_v21 = vadd.f32 %v7627_v39, %v1214_v37  ;;  %v1216_v54 = vpop.f32.mrb[49].mxu0 }
 0x183   : > { %v1217_v14 = vpop.f32.mrb[50].mxu0  ;;  %v1752_v35 = vpop.f32.mrb[64].mxu1 }
 0x184   : > { %v1411_v50 = vadd.f32 %v7632_v52, %v1217_v14  ;;  %v7764_v19 = vadd.f32 %v1744_v47, %v1408_v21  ;;  %v1219_v11 = vpop.f32.mrb[51].mxu0  ;;  %v1754_v46 = vpop.f32.mrb[65].mxu1 }
 0x185   : > { %v1755_v63 = vpop.f32.mrb[66].mxu1 }
 0x186   : > { %v7766_v34 = vadd.f32 %v1747_v45, %v1411_v50  ;;  %6493 = vmatmul.mubr.bf16.gmra.mrb[156].mxu0 %v7663_v36  ;;  %v1757_v41 = vpop.f32.mrb[67].mxu1 }
 0x187   : > { %6496 = vmatprep.mubr.bf16.mxu0 %v7665_v42 }
 0x189   : > { %v1222_v12 = vpop.f32.mrb[52].mxu0 }
 0x18a   : > { %v1416_v39 = vadd.f32 %v7624_v18, %v1222_v12  ;;  %v1224_v17 = vpop.f32.mrb[53].mxu0 }
 0x18b   : > { %v1225_v4 = vpop.f32.mrb[54].mxu0  ;;  %v1760_v40 = vpop.f32.mrb[68].mxu1 }
 0x18c   : > { %v1419_v52 = vadd.f32 %v7630_v22, %v1225_v4  ;;  %v7772_v16 = vadd.f32 %v1752_v35, %v1416_v39  ;;  %v1227_v33 = vpop.f32.mrb[55].mxu0  ;;  %v1762_v36 = vpop.f32.mrb[69].mxu1 }
 0x18d   : > { %v1763_v27 = vpop.f32.mrb[70].mxu1 }
 0x18e   : > { %v7774_v60 = vadd.f32 %v1755_v63, %v1419_v52  ;;  %6497 = vmatmul.mubr.bf16.gmra.mrb[160].mxu0 %v7683_v55  ;;  %v1765_v42 = vpop.f32.mrb[71].mxu1 }
 0x18f   : > { %6500 = vmatprep.mubr.bf16.mxu0 %v7685_v23  ;;  %v2153_v42 = vld [vmem:[#allocation2 + $0x193] sm:$0xff] }
 0x191   : > { %v1230_v47 = vpop.f32.mrb[56].mxu0 }
 0x192   : > { %v1424_v18 = vadd.f32 %v7653_v15, %v1230_v47  ;;  %v1232_v29 = vpop.f32.mrb[57].mxu0  ;;  %v2154_v47 = vld [vmem:[#allocation2 + $0x19b] sm:$0xff] }
 0x193   : > { %v1233_v43 = vpop.f32.mrb[58].mxu0  ;;  %v1768_v37 = vpop.f32.mrb[72].mxu1 }
 0x194   : > { %v1427_v22 = vadd.f32 %v7658_v31, %v1233_v43  ;;  %v7780_v45 = vadd.f32 %v1760_v40, %v1424_v18  ;;  %v1235_v8 = vpop.f32.mrb[59].mxu0  ;;  %v1770_v55 = vpop.f32.mrb[73].mxu1  ;;  %v2177_v43 = vpack.c.bf16 %v2154_v47, %v2153_v42 }
 0x195   : > { %v1771_v54 = vpop.f32.mrb[74].mxu1 }
 0x196   : > { %v7782_v21 = vadd.f32 %v1763_v27, %v1427_v22  ;;  %6501 = vmatmul.mubr.bf16.gmra.mrb[164].mxu0 %v7703_v25  ;;  %v1773_v23 = vpop.f32.mrb[75].mxu1 }
 0x197   : > { %6504 = vmatprep.mubr.bf16.mxu0 %v7705_v9  ;;  %v2155_v23 = vld [vmem:[#allocation2 + $0x1a3] sm:$0xff] }
 0x199   : > { %v1238_v14 = vpop.f32.mrb[60].mxu0 }
 0x19a   : > { %v1432_v15 = vadd.f32 %v7650_v10, %v1238_v14  ;;  %v1240_v50 = vpop.f32.mrb[61].mxu0  ;;  %v2156_v14 = vld [vmem:[#allocation2 + $0x1ab] sm:$0xff] }
 0x19b   : > { %v1241_v11 = vpop.f32.mrb[62].mxu0  ;;  %v1776_v63 = vpop.f32.mrb[76].mxu1  ;;  %v2158_v50 = vld [vmem:[#allocation2 + $0x1c3] sm:$0xff] }
 0x19c   : > { %v1435_v31 = vadd.f32 %v7656_v3, %v1241_v11  ;;  %v7788_v35 = vadd.f32 %v1768_v37, %v1432_v15  ;;  %v1243_v46 = vpop.f32.mrb[63].mxu0  ;;  %v1778_v25 = vpop.f32.mrb[77].mxu1 }
 0x19d   : > { %v1779_v12 = vpop.f32.mrb[78].mxu1  ;;  %v2178_v46 = vpack.c.bf16 %v2156_v14, %v2155_v23 }
 0x19e   : > { %v7790_v41 = vadd.f32 %v1771_v54, %v1435_v31  ;;  %6505 = vmatmul.mubr.bf16.gmra.mrb[168].mxu0 %v7713_v61  ;;  %v1781_v9 = vpop.f32.mrb[79].mxu1 }
 0x19f   : > { %6508 = vmatprep.mubr.bf16.mxu0 %v7715_v5 }
 0x1a1   : > { %v1246_v39 = vpop.f32.mrb[64].mxu0 }
 0x1a2   : > { %v1440_v10 = vadd.f32 %v7673_v59, %v1246_v39  ;;  %v1248_v17 = vpop.f32.mrb[65].mxu0 }
 0x1a3   : > { %v1249_v4 = vpop.f32.mrb[66].mxu0  ;;  %v1784_v40 = vpop.f32.mrb[80].mxu1 }
 0x1a4   : > { %v1443_v3 = vadd.f32 %v7678_v44, %v1249_v4  ;;  %v7796_v52 = vadd.f32 %v1776_v63, %v1440_v10  ;;  %v1251_v33 = vpop.f32.mrb[67].mxu0  ;;  %v1786_v61 = vpop.f32.mrb[81].mxu1 }
 0x1a5   : > { %v1787_v27 = vpop.f32.mrb[82].mxu1  ;;  %v2160_v33 = vld [vmem:[#allocation2 + $0x1d3] sm:$0xff] }
 0x1a6   : > { %v7798_v36 = vadd.f32 %v1779_v12, %v1443_v3  ;;  %6509 = vmatmul.mubr.bf16.gmra.mrb[172].mxu0 %v7725_v0  ;;  %v1789_v5 = vpop.f32.mrb[83].mxu1  ;;  %v2159_v3 = vld [vmem:[#allocation2 + $0x1cb] sm:$0xff] }
 0x1a7   : > { %6512 = vmatprep.mubr.bf16.mxu0 %v7727_v13  ;;  %v2180_v5 = vpack.c.bf16 %v2160_v33, %v2159_v3  ;;  %v8961_v3 = vld [vmem:[#allocation5_spill] sm:$0xff] }
 0x1a9   : > { %v1254_v59 = vpop.f32.mrb[68].mxu0 }
 0x1aa   : > { %v1448_v18 = vadd.f32 %v7670_v58, %v1254_v59  ;;  %v1256_v29 = vpop.f32.mrb[69].mxu0  ;;  %v2157_v58 = vld [vmem:[#allocation2 + $0x1bb] sm:$0xff] }
 0x1ab   : > { %v1257_v44 = vpop.f32.mrb[70].mxu0  ;;  %v1792_v55 = vpop.f32.mrb[84].mxu1  ;;  %v2179_v25 = vpack.c.bf16 %v2158_v50, %v2157_v58 }
 0x1ac   : > { %v1451_v22 = vadd.f32 %v7676_v6, %v1257_v44  ;;  %v7804_v8 = vadd.f32 %v1784_v40, %v1448_v18  ;;  %v1259_v37 = vpop.f32.mrb[71].mxu0  ;;  %v1794_v13 = vpop.f32.mrb[85].mxu1 }
 0x1ad   : > { %v1795_v54 = vpop.f32.mrb[86].mxu1 }
 0x1ae   : > { %v7806_v0 = vadd.f32 %v1787_v27, %v1451_v22  ;;  %6513 = vmatmul.mubr.bf16.gmra.mrb[176].mxu0 %v7737_v20  ;;  %v1797_v15 = vpop.f32.mrb[87].mxu1 }
 0x1af   : > { %6516 = vmatprep.mubr.bf16.mxu0 %v2177_v43 }
 0x1b1   : > { %v1262_v11 = vpop.f32.mrb[72].mxu0 }
 0x1b2   : > { %v1456_v31 = vadd.f32 %v7693_v1, %v1262_v11  ;;  %v1264_v6 = vpop.f32.mrb[73].mxu0 }
 0x1b3   : > { %v1265_v63 = vpop.f32.mrb[74].mxu0  ;;  %v1800_v39 = vpop.f32.mrb[88].mxu1 }
 0x1b4   : > { %v1459_v12 = vadd.f32 %v7698_v28, %v1265_v63  ;;  %v7811_v9 = vadd.f32 %v1792_v55, %v1456_v31  ;;  %v1267_v20 = vpop.f32.mrb[75].mxu0  ;;  %v1802_v17 = vpop.f32.mrb[89].mxu1 }
 0x1b5   : > { %v1803_v4 = vpop.f32.mrb[90].mxu1 }
 0x1b6   : > { %v7813_v10 = vadd.f32 %v1795_v54, %v1459_v12  ;;  %6517 = vmatmul.mubr.bf16.gmra.mrb[180].mxu0 %v2178_v46  ;;  %v1805_v40 = vpop.f32.mrb[91].mxu1 }
 0x1b7   : > { %6520 = vmatprep.mubr.bf16.mxu0 %v2179_v25 }
 0x1b9   : > { %v1270_v1 = vpop.f32.mrb[76].mxu0 }
 0x1ba   : > { %v1464_v61 = vadd.f32 %v7690_v51, %v1270_v1  ;;  %v1272_v27 = vpop.f32.mrb[77].mxu0 }
 0x1bb   : > { %v1273_v42 = vpop.f32.mrb[78].mxu0  ;;  %v7819_v18 = vpop.f32.mrb[92].mxu1 }
 0x1bc   : > { %v1467_v28 = vadd.f32 %v7696_v2, %v1273_v42  ;;  %v7817_v47 = vadd.f32 %v1800_v39, %v1464_v61  ;;  %v1275_v59 = vpop.f32.mrb[79].mxu0  ;;  %v2410_v44 = vpop.f32.mrb[93].mxu1  ;;  %v7027_v39 = vmov 0.0  }
 0x1bd   : > { %v7823_v43 = vpop.f32.mrb[94].mxu1  ;;  %2889 = vst [vmem:[#allocation3 + $0x10] sm:$0xff] %v7027_v39  ;;  %2890 = vst [vmem:[#allocation3 + $0x18] sm:$0xff] %v7027_v39 }
 0x1be   : > { %v7821_v29 = vadd.f32 %v1803_v4, %v1467_v28  ;;  %6521 = vmatmul.mubr.bf16.gmra.mrb[184].mxu0 %v2180_v5  ;;  %v2413_v22 = vpop.f32.mrb[95].mxu1  ;;  %2887 = vst [vmem:[#allocation3] sm:$0xff] %v7027_v39  ;;  %2888 = vst [vmem:[#allocation3 + $0x8] sm:$0xff] %v7027_v39  ;;  %v8962_v28 = vld [vmem:[#allocation6_spill] sm:$0xff] }
 0x1bf   : > { %2891 = vst [vmem:[#allocation3 + $0x20] sm:$0x3] %v7027_v39  ;;  %2892 = vst [vmem:[#allocation3 + $0x28] sm:$0xff] %v7027_v39 }
 0x1c0   : > { %2893 = vst [vmem:[#allocation3 + $0x30] sm:$0xff] %v7027_v39  ;;  %2894 = vst [vmem:[#allocation3 + $0x38] sm:$0xff] %v7027_v39 }
 0x1c1   : > { %v1648_v37 = vpop.f32.mrb[80].mxu0  ;;  %2895 = vst [vmem:[#allocation3 + $0x40] sm:$0xff] %v7027_v39  ;;  %2896 = vst [vmem:[#allocation3 + $0x48] sm:$0x3] %v7027_v39 }
 0x1c2   : > { %v7826_v51 = vadd.f32 %v1648_v37, %v7563_v24  ;;  %v1650_v55 = vpop.f32.mrb[81].mxu0  ;;  %2897 = vst [vmem:[#allocation3 + $0x50] sm:$0xff] %v7027_v39  ;;  %2898 = vst [vmem:[#allocation3 + $0x58] sm:$0xff] %v7027_v39  ;;  %v8963_v37 = vld [vmem:[#allocation7_spill] sm:$0xff] }
 0x1c3   : > { %v1651_v13 = vpop.f32.mrb[82].mxu0  ;;  %v7831_v23 = vpop.f32.mrb[96].mxu1  ;;  %2899 = vst [vmem:[#allocation3 + $0x60] sm:$0xff] %v7027_v39  ;;  %2900 = vst [vmem:[#allocation3 + $0x68] sm:$0xff] %v7027_v39 }
 0x1c4   : > { %v7829_v2 = vadd.f32 %v1651_v13, %v7566_v30  ;;  %v1653_v54 = vpop.f32.mrb[83].mxu0  ;;  %v2418_v14 = vpop.f32.mrb[97].mxu1  ;;  %2901 = vst [vmem:[#allocation3 + $0x70] sm:$0x3] %v7027_v39  ;;  %2902 = vst [vmem:[#allocation3 + $0x78] sm:$0xff] %v7027_v39 }
 0x1c5   : > { %v7833_v15 = vpop.f32.mrb[98].mxu1  ;;  %2903 = vst [vmem:[#allocation3 + $0x80] sm:$0xff] %v7027_v39  ;;  %2904 = vst [vmem:[#allocation3 + $0x88] sm:$0xff] %v7027_v39 }
 0x1c6   : > { %v2421_v58 = vpop.f32.mrb[99].mxu1  ;;  %2905 = vst [vmem:[#allocation3 + $0x90] sm:$0xff] %v7027_v39  ;;  %2906 = vst [vmem:[#allocation3 + $0x98] sm:$0x3] %v7027_v39 }
 0x1c7   : > { %2907 = vst [vmem:[#allocation3 + $0xa0] sm:$0xff] %v7027_v39  ;;  %2908 = vst [vmem:[#allocation3 + $0xa8] sm:$0xff] %v7027_v39 }
 0x1c8   : > { %2909 = vst [vmem:[#allocation3 + $0xb0] sm:$0xff] %v7027_v39  ;;  %2910 = vst [vmem:[#allocation3 + $0xb8] sm:$0xff] %v7027_v39 }
 0x1c9   : > { %v1656_v50 = vpop.f32.mrb[84].mxu0  ;;  %2911 = vst [vmem:[#allocation3 + $0xc0] sm:$0x3] %v7027_v39  ;;  %2912 = vst [vmem:[#allocation3 + $0xc8] sm:$0xff] %v7027_v39 }
 0x1ca   : > { %v7836_v11 = vadd.f32 %v1656_v50, %v7586_v49  ;;  %v1658_v31 = vpop.f32.mrb[85].mxu0  ;;  %2913 = vst [vmem:[#allocation3 + $0xd0] sm:$0xff] %v7027_v39  ;;  %2914 = vst [vmem:[#allocation3 + $0xd8] sm:$0xff] %v7027_v39  ;;  %v8960_v49 = vld [vmem:[#allocation4_spill] sm:$0xff] }
 0x1cb   : > { %v1659_v6 = vpop.f32.mrb[86].mxu0  ;;  %v7841_v63 = vpop.f32.mrb[100].mxu1  ;;  %2915 = vst [vmem:[#allocation3 + $0xe0] sm:$0xff] %v7027_v39  ;;  %2916 = vst [vmem:[#allocation3 + $0xe8] sm:$0x3] %v7027_v39 }
 0x1cc   : > { %v7839_v24 = vadd.f32 %v1659_v6, %v7592_v57  ;;  %v1661_v46 = vpop.f32.mrb[87].mxu0  ;;  %v2426_v30 = vpop.f32.mrb[101].mxu1  ;;  %2917 = vst [vmem:[#allocation3 + $0xf0] sm:$0xff] %v7027_v39  ;;  %2918 = vst [vmem:[#allocation3 + $0xf8] sm:$0xff] %v7027_v39  ;;  %v8965_v6 = vld [vmem:[#allocation8_spill] sm:$0xff] }
 0x1cd   : > { %v7843_v25 = vpop.f32.mrb[102].mxu1  ;;  %2919 = vst [vmem:[#allocation3 + $0x100] sm:$0xff] %v7027_v39  ;;  %2920 = vst [vmem:[#allocation3 + $0x108] sm:$0xff] %v7027_v39 }
 0x1ce   : > { %v2429_v12 = vpop.f32.mrb[103].mxu1  ;;  %2921 = vst [vmem:[#allocation3 + $0x110] sm:$0x3] %v7027_v39  ;;  %2922 = vst [vmem:[#allocation3 + $0x118] sm:$0xff] %v7027_v39 }
 0x1cf   : > { %2923 = vst [vmem:[#allocation3 + $0x120] sm:$0xff] %v7027_v39  ;;  %2924 = vst [vmem:[#allocation3 + $0x128] sm:$0xff] %v7027_v39 }
 0x1d0   : > { %2925 = vst [vmem:[#allocation3 + $0x130] sm:$0xff] %v7027_v39  ;;  %2926 = vst [vmem:[#allocation3 + $0x138] sm:$0x3] %v7027_v39 }
 0x1d1   : > { %v1664_v20 = vpop.f32.mrb[88].mxu0  ;;  %2927 = vst [vmem:[#allocation3 + $0x140] sm:$0xff] %v7027_v39  ;;  %2928 = vst [vmem:[#allocation3 + $0x148] sm:$0xff] %v7027_v39 }
 0x1d2   : > { %2929 = vst [vmem:[#allocation3 + $0x150] sm:$0xff] %v7027_v39  ;;  %2930 = vst [vmem:[#allocation3 + $0x158] sm:$0xff] %v7027_v39  ;;  %v7846_v57 = vadd.f32 %v1664_v20, %v8960_v49  ;;  %v1666_v17 = vpop.f32.mrb[89].mxu0  ;;  %v8966_v20 = vld [vmem:[#allocation9_spill] sm:$0xff] }
 0x1d3   : > { %2931 = vst [vmem:[#allocation3 + $0x160] sm:$0x3] %v7027_v39  ;;  %2932 = vst [vmem:[#allocation3 + $0x168] sm:$0xff] %v7027_v39  ;;  %v1667_v4 = vpop.f32.mrb[90].mxu0  ;;  %v7851_v1 = vpop.f32.mrb[104].mxu1 }
 0x1d4   : > { %2933 = vst [vmem:[#allocation3 + $0x170] sm:$0xff] %v7027_v39  ;;  %2934 = vst [vmem:[#allocation3 + $0x178] sm:$0xff] %v7027_v39  ;;  %v7849_v33 = vadd.f32 %v1667_v4, %v8961_v3  ;;  %v1669_v40 = vpop.f32.mrb[91].mxu0  ;;  %v2434_v61 = vpop.f32.mrb[105].mxu1 }
 0x1d5   : > { %2935 = vst [vmem:[#allocation3 + $0x180] sm:$0xff] %v7027_v39  ;;  %2936 = vst [vmem:[#allocation3 + $0x188] sm:$0x3] %v7027_v39  ;;  %v7853_v27 = vpop.f32.mrb[106].mxu1 }
 0x1d6   : > { %v2437_v5 = vpop.f32.mrb[107].mxu1 }
 0x1d7   : > { %v8968_v5 = vld [vmem:[#allocation10_spill] sm:$0xff] }
 0x1d9   : > { %v1672_v42 = vpop.f32.mrb[92].mxu0 }
 0x1da   : > { %v1673_v59 = vadd.f32 %v1672_v42, %v8962_v28  ;;  %v1674_v44 = vpop.f32.mrb[93].mxu0 }
 0x1db   : > { %v1675_v22 = vpop.f32.mrb[94].mxu0  ;;  %v7857_v54 = vpop.f32.mrb[108].mxu1 }
 0x1dc   : > { %v1676_v55 = vadd.f32 %v1675_v22, %v8963_v37  ;;  %v1677_v13 = vpop.f32.mrb[95].mxu0  ;;  %v2442_v14 = vpop.f32.mrb[109].mxu1  ;;  %v8969_v22 = vld [vmem:[#allocation11_spill] sm:$0xff] }
 0x1dd   : > { %v7859_v58 = vpop.f32.mrb[110].mxu1 }
 0x1de   : > { %8964 = vst [vmem:[#allocation4_spill] sm:$0xff] %v7859_v58  ;;  %v2445_v50 = vpop.f32.mrb[111].mxu1 }
 0x1e1   : > { %v1680_v31 = vpop.f32.mrb[96].mxu0 }
 0x1e2   : > { %v1681_v46 = vadd.f32 %v1680_v31, %v8965_v6  ;;  %v1682_v30 = vpop.f32.mrb[97].mxu0 }
 0x1e3   : > { %v1683_v12 = vpop.f32.mrb[98].mxu0  ;;  %v7863_v17 = vpop.f32.mrb[112].mxu1 }
 0x1e4   : > { %v1684_v39 = vadd.f32 %v1683_v12, %v8966_v20  ;;  %v1685_v49 = vpop.f32.mrb[99].mxu0  ;;  %v2450_v4 = vpop.f32.mrb[113].mxu1  ;;  %v8972_v12 = vld [vmem:[#allocation12_spill] sm:$0xff] }
 0x1e5   : > { %v7865_v3 = vpop.f32.mrb[114].mxu1 }
 0x1e6   : > { %8967 = vst [vmem:[#allocation5_spill] sm:$0xff] %v7865_v3  ;;  %v2453_v40 = vpop.f32.mrb[115].mxu1 }
 0x1e7   : > { %v8973_v40 = vld [vmem:[#allocation13_spill] sm:$0xff] }
 0x1e9   : > { %v1688_v61 = vpop.f32.mrb[100].mxu0 }
 0x1ea   : > { %v1689_v42 = vadd.f32 %v1688_v61, %v8968_v5  ;;  %v1690_v28 = vpop.f32.mrb[101].mxu0 }
 0x1eb   : > { %v1691_v44 = vpop.f32.mrb[102].mxu0  ;;  %v7869_v14 = vpop.f32.mrb[116].mxu1 }
 0x1ec   : > { %v1692_v37 = vadd.f32 %v1691_v44, %v8969_v22  ;;  %v1693_v13 = vpop.f32.mrb[103].mxu0  ;;  %8970 = vst [vmem:[#allocation6_spill] sm:$0xff] %v7869_v14  ;;  %v2458_v50 = vpop.f32.mrb[117].mxu1 }
 0x1ed   : > { %v7871_v31 = vpop.f32.mrb[118].mxu1 }
 0x1ee   : > { %8971 = vst [vmem:[#allocation7_spill] sm:$0xff] %v7871_v31  ;;  %v2461_v6 = vpop.f32.mrb[119].mxu1 }
 0x1f1   : > { %v1696_v30 = vpop.f32.mrb[104].mxu0 }
 0x1f2   : > { %v1697_v20 = vadd.f32 %v1696_v30, %v8972_v12  ;;  %v1698_v49 = vpop.f32.mrb[105].mxu0 }
 0x1f3   : > { %v1699_v4 = vpop.f32.mrb[106].mxu0  ;;  %v7875_v61 = vpop.f32.mrb[120].mxu1 }
 0x1f4   : > { %v1700_v58 = vadd.f32 %v1699_v4, %v8973_v40  ;;  %v1701_v3 = vpop.f32.mrb[107].mxu0  ;;  %v2466_v5 = vpop.f32.mrb[121].mxu1 }
 0x1f5   : > { %v7877_v28 = vpop.f32.mrb[122].mxu1 }
 0x1f6   : > { %8974 = vst [vmem:[#allocation8_spill] sm:$0xff] %v7877_v28  ;;  %v2469_v44 = vpop.f32.mrb[123].mxu1 }
 0x1f9   : > { %v6430_v22 = vpop.f32.mrb[108].mxu0 }
 0x1fa   : > { %v7880_v13 = vadd.f32 %v6430_v22, %v7836_v11  ;;  %v1841_v50 = vpop.f32.mrb[109].mxu0 }
 0x1fb   : > { %v7883_v6 = vadd.f32 %v1841_v50, %v7826_v51  ;;  %v6431_v30 = vpop.f32.mrb[110].mxu0  ;;  %v7891_v4 = vpop.f32.mrb[124].mxu1 }
 0x1fc   : > { %v7886_v12 = vadd.f32 %v6431_v30, %v7839_v24  ;;  %v1844_v49 = vpop.f32.mrb[111].mxu0  ;;  %8975 = vst [vmem:[#allocation9_spill] sm:$0xff] %v7891_v4  ;;  %v2474_v40 = vpop.f32.mrb[125].mxu1 }
 0x1fd   : > { %v7889_v3 = vadd.f32 %v1844_v49, %v7829_v2  ;;  %v7893_v5 = vpop.f32.mrb[126].mxu1 }
 0x1fe   : > { %8976 = vst [vmem:[#allocation10_spill] sm:$0xff] %v7893_v5  ;;  %v2477_v44 = vpop.f32.mrb[127].mxu1 }
 0x201   : > { %v6434_v11 = vpop.f32.mrb[112].mxu0 }
 0x202   : > { %v7895_v22 = vadd.f32 %v6434_v11, %v1673_v59  ;;  %v1857_v31 = vpop.f32.mrb[113].mxu0 }
 0x203   : > { %v7898_v51 = vadd.f32 %v1857_v31, %v7846_v57  ;;  %v6435_v50 = vpop.f32.mrb[114].mxu0  ;;  %v7905_v49 = vpop.f32.mrb[128].mxu1 }
 0x204   : > { %v7900_v24 = vadd.f32 %v6435_v50, %v1676_v55  ;;  %v1860_v30 = vpop.f32.mrb[115].mxu0  ;;  %8977 = vst [vmem:[#allocation11_spill] sm:$0xff] %v7905_v49  ;;  %v2482_v40 = vpop.f32.mrb[129].mxu1 }
 0x205   : > { %v7903_v2 = vadd.f32 %v1860_v30, %v7849_v33  ;;  %v7907_v4 = vpop.f32.mrb[130].mxu1 }
 0x206   : > { %8978 = vst [vmem:[#allocation12_spill] sm:$0xff] %v7907_v4  ;;  %v2485_v44 = vpop.f32.mrb[131].mxu1 }
 0x207   : > { %v8981_v44 = vld [vmem:[#allocation14_spill] sm:$0xff] }
 0x209   : > { %v6438_v5 = vpop.f32.mrb[116].mxu0 }
 0x20a   : > { %v7909_v59 = vadd.f32 %v6438_v5, %v1689_v42  ;;  %v1873_v11 = vpop.f32.mrb[117].mxu0 }
 0x20b   : > { %v7911_v28 = vadd.f32 %v1873_v11, %v1681_v46  ;;  %v6439_v57 = vpop.f32.mrb[118].mxu0  ;;  %v7917_v33 = vpop.f32.mrb[132].mxu1  ;;  %v8982_v11 = vld [vmem:[#allocation15_spill] sm:$0xff] }
 0x20c   : > { %v7913_v31 = vadd.f32 %v6439_v57, %v1692_v37  ;;  %v1876_v55 = vpop.f32.mrb[119].mxu0  ;;  %8979 = vst [vmem:[#allocation13_spill] sm:$0xff] %v7917_v33  ;;  %v2490_v30 = vpop.f32.mrb[133].mxu1 }
 0x20d   : > { %v7915_v50 = vadd.f32 %v1876_v55, %v1684_v39  ;;  %v7919_v49 = vpop.f32.mrb[134].mxu1 }
 0x20e   : > { %8980 = vst [vmem:[#allocation16_spill] sm:$0xff] %v7919_v49  ;;  %v2493_v40 = vpop.f32.mrb[135].mxu1 }
 0x211   : > { %v6442_v4 = vpop.f32.mrb[120].mxu0 }
 0x212   : > { %v7922_v14 = vadd.f32 %v6442_v4, %v8981_v44  ;;  %v1889_v42 = vpop.f32.mrb[121].mxu0 }
 0x213   : > { %v7924_v5 = vadd.f32 %v1889_v42, %v1697_v20  ;;  %v6443_v46 = vpop.f32.mrb[122].mxu0  ;;  %v7931_v55 = vpop.f32.mrb[136].mxu1 }
 0x214   : > { %v7927_v37 = vadd.f32 %v6443_v46, %v8982_v11  ;;  %v1892_v57 = vpop.f32.mrb[123].mxu0  ;;  %v2498_v30 = vpop.f32.mrb[137].mxu1 }
 0x215   : > { %v7929_v39 = vadd.f32 %v1892_v57, %v1700_v58  ;;  %v7933_v33 = vpop.f32.mrb[138].mxu1 }
 0x216   : > { %8983 = vst [vmem:[#allocation14_spill] sm:$0xff] %v7933_v33  ;;  %v2501_v40 = vpop.f32.mrb[139].mxu1 }
 0x219   : > { %v6446_v49 = vpop.f32.mrb[124].mxu0 }
 0x21a   : > { %v7936_v4 = vadd.f32 %v6446_v49, %v7740_v38  ;;  %v1905_v44 = vpop.f32.mrb[125].mxu0 }
 0x21b   : > { %v7939_v20 = vadd.f32 %v1905_v44, %v7730_v56  ;;  %v6447_v42 = vpop.f32.mrb[126].mxu0  ;;  %v7947_v57 = vpop.f32.mrb[140].mxu1 }
 0x21c   : > { %v7942_v46 = vadd.f32 %v6447_v42, %v7742_v53  ;;  %v1908_v58 = vpop.f32.mrb[127].mxu0  ;;  %8984 = vst [vmem:[#allocation15_spill] sm:$0xff] %v7947_v57  ;;  %v2506_v30 = vpop.f32.mrb[141].mxu1 }
 0x21d   : > { %v7945_v11 = vadd.f32 %v1908_v58, %v7732_v48  ;;  %v7949_v40 = vpop.f32.mrb[142].mxu1 }
 0x21e   : > { %8985 = vst [vmem:[#allocation17_spill] sm:$0xff] %v7949_v40  ;;  %v2509_v33 = vpop.f32.mrb[143].mxu1 }
 0x221   : > { %v6450_v38 = vpop.f32.mrb[128].mxu0 }
 0x222   : > { %v7952_v49 = vadd.f32 %v6450_v38, %v7756_v26  ;;  %v1921_v56 = vpop.f32.mrb[129].mxu0 }
 0x223   : > { %v7955_v44 = vadd.f32 %v1921_v56, %v7748_v7  ;;  %v6451_v53 = vpop.f32.mrb[130].mxu0  ;;  %v7963_v30 = vpop.f32.mrb[144].mxu1 }
 0x224   : > { %v7958_v42 = vadd.f32 %v6451_v53, %v7758_v32  ;;  %v1924_v48 = vpop.f32.mrb[131].mxu0  ;;  %8986 = vst [vmem:[#allocation18_spill] sm:$0xff] %v7963_v30  ;;  %v2514_v40 = vpop.f32.mrb[145].mxu1 }
 0x225   : > { %v7961_v58 = vadd.f32 %v1924_v48, %v7750_v62  ;;  %v7965_v33 = vpop.f32.mrb[146].mxu1 }
 0x226   : > { %8987 = vst [vmem:[#allocation19_spill] sm:$0xff] %v7965_v33  ;;  %v2517_v57 = vpop.f32.mrb[147].mxu1 }
 0x229   : > { %v6454_v26 = vpop.f32.mrb[132].mxu0 }
 0x22a   : > { %v7968_v38 = vadd.f32 %v6454_v26, %v7772_v16  ;;  %v1937_v7 = vpop.f32.mrb[133].mxu0 }
 0x22b   : > { %v7971_v56 = vadd.f32 %v1937_v7, %v7764_v19  ;;  %v6455_v32 = vpop.f32.mrb[134].mxu0  ;;  %v7979_v40 = vpop.f32.mrb[148].mxu1 }
 0x22c   : > { %v7974_v53 = vadd.f32 %v6455_v32, %v7774_v60  ;;  %v1940_v62 = vpop.f32.mrb[135].mxu0  ;;  %8988 = vst [vmem:[#allocation20_spill] sm:$0xff] %v7979_v40  ;;  %v2522_v33 = vpop.f32.mrb[149].mxu1 }
 0x22d   : > { %v7977_v48 = vadd.f32 %v1940_v62, %v7766_v34  ;;  %v7981_v57 = vpop.f32.mrb[150].mxu1 }
 0x22e   : > { %8989 = vst [vmem:[#allocation21_spill] sm:$0xff] %v7981_v57  ;;  %v2525_v30 = vpop.f32.mrb[151].mxu1 }
 0x231   : > { %v6458_v16 = vpop.f32.mrb[136].mxu0 }
 0x232   : > { %v7984_v26 = vadd.f32 %v6458_v16, %v7788_v35  ;;  %v1953_v19 = vpop.f32.mrb[137].mxu0 }
 0x233   : > { %v7987_v7 = vadd.f32 %v1953_v19, %v7780_v45  ;;  %v6459_v60 = vpop.f32.mrb[138].mxu0  ;;  %v7995_v33 = vpop.f32.mrb[152].mxu1 }
 0x234   : > { %v7990_v32 = vadd.f32 %v6459_v60, %v7790_v41  ;;  %v1956_v34 = vpop.f32.mrb[139].mxu0  ;;  %v2530_v57 = vpop.f32.mrb[153].mxu1 }
 0x235   : > { %v7993_v62 = vadd.f32 %v1956_v34, %v7782_v21  ;;  %v7997_v30 = vpop.f32.mrb[154].mxu1 }
 0x236   : > { %8990 = vst [vmem:[#allocation22_spill] sm:$0xff] %v7990_v32  ;;  %v2533_v40 = vpop.f32.mrb[155].mxu1 }
 0x237   : > { %8991 = vst [vmem:[#allocation23_spill] sm:$0xff] %v7993_v62 }
 0x239   : > { %v6462_v35 = vpop.f32.mrb[140].mxu0 }
 0x23a   : > { %v8000_v16 = vadd.f32 %v6462_v35, %v7804_v8  ;;  %v1969_v45 = vpop.f32.mrb[141].mxu0 }
 0x23b   : > { %v8003_v19 = vadd.f32 %v1969_v45, %v7796_v52  ;;  %v6463_v41 = vpop.f32.mrb[142].mxu0  ;;  %v8011_v57 = vpop.f32.mrb[156].mxu1 }
 0x23c   : > { %v8006_v60 = vadd.f32 %v6463_v41, %v7806_v0  ;;  %v1972_v21 = vpop.f32.mrb[143].mxu0  ;;  %v2538_v62 = vpop.f32.mrb[157].mxu1 }
 0x23d   : > { %v8009_v34 = vadd.f32 %v1972_v21, %v7798_v36  ;;  %v8013_v40 = vpop.f32.mrb[158].mxu1 }
 0x23e   : > { %8992 = vst [vmem:[#allocation24_spill] sm:$0xff] %v8006_v60  ;;  %v2541_v32 = vpop.f32.mrb[159].mxu1 }
 0x23f   : > { %8993 = vst [vmem:[#allocation25_spill] sm:$0xff] %v8009_v34 }
 0x241   : > { %v6466_v8 = vpop.f32.mrb[144].mxu0 }
 0x242   : > { %v8016_v35 = vadd.f32 %v6466_v8, %v7817_v47  ;;  %v1985_v52 = vpop.f32.mrb[145].mxu0 }
 0x243   : > { %v8019_v45 = vadd.f32 %v1985_v52, %v7811_v9  ;;  %v6467_v0 = vpop.f32.mrb[146].mxu0  ;;  %v8027_v62 = vpop.f32.mrb[160].mxu1  ;;  %v8035_v9 = vld [vmem:[%s8942_s3] ss:$0 sm:$0xff] }
 0x244   : > { %8994 = vst [vmem:[#allocation26_spill] sm:$0xff] %v8016_v35  ;;  %v8022_v41 = vadd.f32 %v6467_v0, %v7821_v29  ;;  %v1988_v36 = vpop.f32.mrb[147].mxu0  ;;  %v2546_v34 = vpop.f32.mrb[161].mxu1 }
 0x245   : > { %8995 = vst [vmem:[#allocation27_spill] sm:$0xff] %v8019_v45  ;;  %v8025_v21 = vadd.f32 %v1988_v36, %v7813_v10  ;;  %v8029_v32 = vpop.f32.mrb[162].mxu1 }
 0x246   : > { %8996 = vst [vmem:[#allocation28_spill] sm:$0xff] %v8022_v41  ;;  %v2549_v60 = vpop.f32.mrb[163].mxu1 }
 0x247   : > { %8997 = vst [vmem:[#allocation29_spill] sm:$0xff] %v8025_v21 }
 0x249   : > { %v6486_v47 = vpop.f32.mrb[148].mxu0 }
 0x24a   : > { %v2610_v8 = vadd.f32 %v6486_v47, %v7831_v23  ;;  %v2601_v35 = vpop.f32.mrb[149].mxu0 }
 0x24b   : > { %v2602_v29 = vadd.f32 %v2601_v35, %v7819_v18  ;;  %v6487_v52 = vpop.f32.mrb[150].mxu0  ;;  %v8042_v21 = vpop.f32.mrb[164].mxu1 }
 0x24c   : > { %v2762_v10 = vadd.f32 %v2610_v8, %v7880_v13  ;;  %v2613_v0 = vadd.f32 %v6487_v52, %v7833_v15  ;;  %v2604_v34 = vpop.f32.mrb[151].mxu0  ;;  %v2554_v41 = vpop.f32.mrb[165].mxu1 }
 0x24d   : > { %v2760_v36 = vadd.f32 %v2602_v29, %v7883_v6  ;;  %v2605_v60 = vadd.f32 %v2604_v34, %v7823_v43  ;;  %v8048_v35 = vpop.f32.mrb[166].mxu1 }
 0x24e   : > { %v2809_v23 = vadd.f32 %v8035_v9, %v2762_v10  ;;  %v2763_v47 = vadd.f32 %v2613_v0, %v7886_v12  ;;  %v2557_v8 = vpop.f32.mrb[167].mxu1 }
 0x24f   : > { %v2807_v45 = vadd.f32 %v8035_v9, %v2760_v36  ;;  %v2761_v18 = vadd.f32 %v2605_v60, %v7889_v3 }
 0x250   : > { %v2849_v13 = vmax.f32 %v2809_v23, 0.0  ;;  %v2810_v15 = vadd.f32 %v8035_v9, %v2763_v47 }
 0x251   : > { %v2847_v6 = vmax.f32 %v2807_v45, 0.0  ;;  %v2808_v43 = vadd.f32 %v8035_v9, %v2761_v18  ;;  %v6490_v29 = vpop.f32.mrb[152].mxu0 }
 0x252   : > { %2939 = vst [vmem:[#allocation3 + $0x11] sm:$0xff] %v2849_v13  ;;  %v2850_v52 = vmax.f32 %v2810_v15, 0.0  ;;  %v2626_v10 = vadd.f32 %v6490_v29, %v7851_v1  ;;  %v2617_v12 = vpop.f32.mrb[153].mxu0 }
 0x253   : > { %2937 = vst [vmem:[#allocation3 + $0x1] sm:$0xff] %v2847_v6  ;;  %v2848_v41 = vmax.f32 %v2808_v43, 0.0  ;;  %v2618_v0 = vadd.f32 %v2617_v12, %v7841_v63  ;;  %v6491_v3 = vpop.f32.mrb[154].mxu0  ;;  %v8058_v47 = vpop.f32.mrb[168].mxu1 }
 0x254   : > { %2940 = vst [vmem:[#allocation3 + $0x19] sm:$0xff] %v2850_v52  ;;  %v2766_v34 = vadd.f32 %v2626_v10, %v7895_v22  ;;  %v2629_v36 = vadd.f32 %v6491_v3, %v7853_v27  ;;  %v2620_v60 = vpop.f32.mrb[155].mxu0  ;;  %v2562_v13 = vpop.f32.mrb[169].mxu1 }
 0x255   : > { %2938 = vst [vmem:[#allocation3 + $0x9] sm:$0xff] %v2848_v41  ;;  %v2764_v45 = vadd.f32 %v2618_v0, %v7898_v51  ;;  %v2621_v23 = vadd.f32 %v2620_v60, %v7843_v25  ;;  %v8064_v22 = vpop.f32.mrb[170].mxu1  ;;  %v8998_v0 = vld [vmem:[#allocation5_spill] sm:$0xff]  ;;  %v8999_v60 = vld [vmem:[#allocation4_spill] sm:$0xff] }
 0x256   : > { %v2813_v1 = vadd.f32 %v8035_v9, %v2766_v34  ;;  %v2767_v18 = vadd.f32 %v2629_v36, %v7900_v24  ;;  %v2565_v6 = vpop.f32.mrb[171].mxu1 }
 0x257   : > { %v2811_v63 = vadd.f32 %v8035_v9, %v2764_v45  ;;  %v2765_v15 = vadd.f32 %v2621_v23, %v7903_v2 }
 0x258   : > { %v2853_v27 = vmax.f32 %v2813_v1, 0.0  ;;  %v2814_v8 = vadd.f32 %v8035_v9, %v2767_v18 }
 0x259   : > { %v2851_v51 = vmax.f32 %v2811_v63, 0.0  ;;  %v2812_v25 = vadd.f32 %v8035_v9, %v2765_v15  ;;  %v6494_v43 = vpop.f32.mrb[156].mxu0 }
 0x25a   : > { %2943 = vst [vmem:[#allocation3 + $0x39] sm:$0xff] %v2853_v27  ;;  %v2854_v29 = vmax.f32 %v2814_v8, 0.0  ;;  %v2642_v52 = vadd.f32 %v6494_v43, %v7863_v17  ;;  %v2633_v24 = vpop.f32.mrb[157].mxu0  ;;  %v9001_v43 = vld [vmem:[#allocation8_spill] sm:$0xff] }
 0x25b   : > { %2941 = vst [vmem:[#allocation3 + $0x29] sm:$0xff] %v2851_v51  ;;  %v2852_v10 = vmax.f32 %v2812_v25, 0.0  ;;  %v2634_v12 = vadd.f32 %v2633_v24, %v7857_v54  ;;  %v6495_v2 = vpop.f32.mrb[158].mxu0  ;;  %v9000_v51 = vld [vmem:[#allocation6_spill] sm:$0xff] }
 0x25c   : > { %2944 = vst [vmem:[#allocation3 + $0x41] sm:$0xff] %v2854_v29  ;;  %v2770_v41 = vadd.f32 %v2642_v52, %v7909_v59  ;;  %v2645_v3 = vadd.f32 %v6495_v2, %v8998_v0  ;;  %v2636_v34 = vpop.f32.mrb[159].mxu0 }
 0x25d   : > { %2942 = vst [vmem:[#allocation3 + $0x31] sm:$0xff] %v2852_v10  ;;  %v2768_v36 = vadd.f32 %v2634_v12, %v7911_v28  ;;  %v2637_v45 = vadd.f32 %v2636_v34, %v8999_v60  ;;  %v9002_v10 = vld [vmem:[#allocation7_spill] sm:$0xff] }
 0x25e   : > { %v2817_v23 = vadd.f32 %v8035_v9, %v2770_v41  ;;  %v2771_v17 = vadd.f32 %v2645_v3, %v7913_v31 }
 0x25f   : > { %v2815_v1 = vadd.f32 %v8035_v9, %v2768_v36  ;;  %v2769_v54 = vadd.f32 %v2637_v45, %v7915_v50 }
 0x260   : > { %v2857_v18 = vmax.f32 %v2817_v23, 0.0  ;;  %v2818_v13 = vadd.f32 %v8035_v9, %v2771_v17 }
 0x261   : > { %v2855_v59 = vmax.f32 %v2815_v1, 0.0  ;;  %v2816_v63 = vadd.f32 %v8035_v9, %v2769_v54  ;;  %v6498_v15 = vpop.f32.mrb[160].mxu0  ;;  %v9004_v54 = vld [vmem:[#allocation9_spill] sm:$0xff] }
 0x262   : > { %2947 = vst [vmem:[#allocation3 + $0x61] sm:$0xff] %v2857_v18  ;;  %v2858_v27 = vmax.f32 %v2818_v13, 0.0  ;;  %v2658_v28 = vadd.f32 %v6498_v15, %v7875_v61  ;;  %v2649_v8 = vpop.f32.mrb[161].mxu0  ;;  %v9005_v13 = vld [vmem:[#allocation12_spill] sm:$0xff] }
 0x263   : > { %2945 = vst [vmem:[#allocation3 + $0x51] sm:$0xff] %v2855_v59  ;;  %v2856_v6 = vmax.f32 %v2816_v63, 0.0  ;;  %v2650_v31 = vadd.f32 %v2649_v8, %v9000_v51  ;;  %v6499_v25 = vpop.f32.mrb[162].mxu0 }
 0x264   : > { %2948 = vst [vmem:[#allocation3 + $0x69] sm:$0xff] %v2858_v27  ;;  %v2774_v50 = vadd.f32 %v2658_v28, %v7922_v14  ;;  %v2661_v29 = vadd.f32 %v6499_v25, %v9001_v43  ;;  %v2652_v52 = vpop.f32.mrb[163].mxu0  ;;  %v9006_v27 = vld [vmem:[#allocation10_spill] sm:$0xff] }
 0x265   : > { %2946 = vst [vmem:[#allocation3 + $0x59] sm:$0xff] %v2856_v6  ;;  %v2772_v24 = vadd.f32 %v2650_v31, %v7924_v5  ;;  %v2653_v12 = vadd.f32 %v2652_v52, %v9002_v10  ;;  %v9003_v5 = vld [vmem:[#allocation11_spill] sm:$0xff] }
 0x266   : > { %v2821_v2 = vadd.f32 %v8035_v9, %v2774_v50  ;;  %v2775_v61 = vadd.f32 %v2661_v29, %v7927_v37 }
 0x267   : > { %v2819_v41 = vadd.f32 %v8035_v9, %v2772_v24  ;;  %v2773_v0 = vadd.f32 %v2653_v12, %v7929_v39  ;;  %v9007_v12 = vld [vmem:[#allocation13_spill] sm:$0xff] }
 0x268   : > { %v2861_v3 = vmax.f32 %v2821_v2, 0.0  ;;  %v2822_v34 = vadd.f32 %v8035_v9, %v2775_v61  ;;  %v9008_v61 = vld [vmem:[#allocation14_spill] sm:$0xff] }
 0x269   : > { %v2859_v14 = vmax.f32 %v2819_v41, 0.0  ;;  %v2820_v36 = vadd.f32 %v8035_v9, %v2773_v0  ;;  %v6502_v60 = vpop.f32.mrb[164].mxu0 }
 0x26a   : > { %2951 = vst [vmem:[#allocation3 + $0x89] sm:$0xff] %v2861_v3  ;;  %v2862_v45 = vmax.f32 %v2822_v34, 0.0  ;;  %v2674_v23 = vadd.f32 %v6502_v60, %v9003_v5  ;;  %v2665_v17 = vpop.f32.mrb[165].mxu0  ;;  %v9009_v34 = vld [vmem:[#allocation16_spill] sm:$0xff] }
 0x26b   : > { %2949 = vst [vmem:[#allocation3 + $0x79] sm:$0xff] %v2859_v14  ;;  %v2860_v1 = vmax.f32 %v2820_v36, 0.0  ;;  %v2666_v37 = vadd.f32 %v2665_v17, %v9004_v54  ;;  %v6503_v18 = vpop.f32.mrb[166].mxu0 }
 0x26c   : > { %2952 = vst [vmem:[#allocation3 + $0x91] sm:$0xff] %v2862_v45  ;;  %v2778_v39 = vadd.f32 %v2674_v23, %v7936_v4  ;;  %v2677_v59 = vadd.f32 %v6503_v18, %v9005_v13  ;;  %v2668_v63 = vpop.f32.mrb[167].mxu0  ;;  %v9011_v13 = vld [vmem:[#allocation15_spill] sm:$0xff] }
 0x26d   : > { %2950 = vst [vmem:[#allocation3 + $0x81] sm:$0xff] %v2860_v1  ;;  %v2776_v15 = vadd.f32 %v2666_v37, %v7939_v20  ;;  %v2669_v28 = vadd.f32 %v2668_v63, %v9006_v27  ;;  %v9012_v63 = vld [vmem:[#allocation19_spill] sm:$0xff] }
 0x26e   : > { %v2825_v8 = vadd.f32 %v8035_v9, %v2778_v39  ;;  %v2779_v6 = vadd.f32 %v2677_v59, %v7942_v46 }
 0x26f   : > { %v2823_v51 = vadd.f32 %v8035_v9, %v2776_v15  ;;  %v2777_v31 = vadd.f32 %v2669_v28, %v7945_v11 }
 0x270   : > { %v2865_v25 = vmax.f32 %v2825_v8, 0.0  ;;  %v2826_v50 = vadd.f32 %v8035_v9, %v2779_v6  ;;  %v9013_v8 = vld [vmem:[#allocation17_spill] sm:$0xff] }
 0x271   : > { %v2863_v4 = vmax.f32 %v2823_v51, 0.0  ;;  %v2824_v43 = vadd.f32 %v8035_v9, %v2777_v31  ;;  %v6506_v29 = vpop.f32.mrb[168].mxu0 }
 0x272   : > { %2955 = vst [vmem:[#allocation3 + $0xb1] sm:$0xff] %v2865_v25  ;;  %v2866_v52 = vmax.f32 %v2826_v50, 0.0  ;;  %v2690_v20 = vadd.f32 %v6506_v29, %v7931_v55  ;;  %v2681_v24 = vpop.f32.mrb[169].mxu0 }
 0x273   : > { %2953 = vst [vmem:[#allocation3 + $0xa1] sm:$0xff] %v2863_v4  ;;  %v2864_v10 = vmax.f32 %v2824_v43, 0.0  ;;  %v2682_v46 = vadd.f32 %v2681_v24, %v9007_v12  ;;  %v6507_v2 = vpop.f32.mrb[170].mxu0  ;;  %v9014_v12 = vld [vmem:[#allocation20_spill] sm:$0xff] }
 0x274   : > { %2956 = vst [vmem:[#allocation3 + $0xb9] sm:$0xff] %v2866_v52  ;;  %v2782_v11 = vadd.f32 %v2690_v20, %v7952_v49  ;;  %v2693_v41 = vadd.f32 %v6507_v2, %v9008_v61  ;;  %v2684_v0 = vpop.f32.mrb[171].mxu0 }
 0x275   : > { %2954 = vst [vmem:[#allocation3 + $0xa9] sm:$0xff] %v2864_v10  ;;  %v2780_v3 = vadd.f32 %v2682_v46, %v7955_v44  ;;  %v2685_v14 = vadd.f32 %v2684_v0, %v9009_v34  ;;  %v9010_v44 = vld [vmem:[#allocation18_spill] sm:$0xff] }
 0x276   : > { %v2829_v36 = vadd.f32 %v8035_v9, %v2782_v11  ;;  %v2783_v55 = vadd.f32 %v2693_v41, %v7958_v42  ;;  %v9015_v41 = vld [vmem:[#allocation21_spill] sm:$0xff] }
 0x277   : > { %v2827_v60 = vadd.f32 %v8035_v9, %v2780_v3  ;;  %v2781_v45 = vadd.f32 %v2685_v14, %v7961_v58 }
 0x278   : > { %v2869_v5 = vmax.f32 %v2829_v36, 0.0  ;;  %v2830_v23 = vadd.f32 %v8035_v9, %v2783_v55  ;;  %v9017_v36 = vld [vmem:[#allocation23_spill] sm:$0xff] }
 0x279   : > { %v2867_v49 = vmax.f32 %v2827_v60, 0.0  ;;  %v2828_v17 = vadd.f32 %v8035_v9, %v2781_v45  ;;  %v6510_v1 = vpop.f32.mrb[172].mxu0 }
 0x27a   : > { %2959 = vst [vmem:[#allocation3 + $0xd9] sm:$0xff] %v2869_v5  ;;  %v2870_v54 = vmax.f32 %v2830_v23, 0.0  ;;  %v2706_v37 = vadd.f32 %v6510_v1, %v9010_v44  ;;  %v2697_v18 = vpop.f32.mrb[173].mxu0 }
 0x27b   : > { %2957 = vst [vmem:[#allocation3 + $0xc9] sm:$0xff] %v2867_v49  ;;  %v2868_v39 = vmax.f32 %v2828_v17, 0.0  ;;  %v2698_v42 = vadd.f32 %v2697_v18, %v9011_v13  ;;  %v6511_v59 = vpop.f32.mrb[174].mxu0 }
 0x27c   : > { %2960 = vst [vmem:[#allocation3 + $0xe1] sm:$0xff] %v2870_v54  ;;  %v2786_v58 = vadd.f32 %v2706_v37, %v7968_v38  ;;  %v2709_v15 = vadd.f32 %v6511_v59, %v9012_v63  ;;  %v2700_v27 = vpop.f32.mrb[175].mxu0  ;;  %v9019_v63 = vld [vmem:[#allocation25_spill] sm:$0xff] }
 0x27d   : > { %2958 = vst [vmem:[#allocation3 + $0xd1] sm:$0xff] %v2868_v39  ;;  %v2784_v28 = vadd.f32 %v2698_v42, %v7971_v56  ;;  %v2701_v6 = vadd.f32 %v2700_v27, %v9013_v8 }
 0x27e   : > { %v2833_v51 = vadd.f32 %v8035_v9, %v2786_v58  ;;  %v2787_v31 = vadd.f32 %v2709_v15, %v7974_v53 }
 0x27f   : > { %v2831_v25 = vadd.f32 %v8035_v9, %v2784_v28  ;;  %v2785_v50 = vadd.f32 %v2701_v6, %v7977_v48 }
 0x280   : > { %v2873_v4 = vmax.f32 %v2833_v51, 0.0  ;;  %v2834_v43 = vadd.f32 %v8035_v9, %v2787_v31 }
 0x281   : > { %v2871_v38 = vmax.f32 %v2831_v25, 0.0  ;;  %v2832_v29 = vadd.f32 %v8035_v9, %v2785_v50  ;;  %v6514_v52 = vpop.f32.mrb[176].mxu0  ;;  %v9020_v25 = vld [vmem:[#allocation26_spill] sm:$0xff] }
 0x282   : > { %2963 = vst [vmem:[#allocation3 + $0x101] sm:$0xff] %v2873_v4  ;;  %v2874_v20 = vmax.f32 %v2834_v43, 0.0  ;;  %v2722_v56 = vadd.f32 %v6514_v52, %v7995_v33  ;;  %v2713_v24 = vpop.f32.mrb[177].mxu0  ;;  %v9016_v33 = vld [vmem:[#allocation22_spill] sm:$0xff] }
 0x283   : > { %2961 = vst [vmem:[#allocation3 + $0xf1] sm:$0xff] %v2871_v38  ;;  %v2872_v10 = vmax.f32 %v2832_v29, 0.0  ;;  %v2714_v53 = vadd.f32 %v2713_v24, %v9014_v12  ;;  %v6515_v46 = vpop.f32.mrb[178].mxu0  ;;  %v9021_v38 = vld [vmem:[#allocation27_spill] sm:$0xff] }
 0x284   : > { %2964 = vst [vmem:[#allocation3 + $0x109] sm:$0xff] %v2874_v20  ;;  %v2790_v48 = vadd.f32 %v2722_v56, %v7984_v26  ;;  %v2725_v2 = vadd.f32 %v6515_v46, %v7997_v30  ;;  %v2716_v11 = vpop.f32.mrb[179].mxu0 }
 0x285   : > { %2962 = vst [vmem:[#allocation3 + $0xf9] sm:$0xff] %v2872_v10  ;;  %v2788_v61 = vadd.f32 %v2714_v53, %v7987_v7  ;;  %v2717_v0 = vadd.f32 %v2716_v11, %v9015_v41  ;;  %v9023_v10 = vld [vmem:[#allocation29_spill] sm:$0xff] }
 0x286   : > { %v2837_v3 = vadd.f32 %v8035_v9, %v2790_v48  ;;  %v2791_v34 = vadd.f32 %v2725_v2, %v9016_v33 }
 0x287   : > { %v2835_v14 = vadd.f32 %v8035_v9, %v2788_v61  ;;  %v2789_v55 = vadd.f32 %v2717_v0, %v9017_v36 }
 0x288   : > { %v2877_v60 = vmax.f32 %v2837_v3, 0.0  ;;  %v2838_v45 = vadd.f32 %v8035_v9, %v2791_v34 }
 0x289   : > { %v2875_v26 = vmax.f32 %v2835_v14, 0.0  ;;  %v2836_v30 = vadd.f32 %v8035_v9, %v2789_v55  ;;  %v6518_v5 = vpop.f32.mrb[180].mxu0 }
 0x28a   : > { %2967 = vst [vmem:[#allocation3 + $0x129] sm:$0xff] %v2877_v60  ;;  %v2878_v23 = vmax.f32 %v2838_v45, 0.0  ;;  %v2738_v7 = vadd.f32 %v6518_v5, %v8027_v62  ;;  %v2729_v49 = vpop.f32.mrb[181].mxu0  ;;  %v9018_v62 = vld [vmem:[#allocation24_spill] sm:$0xff] }
 0x28b   : > { %2965 = vst [vmem:[#allocation3 + $0x119] sm:$0xff] %v2875_v26  ;;  %v2876_v17 = vmax.f32 %v2836_v30, 0.0  ;;  %v2730_v1 = vadd.f32 %v2729_v49, %v8011_v57  ;;  %v6519_v54 = vpop.f32.mrb[182].mxu0 }
 0x28c   : > { %2968 = vst [vmem:[#allocation3 + $0x131] sm:$0xff] %v2878_v23  ;;  %v2794_v44 = vadd.f32 %v2738_v7, %v8000_v16  ;;  %v2741_v37 = vadd.f32 %v6519_v54, %v8029_v32  ;;  %v2732_v18 = vpop.f32.mrb[183].mxu0 }
 0x28d   : > { %2966 = vst [vmem:[#allocation3 + $0x121] sm:$0xff] %v2876_v17  ;;  %v2792_v39 = vadd.f32 %v2730_v1, %v8003_v19  ;;  %v2733_v13 = vadd.f32 %v2732_v18, %v8013_v40 }
 0x28e   : > { %v2841_v42 = vadd.f32 %v8035_v9, %v2794_v44  ;;  %v2795_v59 = vadd.f32 %v2741_v37, %v9018_v62 }
 0x28f   : > { %v2839_v58 = vadd.f32 %v8035_v9, %v2792_v39  ;;  %v2793_v57 = vadd.f32 %v2733_v13, %v9019_v63 }
 0x290   : > { %v2881_v15 = vmax.f32 %v2841_v42, 0.0  ;;  %v2842_v27 = vadd.f32 %v8035_v9, %v2795_v59 }
 0x291   : > { %v2879_v16 = vmax.f32 %v2839_v58, 0.0  ;;  %v2840_v32 = vadd.f32 %v8035_v9, %v2793_v57  ;;  %v6522_v28 = vpop.f32.mrb[184].mxu0 }
 0x292   : > { %2971 = vst [vmem:[#allocation3 + $0x151] sm:$0xff] %v2881_v15  ;;  %v2882_v8 = vmax.f32 %v2842_v27, 0.0  ;;  %v2754_v19 = vadd.f32 %v6522_v28, %v8058_v47  ;;  %v2745_v40 = vpop.f32.mrb[185].mxu0  ;;  %v9022_v47 = vld [vmem:[#allocation28_spill] sm:$0xff] }
 0x293   : > { %2969 = vst [vmem:[#allocation3 + $0x141] sm:$0xff] %v2879_v16  ;;  %v2880_v6 = vmax.f32 %v2840_v32, 0.0  ;;  %v2746_v51 = vadd.f32 %v2745_v40, %v8042_v21  ;;  %v6523_v31 = vpop.f32.mrb[186].mxu0 }
 0x294   : > { %2972 = vst [vmem:[#allocation3 + $0x159] sm:$0xff] %v2882_v8  ;;  %v2798_v50 = vadd.f32 %v2754_v19, %v9020_v25  ;;  %v2757_v4 = vadd.f32 %v6523_v31, %v8064_v22  ;;  %v2748_v43 = vpop.f32.mrb[187].mxu0 }
 0x295   : > { %2970 = vst [vmem:[#allocation3 + $0x149] sm:$0xff] %v2880_v6  ;;  %v2796_v29 = vadd.f32 %v2746_v51, %v9021_v38  ;;  %v2749_v52 = vadd.f32 %v2748_v43, %v8048_v35  ;;  %v7028_v35 = vmov (!%p5522_p7), 0.0  }
 0x296   : > { %v2845_v20 = vadd.f32 %v8035_v9, %v2798_v50  ;;  %v2799_v56 = vadd.f32 %v2757_v4, %v9022_v47  ;;  %2981 = vst [vmem:[#allocation3] sm:$0xff] (!%p5522_p7), %v7028_v35  ;;  %2982 = vst [vmem:[#allocation3 + $0x8] sm:$0xff] (!%p5522_p7), %v7028_v35 }
 0x297   : > { %v2843_v24 = vadd.f32 %v8035_v9, %v2796_v29  ;;  %v2797_v21 = vadd.f32 %v2749_v52, %v9023_v10  ;;  %2980 = sbr.rel (%p5522_p7) target bundleno = 670 (0x29e), region = 48  ;;  %2983 = vst [vmem:[#allocation3 + $0x10] sm:$0xff] (!%p5522_p7), %v7028_v35  ;;  %2984 = vst [vmem:[#allocation3 + $0x18] sm:$0xff] (!%p5522_p7), %v7028_v35 }
 0x298   : > { %v2885_v12 = vmax.f32 %v2845_v20, 0.0  ;;  %v2846_v53 = vadd.f32 %v8035_v9, %v2799_v56  ;;  %2985 = vst [vmem:[#allocation3 + $0x20] sm:$0x3] (!%p5522_p7), %v7028_v35 }
 0x299   : > { %v2883_v46 = vmax.f32 %v2843_v24, 0.0  ;;  %v2844_v22 = vadd.f32 %v8035_v9, %v2797_v21 }
 0x29a   : > { %2975 = vst [vmem:[#allocation3 + $0x179] sm:$0xff] %v2885_v12  ;;  %v2886_v48 = vmax.f32 %v2846_v53, 0.0 }
 0x29b   : > { %2973 = vst [vmem:[#allocation3 + $0x169] sm:$0xff] %v2883_v46  ;;  %v2884_v2 = vmax.f32 %v2844_v22, 0.0 }
 0x29c   : > { %2976 = vst [vmem:[#allocation3 + $0x181] sm:$0xff] %v2886_v48 }
 0x29d   : > { %2974 = vst [vmem:[#allocation3 + $0x171] sm:$0xff] %v2884_v2 }
 0x29e PF: > { %p5523_p8 = scmp.ne.s32.totalorder %s7076_s25, 3 }
 0x29f   : > { %v7029_v9 = vmov (!%p5523_p8), 0.0  }
 0x2a0   : > { %2989 = sbr.rel (%p5523_p8) target bundleno = 679 (0x2a7), region = 52  ;;  %2991 = vst [vmem:[#allocation3 + $0x168] sm:$0xff] (!%p5523_p8), %v7029_v9  ;;  %2992 = vst [vmem:[#allocation3 + $0x170] sm:$0xff] (!%p5523_p8), %v7029_v9 }
 0x2a1   : > { %2993 = vst [vmem:[#allocation3 + $0x178] sm:$0xff] (!%p5523_p8), %v7029_v9  ;;  %2994 = vst [vmem:[#allocation3 + $0x180] sm:$0xff] (!%p5523_p8), %v7029_v9 }
 0x2a2   : > { %2995 = vst [vmem:[#allocation3 + $0x188] sm:$0x3] (!%p5523_p8), %v7029_v9 }
 0x2a7 PF: > { %v6946_v11 = vld [vmem:[%s8943_s4 + $0x100] sm:$0xff]   ;;  %v6949_v0 = vld [vmem:[%s8943_s4 + $0x108] sm:$0xff]   ;;  %v6952_v34 = vld [vmem:[%s8943_s4 + $0x110] sm:$0xff]  }
 0x2a8   : > { %v6947_v61 = vld [vmem:[%s8943_s4 + $0x140] sm:$0xff]   ;;  %5948 = vmatprep.subr.bf16.mxu0 %v6946_v11  ;;  %v6950_v3 = vld [vmem:[%s8943_s4 + $0x148] sm:$0xff]   ;;  %v6953_v14 = vld [vmem:[%s8943_s4 + $0x150] sm:$0xff]  }
 0x2a9   : > { %v6948_v41 = vld [vmem:[%s8943_s4 + $0xc0] sm:$0xff]   ;;  %6524 = vmatprep.subr.bf16.mxu1 %v6947_v61  ;;  %v6951_v33 = vld [vmem:[%s8943_s4 + $0xc8] sm:$0xff]   ;;  %v6954_v36 = vld [vmem:[%s8943_s4 + $0xd0] sm:$0xff]  }
 0x2aa   : > { %5949 = vmatpush3.bf16.msra.mxu0 %v6948_v41  ;;  %6525 = vmatpush3.bf16.msra.mxu1 %v6947_v61  ;;  %v6955_v55 = vld [vmem:[%s8943_s4 + $0x118] sm:$0xff]   ;;  %v6958_v26 = vld [vmem:[%s8943_s4 + $0x120] sm:$0xff]   ;;  %v6961_v23 = vld [vmem:[%s8943_s4 + $0x128] sm:$0xff]  }
 0x2ab   : > { %5950 = vmatprep.subr.bf16.mxu0 %v6949_v0  ;;  %6526 = vmatprep.subr.bf16.mxu1 %v6950_v3  ;;  %v6956_v60 = vld [vmem:[%s8943_s4 + $0x158] sm:$0xff]   ;;  %v6959_v30 = vld [vmem:[%s8943_s4 + $0x160] sm:$0xff]   ;;  %v6962_v7 = vld [vmem:[%s8943_s4 + $0x168] sm:$0xff]  }
 0x2ac   : > { %v6957_v45 = vld [vmem:[%s8943_s4 + $0xd8] sm:$0xff]   ;;  %v6960_v5 = vld [vmem:[%s8943_s4 + $0xe0] sm:$0xff]   ;;  %v6963_v49 = vld [vmem:[%s8943_s4 + $0xe8] sm:$0xff]  }
 0x2ad   : > { %v6964_v17 = vld [vmem:[%s8943_s4 + $0x130] sm:$0xff]   ;;  %v6967_v39 = vld [vmem:[%s8943_s4 + $0x138] sm:$0xff]   ;;  %v3189_v63 = vld [vmem:[#allocation3 + $0x28] sm:$0xff] }
 0x2ae   : > { %5951 = vmatpush3.bf16.msra.mxu0 %v6951_v33  ;;  %6527 = vmatpush3.bf16.msra.mxu1 %v6950_v3  ;;  %v6965_v1 = vld [vmem:[%s8943_s4 + $0x170] sm:$0xff]   ;;  %v6968_v13 = vld [vmem:[%s8943_s4 + $0x178] sm:$0xff]   ;;  %v3288_v27 = vld [vmem:[#allocation3 + $0x42] sm:$0xff] }
 0x2af   : > { %5952 = vmatprep.subr.bf16.mxu0 %v6952_v34  ;;  %6528 = vmatprep.subr.bf16.mxu1 %v6953_v14  ;;  %v6966_v54 = vld [vmem:[%s8943_s4 + $0xf0] sm:$0xff]   ;;  %v6969_v59 = vld [vmem:[%s8943_s4 + $0xf8] sm:$0xff]   ;;  %v6970_v16 = vld [vmem:[%s8943_s4 + $0x40] sm:$0xff]  }
 0x2b0   : > { %v3237_v44 = vld [vmem:[#allocation3 + $0x29] sm:$0xff]  ;;  %v3238_v37 = vld [vmem:[#allocation3 + $0x31] sm:$0xff]  ;;  %v3287_v15 = vld [vmem:[#allocation3 + $0x3a] sm:$0xff] }
 0x2b1   : > { %v3285_v18 = vld [vmem:[#allocation3 + $0x2a] sm:$0xff]  ;;  %v8235_v42 = vpack.c.bf16 %v3238_v37, %v3237_v44  ;;  %v3286_v62 = vld [vmem:[#allocation3 + $0x32] sm:$0xff]  ;;  %v3240_v28 = vld [vmem:[#allocation3 + $0x41] sm:$0xff]  ;;  %v3318_v6 = vpack.c.bf16 %v3288_v27, %v3287_v15 }
 0x2b2   : > { %5953 = vmatpush3.bf16.msra.mxu0 %v6954_v36  ;;  %6529 = vmatpush3.bf16.msra.mxu1 %v6953_v14  ;;  %v3317_v58 = vpack.c.bf16 %v3286_v62, %v3285_v18  ;;  %v3190_v57 = vld [vmem:[#allocation3 + $0x30] sm:$0xff]  ;;  %v3239_v32 = vld [vmem:[#allocation3 + $0x39] sm:$0xff]  ;;  %v6972_v50 = vld [vmem:[%s8943_s4 + $0x48] sm:$0xff]  }
 0x2b3   : > { %5954 = vmatprep.subr.bf16.mxu0 %v6955_v55  ;;  %6530 = vmatprep.subr.bf16.mxu1 %v6956_v60  ;;  %v3289_v8 = vld [vmem:[#allocation3 + $0x52] sm:$0xff]  ;;  %v3290_v19 = vld [vmem:[#allocation3 + $0x5a] sm:$0xff]  ;;  %v8244_v40 = vpack.c.bf16 %v3190_v57, %v3189_v63  ;;  %v8249_v31 = vpack.c.bf16 %v3240_v28, %v3239_v32  ;;  %v3291_v38 = vld [vmem:[#allocation3 + $0x62] sm:$0xff] }
 0x2b4   : > { %3558 = vmatprep.mubr.bf16.mxu0 %v8235_v42  ;;  %6540 = vmatprep.mubr.bf16.mxu1 %v3317_v58  ;;  %v6971_v51 = vld [vmem:[%s8943_s4] sm:$0xff]   ;;  %v3319_v25 = vpack.c.bf16 %v3290_v19, %v3289_v8  ;;  %v3191_v4 = vld [vmem:[#allocation3 + $0x38] sm:$0xff]  ;;  %v3292_v29 = vld [vmem:[#allocation3 + $0x6a] sm:$0xff] }
 0x2b5   : > { %v3192_v43 = vld [vmem:[#allocation3 + $0x40] sm:$0xff]  ;;  %v6973_v52 = vld [vmem:[%s8943_s4 + $0x8] sm:$0xff]   ;;  %v3241_v20 = vld [vmem:[#allocation3 + $0x51] sm:$0xff]  ;;  %v3320_v12 = vpack.c.bf16 %v3292_v29, %v3291_v38 }
 0x2b6   : > { %5955 = vmatpush3.bf16.msra.mxu0 %v6957_v45  ;;  %6531 = vmatpush3.bf16.msra.mxu1 %v6956_v60  ;;  %v3242_v47 = vld [vmem:[#allocation3 + $0x59] sm:$0xff]  ;;  %v3294_v24 = vld [vmem:[#allocation3 + $0x82] sm:$0xff]  ;;  %v6974_v10 = vld [vmem:[%s8943_s4 + $0x50] sm:$0xff]   ;;  %v8262_v21 = vpack.c.bf16 %v3192_v43, %v3191_v4 }
 0x2b7   : > { %5956 = vmatprep.subr.bf16.mxu0 %v6958_v26  ;;  %6532 = vmatprep.subr.bf16.mxu1 %v6959_v30  ;;  %v3293_v56 = vld [vmem:[#allocation3 + $0x7a] sm:$0xff]  ;;  %v8264_v53 = vpack.c.bf16 %v3242_v47, %v3241_v20  ;;  %v6975_v22 = vld [vmem:[%s8943_s4 + $0x10] sm:$0xff]   ;;  %v3297_v0 = vld [vmem:[#allocation3 + $0xa2] sm:$0xff] }
 0x2b8   : > { %v3321_v46 = vpack.c.bf16 %v3294_v24, %v3293_v56  ;;  %v3193_v48 = vld [vmem:[#allocation3 + $0x50] sm:$0xff]  ;;  %v3194_v2 = vld [vmem:[#allocation3 + $0x58] sm:$0xff]  ;;  %v3243_v61 = vld [vmem:[#allocation3 + $0x61] sm:$0xff] }
 0x2b9   : > { %v6976_v35 = vld [vmem:[%s8943_s4 + $0x58] sm:$0xff]   ;;  %v3295_v9 = vld [vmem:[#allocation3 + $0x8a] sm:$0xff]  ;;  %v6978_v34 = vld [vmem:[%s8943_s4 + $0x60] sm:$0xff]   ;;  %v8280_v14 = vpack.c.bf16 %v3194_v2, %v3193_v48 }
 0x2ba   : > { %5957 = vmatpush3.bf16.msra.mxu0 %v6960_v5  ;;  %6533 = vmatpush3.bf16.msra.mxu1 %v6959_v30  ;;  %v3296_v11 = vld [vmem:[#allocation3 + $0x92] sm:$0xff]  ;;  %v3244_v41 = vld [vmem:[#allocation3 + $0x69] sm:$0xff]  ;;  %v6979_v45 = vld [vmem:[%s8943_s4 + $0x20] sm:$0xff]  }
 0x2bb   : > { %5958 = vmatprep.subr.bf16.mxu0 %v6961_v23  ;;  %6534 = vmatprep.subr.bf16.mxu1 %v6962_v7  ;;  %v3298_v3 = vld [vmem:[#allocation3 + $0xaa] sm:$0xff]  ;;  %v6977_v33 = vld [vmem:[%s8943_s4 + $0x18] sm:$0xff]   ;;  %v3322_v36 = vpack.c.bf16 %v3296_v11, %v3295_v9  ;;  %v8282_v55 = vpack.c.bf16 %v3244_v41, %v3243_v61  ;;  %v3195_v26 = vld [vmem:[#allocation3 + $0x60] sm:$0xff] }
 0x2bc   : > { %v3323_v60 = vpack.c.bf16 %v3298_v3, %v3297_v0  ;;  %v3196_v30 = vld [vmem:[#allocation3 + $0x68] sm:$0xff]  ;;  %v3299_v23 = vld [vmem:[#allocation3 + $0xb2] sm:$0xff]  ;;  %v3198_v63 = vld [vmem:[#allocation3 + $0x80] sm:$0xff] }
 0x2bd   : > { %v6980_v5 = vld [vmem:[%s8943_s4 + $0x68] sm:$0xff]   ;;  %v8295_v37 = vpack.c.bf16 %v3196_v30, %v3195_v26  ;;  %v3197_v58 = vld [vmem:[#allocation3 + $0x78] sm:$0xff]  ;;  %v8320_v4 = vld [vmem:[%s8943_s4 + $0x80] sm:$0xff]  }
 0x2be   : > { %5959 = vmatpush3.bf16.msra.mxu0 %v6963_v49  ;;  %6535 = vmatpush3.bf16.msra.mxu1 %v6962_v7  ;;  %v3300_v7 = vld [vmem:[#allocation3 + $0xba] sm:$0xff]  ;;  %v6981_v44 = vld [vmem:[%s8943_s4 + $0x28] sm:$0xff]   ;;  %v3305_v28 = vld [vmem:[#allocation3 + $0xf2] sm:$0xff] }
 0x2bf   : > { %5960 = vmatprep.subr.bf16.mxu0 %v6964_v17  ;;  %6536 = vmatprep.subr.bf16.mxu1 %v6965_v1  ;;  %v3245_v49 = vld [vmem:[#allocation3 + $0x79] sm:$0xff]  ;;  %v3246_v17 = vld [vmem:[#allocation3 + $0x81] sm:$0xff]  ;;  %v3324_v18 = vpack.c.bf16 %v3300_v7, %v3299_v23  ;;  %v3247_v27 = vld [vmem:[#allocation3 + $0x89] sm:$0xff] }
 0x2c0   : > { %v3303_v57 = vld [vmem:[#allocation3 + $0xda] sm:$0xff]  ;;  %v3304_v15 = vld [vmem:[#allocation3 + $0xe2] sm:$0xff]  ;;  %v3308_v47 = vld [vmem:[#allocation3 + $0x10a] sm:$0xff] }
 0x2c1   : > { %v6984_v32 = vld [vmem:[%s8943_s4 + $0x78] sm:$0xff]   ;;  %v6987_v43 = vld [vmem:[%s8943_s4 + $0x1c0] sm:$0xff]   ;;  %v3199_v29 = vld [vmem:[#allocation3 + $0x88] sm:$0xff] }
 0x2c2   : > { %5961 = vmatpush3.bf16.msra.mxu0 %v6966_v54  ;;  %6537 = vmatpush3.bf16.msra.mxu1 %v6965_v1  ;;  %v3301_v1 = vld [vmem:[#allocation3 + $0xca] sm:$0xff]  ;;  %v3302_v54 = vld [vmem:[#allocation3 + $0xd2] sm:$0xff]  ;;  %v3306_v8 = vld [vmem:[#allocation3 + $0xfa] sm:$0xff] }
 0x2c3   : > { %5962 = vmatprep.subr.bf16.mxu0 %v6967_v39  ;;  %6538 = vmatprep.subr.bf16.mxu1 %v6968_v13  ;;  %v6982_v39 = vld [vmem:[%s8943_s4 + $0x70] sm:$0xff]   ;;  %v3325_v62 = vpack.c.bf16 %v3302_v54, %v3301_v1  ;;  %v6985_v19 = vld [vmem:[%s8943_s4 + $0x38] sm:$0xff]   ;;  %v6988_v38 = vld [vmem:[%s8943_s4 + $0x180] sm:$0xff]  }
 0x2c4   : > { %v3307_v20 = vld [vmem:[#allocation3 + $0x102] sm:$0xff]  ;;  %v3311_v41 = vld [vmem:[#allocation3 + $0x12a] sm:$0xff]  ;;  %v3312_v0 = vld [vmem:[#allocation3 + $0x132] sm:$0xff] }
 0x2c5   : > { %v3249_v56 = vld [vmem:[#allocation3 + $0xa1] sm:$0xff]  ;;  %v3250_v24 = vld [vmem:[#allocation3 + $0xa9] sm:$0xff]  ;;  %v3251_v3 = vld [vmem:[#allocation3 + $0xb1] sm:$0xff]  ;;  %v3330_v26 = vpack.c.bf16 %v3312_v0, %v3311_v41 }
 0x2c6   : > { %5963 = vmatpush3.bf16.msra.mxu0 %v6969_v59  ;;  %6539 = vmatpush3.bf16.msra.mxu1 %v6968_v13  ;;  %v8300_v13 = vpack.c.bf16 %v3246_v17, %v3245_v49  ;;  %v6983_v59 = vld [vmem:[%s8943_s4 + $0x30] sm:$0xff]   ;;  %v8333_v48 = vpack.c.bf16 %v3250_v24, %v3249_v56  ;;  %v6991_v9 = vld [vmem:[%s8943_s4 + $0x188] sm:$0xff]   ;;  %v3201_v11 = vld [vmem:[#allocation3 + $0xa0] sm:$0xff] }
 0x2c7   : > { %6084 = vmatprep.subr.bf16.mxu1 %v6970_v16  ;;  %v3248_v16 = vld [vmem:[#allocation3 + $0x91] sm:$0xff]  ;;  %6220 = vmatprep.subr.bf16.mxu0 %v6987_v43  ;;  %v3202_v61 = vld [vmem:[#allocation3 + $0xa8] sm:$0xff]  ;;  %v3255_v43 = vld [vmem:[#allocation3 + $0xd9] sm:$0xff] }
 0x2c8   : > { %v6994_v30 = vld [vmem:[%s8943_s4 + $0x190] sm:$0xff]   ;;  %v6995_v7 = vld [vmem:[%s8943_s4 + $0x1d8] sm:$0xff]  }
 0x2c9   : > { %3559 = vmatmul.mubr.bf16.vlgmr.msra.gmra.mrb[188].mxu0 %v8244_v40  ;;  %6541 = vmatmul.mubr.bf16.vlgmr.msra.gmra.mrb[172].mxu1 %v3318_v6  ;;  %v8313_v6 = vpack.c.bf16 %v3198_v63, %v3197_v58  ;;  %v3203_v49 = vld [vmem:[#allocation3 + $0xb0] sm:$0xff]  ;;  %v3204_v17 = vld [vmem:[#allocation3 + $0xb8] sm:$0xff]  ;;  %v6998_v58 = vld [vmem:[%s8943_s4 + $0x1e0] sm:$0xff]  }
 0x2ca   : > { %6085 = vmatpush3.bf16.msra.mxu1 %v6971_v51  ;;  %3566 = vmatprep.mubr.bf16.mxu0 %v8249_v31  ;;  %v3326_v51 = vpack.c.bf16 %v3304_v15, %v3303_v57  ;;  %v3315_v1 = vld [vmem:[#allocation3 + $0x152] sm:$0xff]  ;;  %v8364_v63 = vpack.c.bf16 %v3204_v17, %v3203_v49  ;;  %v6999_v15 = vld [vmem:[%s8943_s4 + $0x1a0] sm:$0xff]  }
 0x2cb   : > { %6544 = vmatprep.mubr.bf16.mxu1 %v3319_v25  ;;  %6086 = vmatprep.subr.bf16.mxu1 %v6972_v50  ;;  %v8315_v25 = vpack.c.bf16 %v3248_v16, %v3247_v27  ;;  %v3327_v50 = vpack.c.bf16 %v3306_v8, %v3305_v28  ;;  %v6996_v54 = vld [vmem:[%s8943_s4 + $0x198] sm:$0xff]   ;;  %v3205_v28 = vld [vmem:[#allocation3 + $0xc8] sm:$0xff]  ;;  %v3206_v8 = vld [vmem:[#allocation3 + $0xd0] sm:$0xff] }
 0x2cc   : > { %6221 = vmatpush3.bf16.msra.mxu0 %v6988_v38  ;;  %v3256_v38 = vld [vmem:[#allocation3 + $0xe1] sm:$0xff]  ;;  %v8385_v56 = vpack.c.bf16 %v3206_v8, %v3205_v28  ;;  %v2999_v41 = vld [vmem:[#allocation3 + $0x18] sm:$0xff] }
 0x2cd   : > { %v3257_v0 = vld [vmem:[#allocation3 + $0xf1] sm:$0xff]  ;;  %v7006_v49 = vld [vmem:[%s8943_s4 + $0xa0] sm:$0xff]  }
 0x2ce   : > { %6087 = vmatpush3.bf16.msra.mxu1 %v6973_v52  ;;  %v3200_v52 = vld [vmem:[#allocation3 + $0x90] sm:$0xff] }
 0x2cf   : > { %6088 = vmatprep.subr.bf16.mxu1 %v6974_v10  ;;  %v3309_v10 = vld [vmem:[#allocation3 + $0x11a] sm:$0xff] }
 0x2d1   : > { %3567 = vmatmul.mubr.bf16.gmra.mrb[192].mxu0 %v8262_v21  ;;  %6545 = vmatmul.mubr.bf16.gmra.mrb[176].mxu1 %v3320_v12  ;;  %v3310_v12 = vld [vmem:[#allocation3 + $0x122] sm:$0xff] }
 0x2d2   : > { %3574 = vmatprep.mubr.bf16.mxu0 %v8264_v53  ;;  %6548 = vmatprep.mubr.bf16.mxu1 %v3321_v46  ;;  %v8331_v46 = vpack.c.bf16 %v3200_v52, %v3199_v29  ;;  %v3329_v2 = vpack.c.bf16 %v3310_v12, %v3309_v10  ;;  %v7002_v29 = vld [vmem:[%s8943_s4 + $0x1f0] sm:$0xff]   ;;  %v8387_v10 = vpack.c.bf16 %v3256_v38, %v3255_v43 }
 0x2d3   : > { %6089 = vmatpush3.bf16.msra.mxu1 %v6975_v22  ;;  %v3328_v22 = vpack.c.bf16 %v3308_v47, %v3307_v20  ;;  %v3046_v52 = vld [vmem:[#allocation3 + $0x11] sm:$0xff]  ;;  %v3047_v20 = vld [vmem:[#allocation3 + $0x19] sm:$0xff] }
 0x2d4   : > { %6090 = vmatprep.subr.bf16.mxu1 %v6976_v35  ;;  %v6990_v35 = vld [vmem:[%s8943_s4 + $0x1c8] sm:$0xff]   ;;  %v7003_v47 = vld [vmem:[%s8943_s4 + $0x1b0] sm:$0xff]   ;;  %v3077_v12 = vpack.c.bf16 %v3047_v20, %v3046_v52 }
 0x2d5   : > { %6222 = vmatprep.subr.bf16.mxu0 %v6990_v35  ;;  %v7004_v35 = vld [vmem:[%s8943_s4 + $0x1f8] sm:$0xff]   ;;  %v3218_v52 = vld [vmem:[#allocation3 + $0x148] sm:$0xff] }
 0x2d6   : > { %6223 = vmatpush3.bf16.msra.mxu0 %v6991_v9  ;;  %v3208_v9 = vld [vmem:[#allocation3 + $0xe0] sm:$0xff]  ;;  %v3267_v20 = vld [vmem:[#allocation3 + $0x151] sm:$0xff] }
 0x2d7   : > { %6091 = vmatpush3.bf16.msra.mxu1 %v6977_v33  ;;  %v3252_v33 = vld [vmem:[#allocation3 + $0xb9] sm:$0xff] }
 0x2d8   : > { %6092 = vmatprep.subr.bf16.mxu1 %v6978_v34  ;;  %v3313_v34 = vld [vmem:[#allocation3 + $0x142] sm:$0xff] }
 0x2d9   : > { %3575 = vmatmul.mubr.bf16.gmra.mrb[196].mxu0 %v8280_v14  ;;  %6549 = vmatmul.mubr.bf16.gmra.mrb[180].mxu1 %v3322_v36  ;;  %v3314_v36 = vld [vmem:[#allocation3 + $0x14a] sm:$0xff] }
 0x2da   : > { %3582 = vmatprep.mubr.bf16.mxu0 %v8282_v55  ;;  %6552 = vmatprep.mubr.bf16.mxu1 %v3323_v60  ;;  %v6993_v60 = vld [vmem:[%s8943_s4 + $0x1d0] sm:$0xff]   ;;  %v3331_v23 = vpack.c.bf16 %v3314_v36, %v3313_v34 }
 0x2db   : > { %6093 = vmatpush3.bf16.msra.mxu1 %v6979_v45  ;;  %v8346_v45 = vpack.c.bf16 %v3202_v61, %v3201_v11  ;;  %6224 = vmatprep.subr.bf16.mxu0 %v6993_v60  ;;  %v2998_v11 = vld [vmem:[#allocation3 + $0x10] sm:$0xff]  ;;  %v7005_v61 = vld [vmem:[%s8943_s4 + $0x1b8] sm:$0xff]  }
 0x2dc   : > { %6094 = vmatprep.subr.bf16.mxu1 %v6980_v5  ;;  %v8351_v5 = vpack.c.bf16 %v3252_v33, %v3251_v3  ;;  %6225 = vmatpush3.bf16.msra.mxu0 %v6994_v30  ;;  %v3258_v3 = vld [vmem:[#allocation3 + $0xf9] sm:$0xff]  ;;  %v6992_v33 = vld [vmem:[%s8943_s4 + $0x90] sm:$0xff]   ;;  %v3029_v36 = vpack.c.bf16 %v2999_v41, %v2998_v11  ;;  %v3102_v41 = vld [vmem:[#allocation3 + $0x62] sm:$0xff] }
 0x2dd   : > { %6226 = vmatprep.subr.bf16.mxu0 %v6995_v7  ;;  %v8406_v60 = vpack.c.bf16 %v3258_v3, %v3257_v0  ;;  %v3210_v30 = vld [vmem:[#allocation3 + $0xf8] sm:$0xff]  ;;  %v3260_v7 = vld [vmem:[#allocation3 + $0x109] sm:$0xff] }
 0x2de   : > { %v3103_v0 = vld [vmem:[#allocation3 + $0x6a] sm:$0xff]  ;;  %v3104_v3 = vld [vmem:[#allocation3 + $0x7a] sm:$0xff] }
 0x2df   : > { %6095 = vmatpush3.bf16.msra.mxu1 %v6981_v44  ;;  %v3316_v44 = vld [vmem:[#allocation3 + $0x15a] sm:$0xff] }
 0x2e0   : > { %6096 = vmatprep.subr.bf16.mxu1 %v6982_v39  ;;  %v3254_v39 = vld [vmem:[#allocation3 + $0xd1] sm:$0xff]  ;;  %6227 = vmatpush3.bf16.msra.mxu0 %v6996_v54  ;;  %v3332_v57 = vpack.c.bf16 %v3316_v44, %v3315_v1  ;;  %v3211_v54 = vld [vmem:[#allocation3 + $0x100] sm:$0xff]  ;;  %v3212_v44 = vld [vmem:[#allocation3 + $0x108] sm:$0xff] }
 0x2e1   : > { %3583 = vmatmul.mubr.bf16.gmra.mrb[200].mxu0 %v8295_v37  ;;  %6553 = vmatmul.mubr.bf16.gmra.mrb[184].mxu1 %v3324_v18  ;;  %v3253_v18 = vld [vmem:[#allocation3 + $0xc9] sm:$0xff] }
 0x2e2   : > { %3590 = vmatprep.mubr.bf16.mxu0 %v8300_v13  ;;  %6556 = vmatprep.mubr.bf16.mxu1 %v3325_v62  ;;  %v3044_v62 = vld [vmem:[#allocation3 + $0x1] sm:$0xff]  ;;  %v8369_v27 = vpack.c.bf16 %v3254_v39, %v3253_v18  ;;  %v3261_v18 = vld [vmem:[#allocation3 + $0x119] sm:$0xff] }
 0x2e3   : > { %6097 = vmatpush3.bf16.msra.mxu1 %v6983_v59  ;;  %v3045_v59 = vld [vmem:[#allocation3 + $0x9] sm:$0xff]  ;;  %6228 = vmatprep.subr.bf16.mxu0 %v6998_v58  ;;  %v3262_v39 = vld [vmem:[#allocation3 + $0x121] sm:$0xff] }
 0x2e4   : > { %6098 = vmatprep.subr.bf16.mxu1 %v6984_v32  ;;  %v3076_v16 = vpack.c.bf16 %v3045_v59, %v3044_v62  ;;  %v7000_v32 = vld [vmem:[%s8943_s4 + $0x1e8] sm:$0xff]   ;;  %6229 = vmatpush3.bf16.msra.mxu0 %v6999_v15  ;;  %v7008_v62 = vld [vmem:[%s8943_s4 + $0xb0] sm:$0xff]   ;;  %v8431_v59 = vpack.c.bf16 %v3212_v44, %v3211_v54  ;;  %v8433_v58 = vpack.c.bf16 %v3262_v39, %v3261_v18 }
 0x2e5   : > { %6230 = vmatprep.subr.bf16.mxu0 %v7000_v32  ;;  %v3263_v15 = vld [vmem:[#allocation3 + $0x129] sm:$0xff]  ;;  %v8445_v32 = vld [vmem:[%s8943_s4 + $0x200] sm:$0xff]  }
 0x2e7   : > { %6099 = vmatpush3.bf16.msra.mxu1 %v6985_v19  ;;  %v2996_v19 = vld [vmem:[#allocation3] sm:$0xff] }
 0x2e8   : > { %6572 = vmatprep.subr.bf16.mxu1 %v8320_v4 }
 0x2e9   : > { %3591 = vmatmul.mubr.bf16.gmra.mrb[204].mxu0 %v8313_v6  ;;  %6557 = vmatmul.mubr.bf16.gmra.mrb[188].mxu1 %v3326_v51  ;;  %v2997_v51 = vld [vmem:[#allocation3 + $0x8] sm:$0xff] }
 0x2ea   : > { %3598 = vmatprep.mubr.bf16.mxu0 %v8315_v25  ;;  %6560 = vmatprep.mubr.bf16.mxu1 %v3327_v50  ;;  %v7001_v50 = vld [vmem:[%s8943_s4 + $0x1a8] sm:$0xff]   ;;  %v3028_v24 = vpack.c.bf16 %v2997_v51, %v2996_v19  ;;  %v3216_v19 = vld [vmem:[#allocation3 + $0x130] sm:$0xff] }
 0x2eb   : > { %6231 = vmatpush3.bf16.msra.mxu0 %v7001_v50  ;;  %v3265_v51 = vld [vmem:[#allocation3 + $0x141] sm:$0xff]  ;;  %v3266_v50 = vld [vmem:[#allocation3 + $0x149] sm:$0xff] }
 0x2ec   : > { %6232 = vmatprep.subr.bf16.mxu0 %v7002_v29  ;;  %v8458_v38 = vpack.c.bf16 %v3266_v50, %v3265_v51  ;;  %v3217_v29 = vld [vmem:[#allocation3 + $0x140] sm:$0xff] }
 0x2ed   : > { %v3114_v50 = vld [vmem:[#allocation3 + $0xda] sm:$0xff] }
 0x2ef   : > { %6233 = vmatpush3.bf16.msra.mxu0 %v7003_v47  ;;  %v3268_v47 = vld [vmem:[#allocation3 + $0x159] sm:$0xff] }
 0x2f0   : > { %6234 = vmatprep.subr.bf16.mxu0 %v7004_v35 }
 0x2f1   : > { %3599 = vmatmul.mubr.bf16.gmra.mrb[208].mxu0 %v8331_v46  ;;  %6561 = vmatmul.mubr.bf16.gmra.mrb[192].mxu1 %v3328_v22  ;;  %v6989_v22 = vld [vmem:[%s8943_s4 + $0x88] sm:$0xff]  }
 0x2f2   : > { %3606 = vmatprep.mubr.bf16.mxu0 %v8333_v48  ;;  %6564 = vmatprep.mubr.bf16.mxu1 %v3329_v2  ;;  %v3207_v2 = vld [vmem:[#allocation3 + $0xd8] sm:$0xff] }
 0x2f3   : > { %v8404_v34 = vpack.c.bf16 %v3208_v9, %v3207_v2  ;;  %6235 = vmatpush3.bf16.msra.mxu0 %v7005_v61  ;;  %v3220_v2 = vld [vmem:[#allocation3 + $0x158] sm:$0xff] }
 0x2f4   : > { %v7013_v61 = vld [vmem:[%s8943_s4 + $0x218] sm:$0xff]  }
 0x2f9   : > { %3607 = vmatmul.mubr.bf16.gmra.mrb[212].mxu0 %v8346_v45  ;;  %6565 = vmatmul.mubr.bf16.gmra.mrb[196].mxu1 %v3330_v26  ;;  %v3209_v26 = vld [vmem:[#allocation3 + $0xf0] sm:$0xff] }
 0x2fa   : > { %3614 = vmatprep.mubr.bf16.mxu0 %v8351_v5  ;;  %6568 = vmatprep.mubr.bf16.mxu1 %v3331_v23  ;;  %v3259_v23 = vld [vmem:[#allocation3 + $0x101] sm:$0xff]  ;;  %v8417_v17 = vpack.c.bf16 %v3210_v30, %v3209_v26  ;;  %v3106_v26 = vld [vmem:[#allocation3 + $0x8a] sm:$0xff]  ;;  %v3107_v30 = vld [vmem:[#allocation3 + $0x92] sm:$0xff] }
 0x2fb   : > { %v8419_v1 = vpack.c.bf16 %v3260_v7, %v3259_v23  ;;  %v3108_v23 = vld [vmem:[#allocation3 + $0xa2] sm:$0xff]  ;;  %v3109_v7 = vld [vmem:[#allocation3 + $0xaa] sm:$0xff] }
 0x2fc   : > { %v8545_v54 = vpack.c.bf16 %v3109_v7, %v3108_v23 }
 0x301   : > { %3615 = vmatmul.mubr.bf16.gmra.mrb[216].mxu0 %v8364_v63  ;;  %6569 = vmatmul.mubr.bf16.gmra.mrb[200].mxu1 %v3332_v57  ;;  %v3214_v57 = vld [vmem:[#allocation3 + $0x120] sm:$0xff] }
 0x302   : > { %3622 = vmatprep.mubr.bf16.mxu0 %v8369_v27  ;;  %4024 = vmatprep.mubr.bf16.mxu1 %v3076_v16  ;;  %v3264_v16 = vld [vmem:[#allocation3 + $0x131] sm:$0xff] }
 0x303   : > { %v8449_v8 = vpack.c.bf16 %v3264_v16, %v3263_v15 }
 0x309   : > { %3623 = vmatmul.mubr.bf16.gmra.mrb[220].mxu0 %v8385_v56  ;;  %4025 = vmatmul.mubr.bf16.vlgmr.msra.gmra.mrb[204].mxu1 %v3028_v24  ;;  %v8464_v24 = vpack.c.bf16 %v3218_v52, %v3217_v29  ;;  %v3117_v29 = vld [vmem:[#allocation3 + $0xfa] sm:$0xff]  ;;  %v4391_v52 = vld [vmem:[#allocation3 + $0x169] sm:$0xff] }
 0x30a   : > { %6573 = vmatpush3.bf16.msra.mxu1 %v8320_v4  ;;  %3630 = vmatprep.mubr.bf16.mxu0 %v8387_v10  ;;  %v6997_v4 = vld [vmem:[%s8943_s4 + $0x98] sm:$0xff]  }
 0x30b   : > { %4032 = vmatprep.mubr.bf16.mxu1 %v3077_v12  ;;  %6574 = vmatprep.subr.bf16.mxu1 %v6989_v22  ;;  %v8466_v12 = vpack.c.bf16 %v3268_v47, %v3267_v20  ;;  %v4392_v20 = vld [vmem:[#allocation3 + $0x171] sm:$0xff] }
 0x30e   : > { %6575 = vmatpush3.bf16.msra.mxu1 %v6989_v22  ;;  %v3219_v22 = vld [vmem:[#allocation3 + $0x150] sm:$0xff] }
 0x30f   : > { %6576 = vmatprep.subr.bf16.mxu1 %v6992_v33  ;;  %v8472_v35 = vpack.c.bf16 %v3220_v2, %v3219_v22 }
 0x311   : > { %3631 = vmatmul.mubr.bf16.gmra.mrb[224].mxu0 %v8404_v34  ;;  %4033 = vmatmul.mubr.bf16.gmra.mrb[208].mxu1 %v3029_v36  ;;  %v8529_v36 = vpack.c.bf16 %v3103_v0, %v3102_v41 }
 0x312   : > { %3638 = vmatprep.mubr.bf16.mxu0 %v8406_v60  ;;  %4040 = vmatprep.mubr.bf16.mxu1 %v8235_v42  ;;  %v7007_v42 = vld [vmem:[%s8943_s4 + $0xa8] sm:$0xff]  }
 0x313   : > { %6577 = vmatpush3.bf16.msra.mxu1 %v6992_v33  ;;  %v3105_v33 = vld [vmem:[#allocation3 + $0x82] sm:$0xff] }
 0x314   : > { %6578 = vmatprep.subr.bf16.mxu1 %v6997_v4 }
 0x317   : > { %6579 = vmatpush3.bf16.msra.mxu1 %v6997_v4  ;;  %v7015_v4 = vld [vmem:[%s8943_s4 + $0x228] sm:$0xff]  }
 0x318   : > { %6580 = vmatprep.subr.bf16.mxu1 %v7006_v49 }
 0x319   : > { %3639 = vmatmul.mubr.bf16.gmra.mrb[228].mxu0 %v8417_v17  ;;  %4041 = vmatmul.mubr.bf16.gmra.mrb[212].mxu1 %v8244_v40  ;;  %v7009_v40 = vld [vmem:[%s8943_s4 + $0xb8] sm:$0xff]  }
 0x31a   : > { %3646 = vmatprep.mubr.bf16.mxu0 %v8419_v1  ;;  %4048 = vmatprep.mubr.bf16.mxu1 %v8249_v31  ;;  %v3213_v31 = vld [vmem:[#allocation3 + $0x118] sm:$0xff] }
 0x31b   : > { %6581 = vmatpush3.bf16.msra.mxu1 %v7006_v49  ;;  %v8447_v28 = vpack.c.bf16 %v3214_v57, %v3213_v31  ;;  %v7016_v49 = vld [vmem:[%s8943_s4 + $0x230] sm:$0xff]  }
 0x31c   : > { %6582 = vmatprep.subr.bf16.mxu1 %v7007_v42  ;;  %v3112_v31 = vld [vmem:[#allocation3 + $0xca] sm:$0xff]  ;;  %v3113_v57 = vld [vmem:[#allocation3 + $0xd2] sm:$0xff] }
 0x31f   : > { %6583 = vmatpush3.bf16.msra.mxu1 %v7007_v42 }
 0x320   : > { %6584 = vmatprep.subr.bf16.mxu1 %v7008_v62 }
 0x321   : > { %3647 = vmatmul.mubr.bf16.gmra.mrb[232].mxu0 %v8431_v59  ;;  %4049 = vmatmul.mubr.bf16.gmra.mrb[216].mxu1 %v8262_v21  ;;  %v3215_v21 = vld [vmem:[#allocation3 + $0x128] sm:$0xff] }
 0x322   : > { %3654 = vmatprep.mubr.bf16.mxu0 %v8433_v58  ;;  %4056 = vmatprep.mubr.bf16.mxu1 %v8264_v53  ;;  %v8456_v43 = vpack.c.bf16 %v3216_v19, %v3215_v21 }
 0x323   : > { %6585 = vmatpush3.bf16.msra.mxu1 %v7008_v62  ;;  %v7017_v62 = vld [vmem:[%s8943_s4 + $0x238] sm:$0xff]  }
 0x324   : > { %6586 = vmatprep.subr.bf16.mxu1 %v7009_v40 }
 0x327   : > { %6587 = vmatpush3.bf16.msra.mxu1 %v7009_v40  ;;  %v3111_v40 = vld [vmem:[#allocation3 + $0xba] sm:$0xff] }
 0x328   : > { %6620 = vmatprep.subr.bf16.mxu1 %v8445_v32 }
 0x329   : > { %3655 = vmatmul.mubr.bf16.gmra.mrb[236].mxu0 %v8447_v28  ;;  %4057 = vmatmul.mubr.bf16.gmra.mrb[220].mxu1 %v8280_v14 }
 0x32a   : > { %3662 = vmatprep.mubr.bf16.mxu0 %v8449_v8  ;;  %4064 = vmatprep.mubr.bf16.mxu1 %v8282_v55 }
 0x331   : > { %3663 = vmatmul.mubr.bf16.gmra.mrb[240].mxu0 %v8456_v43  ;;  %4065 = vmatmul.mubr.bf16.gmra.mrb[224].mxu1 %v8295_v37 }
 0x332   : > { %3670 = vmatprep.mubr.bf16.mxu0 %v8458_v38  ;;  %4072 = vmatprep.mubr.bf16.mxu1 %v8300_v13 }
 0x339   : > { %3671 = vmatmul.mubr.bf16.gmra.mrb[244].mxu0 %v8464_v24  ;;  %4073 = vmatmul.mubr.bf16.gmra.mrb[228].mxu1 %v8313_v6 }
 0x33a   : > { %3678 = vmatprep.mubr.bf16.mxu0 %v8466_v12  ;;  %4080 = vmatprep.mubr.bf16.mxu1 %v8315_v25 }
 0x341   : > { %3679 = vmatmul.mubr.bf16.gmra.mrb[248].mxu0 %v8472_v35  ;;  %4081 = vmatmul.mubr.bf16.gmra.mrb[232].mxu1 %v8331_v46 }
 0x342   : > { %4088 = vmatprep.mubr.bf16.mxu1 %v8333_v48  ;;  %4684 = vmatprep.mubr.bf16.mxu0 %v8264_v53  ;;  %v3092_v53 = vld [vmem:[#allocation3 + $0x2] sm:$0xff] }
 0x349   : > { %4089 = vmatmul.mubr.bf16.gmra.mrb[236].mxu1 %v8346_v45  ;;  %4685 = vmatmul.mubr.bf16.vlgmr.msra.gmra.mrb[252].mxu0 %v8280_v14  ;;  %v3093_v14 = vld [vmem:[#allocation3 + $0xa] sm:$0xff] }
 0x34a   : > { %4096 = vmatprep.mubr.bf16.mxu1 %v8351_v5  ;;  %4692 = vmatprep.mubr.bf16.mxu0 %v8282_v55  ;;  %v3124_v55 = vpack.c.bf16 %v3093_v14, %v3092_v53  ;;  %v4409_v14 = vpack.c.bf16 %v4392_v20, %v4391_v52 }
 0x351   : > { %4097 = vmatmul.mubr.bf16.gmra.mrb[240].mxu1 %v8364_v63  ;;  %4693 = vmatmul.mubr.bf16.gmra.mrb[0].mxu0 %v8295_v37  ;;  %v3094_v37 = vld [vmem:[#allocation3 + $0x12] sm:$0xff] }
 0x352   : > { %4104 = vmatprep.mubr.bf16.mxu1 %v8369_v27  ;;  %4700 = vmatprep.mubr.bf16.mxu0 %v8300_v13  ;;  %v3095_v13 = vld [vmem:[#allocation3 + $0x1a] sm:$0xff] }
 0x359   : > { %4105 = vmatmul.mubr.bf16.gmra.mrb[244].mxu1 %v8385_v56  ;;  %4701 = vmatmul.mubr.bf16.gmra.mrb[4].mxu0 %v8313_v6  ;;  %v3096_v6 = vld [vmem:[#allocation3 + $0x2a] sm:$0xff] }
 0x35a   : > { %4112 = vmatprep.mubr.bf16.mxu1 %v8387_v10  ;;  %4708 = vmatprep.mubr.bf16.mxu0 %v8315_v25  ;;  %v3097_v25 = vld [vmem:[#allocation3 + $0x32] sm:$0xff] }
 0x361   : > { %4113 = vmatmul.mubr.bf16.gmra.mrb[248].mxu1 %v8404_v34  ;;  %4709 = vmatmul.mubr.bf16.gmra.mrb[8].mxu0 %v8331_v46  ;;  %v3125_v46 = vpack.c.bf16 %v3095_v13, %v3094_v37 }
 0x362   : > { %4120 = vmatprep.mubr.bf16.mxu1 %v8406_v60  ;;  %4716 = vmatprep.mubr.bf16.mxu0 %v8333_v48  ;;  %v3126_v48 = vpack.c.bf16 %v3097_v25, %v3096_v6  ;;  %v3119_v6 = vld [vmem:[#allocation3 + $0x10a] sm:$0xff] }
 0x363   : > { %v4343_v25 = vld [vmem:[#allocation3 + $0x168] sm:$0xff] }
 0x369   : > { %4121 = vmatmul.mubr.bf16.gmra.mrb[252].mxu1 %v8417_v17  ;;  %4717 = vmatmul.mubr.bf16.gmra.mrb[12].mxu0 %v8346_v45  ;;  %v7011_v45 = vld [vmem:[%s8943_s4 + $0x208] sm:$0xff]  }
 0x36a   : > { %4128 = vmatprep.mubr.bf16.mxu1 %v8419_v1  ;;  %4724 = vmatprep.mubr.bf16.mxu0 %v8351_v5  ;;  %v3098_v5 = vld [vmem:[#allocation3 + $0x3a] sm:$0xff] }
 0x371   : > { %4129 = vmatmul.mubr.bf16.gmra.mrb[0].mxu1 %v8431_v59  ;;  %4725 = vmatmul.mubr.bf16.gmra.mrb[16].mxu0 %v8364_v63  ;;  %v3099_v63 = vld [vmem:[#allocation3 + $0x42] sm:$0xff] }
 0x372   : > { %4136 = vmatprep.mubr.bf16.mxu1 %v8433_v58  ;;  %4732 = vmatprep.mubr.bf16.mxu0 %v8369_v27  ;;  %v3100_v27 = vld [vmem:[#allocation3 + $0x52] sm:$0xff]  ;;  %v3127_v9 = vpack.c.bf16 %v3099_v63, %v3098_v5  ;;  %v4394_v63 = vld [vmem:[#allocation3 + $0x181] sm:$0xff] }
 0x373   : > { %v4393_v5 = vld [vmem:[#allocation3 + $0x179] sm:$0xff] }
 0x374   : > { %v4410_v41 = vpack.c.bf16 %v4394_v63, %v4393_v5 }
 0x379   : > { %4137 = vmatmul.mubr.bf16.gmra.mrb[4].mxu1 %v8447_v28  ;;  %4733 = vmatmul.mubr.bf16.gmra.mrb[20].mxu0 %v8385_v56  ;;  %v3101_v56 = vld [vmem:[#allocation3 + $0x5a] sm:$0xff] }
 0x37a   : > { %4144 = vmatprep.mubr.bf16.mxu1 %v8449_v8  ;;  %4740 = vmatprep.mubr.bf16.mxu0 %v8387_v10  ;;  %v7012_v10 = vld [vmem:[%s8943_s4 + $0x210] sm:$0xff]   ;;  %v8518_v11 = vpack.c.bf16 %v3101_v56, %v3100_v27 }
 0x381   : > { %4145 = vmatmul.mubr.bf16.gmra.mrb[8].mxu1 %v8456_v43  ;;  %4741 = vmatmul.mubr.bf16.gmra.mrb[24].mxu0 %v8404_v34  ;;  %v7014_v34 = vld [vmem:[%s8943_s4 + $0x220] sm:$0xff]  }
 0x382   : > { %6588 = vmatprep.mubr.bf16.mxu1 %v3124_v55  ;;  %4748 = vmatprep.mubr.bf16.mxu0 %v8406_v60  ;;  %v8531_v60 = vpack.c.bf16 %v3105_v33, %v3104_v3 }
 0x389   : > { %6589 = vmatmul.mubr.bf16.vlgmr.msra.gmra.mrb[172].mxu1 %v3125_v46  ;;  %4749 = vmatmul.mubr.bf16.gmra.mrb[28].mxu0 %v8417_v17  ;;  %v4344_v46 = vld [vmem:[#allocation3 + $0x170] sm:$0xff] }
 0x38a   : > { %6621 = vmatpush3.bf16.msra.mxu1 %v8445_v32  ;;  %6592 = vmatprep.mubr.bf16.mxu1 %v3126_v48  ;;  %v3120_v48 = vld [vmem:[#allocation3 + $0x11a] sm:$0xff] }
 0x38b   : > { %4756 = vmatprep.mubr.bf16.mxu0 %v8419_v1  ;;  %6622 = vmatprep.subr.bf16.mxu1 %v7011_v45  ;;  %v8543_v1 = vpack.c.bf16 %v3107_v30, %v3106_v26  ;;  %v4345_v26 = vld [vmem:[#allocation3 + $0x178] sm:$0xff]  ;;  %v4346_v30 = vld [vmem:[#allocation3 + $0x180] sm:$0xff] }
 0x38e   : > { %6623 = vmatpush3.bf16.msra.mxu1 %v7011_v45  ;;  %v3121_v45 = vld [vmem:[#allocation3 + $0x122] sm:$0xff] }
 0x38f   : > { %6624 = vmatprep.subr.bf16.mxu1 %v7012_v10 }
 0x391   : > { %6593 = vmatmul.mubr.bf16.gmra.mrb[176].mxu1 %v3127_v9  ;;  %4757 = vmatmul.mubr.bf16.gmra.mrb[32].mxu0 %v8431_v59 }
 0x392   : > { %6596 = vmatprep.mubr.bf16.mxu1 %v8518_v11  ;;  %4764 = vmatprep.mubr.bf16.mxu0 %v8433_v58  ;;  %v3110_v58 = vld [vmem:[#allocation3 + $0xb2] sm:$0xff] }
 0x393   : > { %6625 = vmatpush3.bf16.msra.mxu1 %v7012_v10  ;;  %v8558_v16 = vpack.c.bf16 %v3111_v40, %v3110_v58  ;;  %v4361_v10 = vpack.c.bf16 %v4344_v46, %v4343_v25 }
 0x394   : > { %6626 = vmatprep.subr.bf16.mxu1 %v7013_v61 }
 0x397   : > { %6627 = vmatpush3.bf16.msra.mxu1 %v7013_v61  ;;  %v8583_v61 = vpack.c.bf16 %v3121_v45, %v3120_v48 }
 0x398   : > { %6628 = vmatprep.subr.bf16.mxu1 %v7014_v34 }
 0x399   : > { %6597 = vmatmul.mubr.bf16.gmra.mrb[180].mxu1 %v8529_v36  ;;  %4765 = vmatmul.mubr.bf16.gmra.mrb[36].mxu0 %v8447_v28  ;;  %v8560_v28 = vpack.c.bf16 %v3113_v57, %v3112_v31 }
 0x39a   : > { %6600 = vmatprep.mubr.bf16.mxu1 %v8531_v60  ;;  %4772 = vmatprep.mubr.bf16.mxu0 %v8449_v8 }
 0x39b   : > { %6629 = vmatpush3.bf16.msra.mxu1 %v7014_v34  ;;  %v3122_v34 = vld [vmem:[#allocation3 + $0x12a] sm:$0xff] }
 0x39c   : > { %6630 = vmatprep.subr.bf16.mxu1 %v7015_v4  ;;  %v5964_v17 = vpop.f32.mrb[188].mxu0 }
 0x39d   : > { %v5965_v42 = vpop.f32.mrb[189].mxu0 }
 0x39e   : > { %v8547_v44 = vadd.f32 %v5965_v42, %v5964_v17  ;;  %v5967_v18 = vpop.f32.mrb[190].mxu0 }
 0x39f   : > { %6631 = vmatpush3.bf16.msra.mxu1 %v7015_v4  ;;  %v5968_v39 = vpop.f32.mrb[191].mxu0  ;;  %v3123_v4 = vld [vmem:[#allocation3 + $0x132] sm:$0xff] }
 0x3a0   : > { %6632 = vmatprep.subr.bf16.mxu1 %v7016_v49  ;;  %v8552_v59 = vadd.f32 %v5968_v39, %v5967_v18  ;;  %v8591_v7 = vpack.c.bf16 %v3123_v4, %v3122_v34 }
 0x3a1   : > { %6601 = vmatmul.mubr.bf16.gmra.mrb[184].mxu1 %v8543_v1  ;;  %4773 = vmatmul.mubr.bf16.gmra.mrb[40].mxu0 %v8456_v43  ;;  %v3115_v43 = vld [vmem:[#allocation3 + $0xe2] sm:$0xff] }
 0x3a2   : > { %6604 = vmatprep.mubr.bf16.mxu1 %v8545_v54  ;;  %4780 = vmatprep.mubr.bf16.mxu0 %v8458_v38  ;;  %v3116_v38 = vld [vmem:[#allocation3 + $0xf2] sm:$0xff]  ;;  %v8570_v22 = vpack.c.bf16 %v3115_v43, %v3114_v50 }
 0x3a3   : > { %6633 = vmatpush3.bf16.msra.mxu1 %v7016_v49  ;;  %v8572_v53 = vpack.c.bf16 %v3117_v29, %v3116_v38  ;;  %v4362_v49 = vpack.c.bf16 %v4346_v30, %v4345_v26  ;;  %v4436_v30 = vld [vmem:[#allocation3 + $0x14a] sm:$0xff] }
 0x3a4   : > { %6634 = vmatprep.subr.bf16.mxu1 %v7017_v62  ;;  %v5970_v15 = vpop.f32.mrb[192].mxu0 }
 0x3a5   : > { %v5971_v32 = vpop.f32.mrb[193].mxu0 }
 0x3a6   : > { %v8562_v8 = vadd.f32 %v5971_v32, %v5970_v15  ;;  %v5973_v21 = vpop.f32.mrb[194].mxu0 }
 0x3a7   : > { %6635 = vmatpush3.bf16.msra.mxu1 %v7017_v62  ;;  %v5974_v19 = vpop.f32.mrb[195].mxu0 }
 0x3a8   : > { %v8564_v51 = vadd.f32 %v5974_v19, %v5973_v21 }
 0x3a9   : > { %6605 = vmatmul.mubr.bf16.gmra.mrb[188].mxu1 %v8558_v16  ;;  %4781 = vmatmul.mubr.bf16.gmra.mrb[44].mxu0 %v8464_v24 }
 0x3aa   : > { %6608 = vmatprep.mubr.bf16.mxu1 %v8560_v28  ;;  %4788 = vmatprep.mubr.bf16.mxu0 %v8466_v12  ;;  %v3118_v12 = vld [vmem:[#allocation3 + $0x102] sm:$0xff] }
 0x3ab   : > { %v8581_v56 = vpack.c.bf16 %v3119_v6, %v3118_v12 }
 0x3ac   : > { %v5976_v47 = vpop.f32.mrb[196].mxu0 }
 0x3ad   : > { %v5977_v2 = vpop.f32.mrb[197].mxu0 }
 0x3ae   : > { %v8574_v55 = vadd.f32 %v5977_v2, %v5976_v47  ;;  %v5979_v24 = vpop.f32.mrb[198].mxu0 }
 0x3af   : > { %v5980_v37 = vpop.f32.mrb[199].mxu0 }
 0x3b0   : > { %v8576_v13 = vadd.f32 %v5980_v37, %v5979_v24 }
 0x3b1   : > { %6609 = vmatmul.mubr.bf16.gmra.mrb[192].mxu1 %v8570_v22  ;;  %4789 = vmatmul.mubr.bf16.gmra.mrb[48].mxu0 %v8472_v35 }
 0x3b2   : > { %6612 = vmatprep.mubr.bf16.mxu1 %v8572_v53  ;;  %4796 = vmatprep.mubr.bf16.mxu0 %v4409_v14 }
 0x3b4   : > { %v5982_v27 = vpop.f32.mrb[200].mxu0 }
 0x3b5   : > { %v5983_v9 = vpop.f32.mrb[201].mxu0 }
 0x3b6   : > { %v8585_v35 = vadd.f32 %v5983_v9, %v5982_v27  ;;  %v5985_v0 = vpop.f32.mrb[202].mxu0 }
 0x3b7   : > { %v5986_v3 = vpop.f32.mrb[203].mxu0 }
 0x3b8   : > { %v8587_v33 = vadd.f32 %v5986_v3, %v5985_v0 }
 0x3b9   : > { %6613 = vmatmul.mubr.bf16.gmra.mrb[196].mxu1 %v8581_v56  ;;  %4797 = vmatmul.mubr.bf16.gmra.mrb[52].mxu0 %v4361_v10 }
 0x3ba   : > { %6616 = vmatprep.mubr.bf16.mxu1 %v8583_v61  ;;  %4804 = vmatprep.mubr.bf16.mxu0 %v4410_v41 }
 0x3bc   : > { %v5988_v23 = vpop.f32.mrb[204].mxu0 }
 0x3bd   : > { %v5989_v17 = vpop.f32.mrb[205].mxu0 }
 0x3be   : > { %v8593_v42 = vadd.f32 %v5989_v17, %v5988_v23  ;;  %v5991_v18 = vpop.f32.mrb[206].mxu0 }
 0x3bf   : > { %v5992_v39 = vpop.f32.mrb[207].mxu0 }
 0x3c0   : > { %v8595_v62 = vadd.f32 %v5992_v39, %v5991_v18 }
 0x3c1   : > { %6617 = vmatmul.mubr.bf16.gmra.mrb[200].mxu1 %v8591_v7  ;;  %4805 = vmatmul.mubr.bf16.gmra.mrb[56].mxu0 %v4362_v49 }
 0x3c2   : > { %6636 = vmatprep.mubr.bf16.mxu1 %v8518_v11 }
 0x3c4   : > { %v5994_v58 = vpop.f32.mrb[208].mxu0 }
 0x3c5   : > { %v5995_v40 = vpop.f32.mrb[209].mxu0 }
 0x3c6   : > { %v8599_v31 = vadd.f32 %v5995_v40, %v5994_v58  ;;  %v5997_v57 = vpop.f32.mrb[210].mxu0 }
 0x3c7   : > { %v5998_v15 = vpop.f32.mrb[211].mxu0 }
 0x3c8   : > { %v8601_v32 = vadd.f32 %v5998_v15, %v5997_v57 }
 0x3c9   : > { %6637 = vmatmul.mubr.bf16.vlgmr.msra.gmra.mrb[172].mxu1 %v8529_v36 }
 0x3ca   : > { %6640 = vmatprep.mubr.bf16.mxu1 %v8531_v60 }
 0x3cc   : > { %v6000_v21 = vpop.f32.mrb[212].mxu0 }
 0x3cd   : > { %v6001_v19 = vpop.f32.mrb[213].mxu0 }
 0x3ce   : > { %v8605_v50 = vadd.f32 %v6001_v19, %v6000_v21  ;;  %v6003_v43 = vpop.f32.mrb[214].mxu0 }
 0x3cf   : > { %v6004_v38 = vpop.f32.mrb[215].mxu0 }
 0x3d0   : > { %v8607_v29 = vadd.f32 %v6004_v38, %v6003_v43  ;;  %v4437_v43 = vld [vmem:[#allocation3 + $0x152] sm:$0xff]  ;;  %v4438_v38 = vld [vmem:[#allocation3 + $0x15a] sm:$0xff] }
 0x3d1   : > { %6641 = vmatmul.mubr.bf16.gmra.mrb[176].mxu1 %v8543_v1 }
 0x3d2   : > { %6644 = vmatprep.mubr.bf16.mxu1 %v8545_v54 }
 0x3d4   : > { %v6006_v11 = vpop.f32.mrb[216].mxu0 }
 0x3d5   : > { %v6007_v52 = vpop.f32.mrb[217].mxu0 }
 0x3d6   : > { %v8611_v20 = vadd.f32 %v6007_v52, %v6006_v11  ;;  %v6009_v47 = vpop.f32.mrb[218].mxu0  ;;  %v4439_v11 = vld [vmem:[#allocation3 + $0x16a] sm:$0xff]  ;;  %v4440_v52 = vld [vmem:[#allocation3 + $0x172] sm:$0xff] }
 0x3d7   : > { %v6010_v36 = vpop.f32.mrb[219].mxu0 }
 0x3d8   : > { %v8613_v2 = vadd.f32 %v6010_v36, %v6009_v47 }
 0x3d9   : > { %6645 = vmatmul.mubr.bf16.gmra.mrb[180].mxu1 %v8558_v16 }
 0x3da   : > { %6648 = vmatprep.mubr.bf16.mxu1 %v8560_v28 }
 0x3dc   : > { %v6100_v60 = vpop.f32.mrb[204].mxu1  ;;  %v6012_v14 = vpop.f32.mrb[220].mxu0 }
 0x3dd   : > { %v6101_v24 = vpop.f32.mrb[205].mxu1  ;;  %v6013_v37 = vpop.f32.mrb[221].mxu0 }
 0x3de   : > { %v6102_v12 = vadd.f32 %v6101_v24, %v6100_v60  ;;  %v6103_v1 = vpop.f32.mrb[206].mxu1  ;;  %v8617_v6 = vadd.f32 %v6013_v37, %v6012_v14  ;;  %v6015_v54 = vpop.f32.mrb[222].mxu0  ;;  %v4456_v14 = vpack.c.bf16 %v4438_v38, %v4437_v43 }
 0x3df   : > { %v6104_v25 = vpop.f32.mrb[207].mxu1  ;;  %v6016_v46 = vpop.f32.mrb[223].mxu0 }
 0x3e0   : > { %v8620_v48 = vadd.f32 %v6102_v12, %v8547_v44  ;;  %v6105_v45 = vadd.f32 %v6104_v25, %v6103_v1  ;;  %v8622_v5 = vadd.f32 %v6016_v46, %v6015_v54  ;;  %v4457_v12 = vpack.c.bf16 %v4440_v52, %v4439_v11 }
 0x3e1   : > { %6649 = vmatmul.mubr.bf16.gmra.mrb[184].mxu1 %v8570_v22 }
 0x3e2   : > { %v8626_v16 = vadd.f32 %v6105_v45, %v8552_v59  ;;  %6652 = vmatprep.mubr.bf16.mxu1 %v8572_v53  ;;  %v4435_v53 = vld [vmem:[#allocation3 + $0x142] sm:$0xff] }
 0x3e4   : > { %v6106_v28 = vpop.f32.mrb[208].mxu1  ;;  %v6018_v63 = vpop.f32.mrb[224].mxu0 }
 0x3e5   : > { %v6107_v27 = vpop.f32.mrb[209].mxu1  ;;  %v6019_v10 = vpop.f32.mrb[225].mxu0 }
 0x3e6   : > { %v6108_v9 = vadd.f32 %v6107_v27, %v6106_v28  ;;  %v6109_v41 = vpop.f32.mrb[210].mxu1  ;;  %v8629_v0 = vadd.f32 %v6019_v10, %v6018_v63  ;;  %v6021_v44 = vpop.f32.mrb[226].mxu0  ;;  %v4441_v63 = vld [vmem:[#allocation3 + $0x17a] sm:$0xff]  ;;  %v4442_v27 = vld [vmem:[#allocation3 + $0x182] sm:$0xff] }
 0x3e7   : > { %v6110_v3 = vpop.f32.mrb[211].mxu1  ;;  %v6022_v34 = vpop.f32.mrb[227].mxu0 }
 0x3e8   : > { %v8632_v4 = vadd.f32 %v6108_v9, %v8562_v8  ;;  %v6111_v22 = vadd.f32 %v6110_v3, %v6109_v41  ;;  %v8634_v26 = vadd.f32 %v6022_v34, %v6021_v44  ;;  %v4455_v8 = vpack.c.bf16 %v4436_v30, %v4435_v53 }
 0x3e9   : > { %6653 = vmatmul.mubr.bf16.gmra.mrb[188].mxu1 %v8581_v56  ;;  %v4458_v44 = vpack.c.bf16 %v4442_v27, %v4441_v63 }
 0x3ea   : > { %v8638_v59 = vadd.f32 %v6111_v22, %v8564_v51  ;;  %6656 = vmatprep.mubr.bf16.mxu1 %v8583_v61 }
 0x3ec   : > { %v6112_v23 = vpop.f32.mrb[212].mxu1  ;;  %v6024_v49 = vpop.f32.mrb[228].mxu0 }
 0x3ed   : > { %v6113_v17 = vpop.f32.mrb[213].mxu1  ;;  %v6025_v18 = vpop.f32.mrb[229].mxu0 }
 0x3ee   : > { %v6114_v39 = vadd.f32 %v6113_v17, %v6112_v23  ;;  %v6115_v58 = vpop.f32.mrb[214].mxu1  ;;  %v8641_v40 = vadd.f32 %v6025_v18, %v6024_v49  ;;  %v6027_v57 = vpop.f32.mrb[230].mxu0 }
 0x3ef   : > { %v6116_v15 = vpop.f32.mrb[215].mxu1  ;;  %v6028_v21 = vpop.f32.mrb[231].mxu0 }
 0x3f0   : > { %v8644_v56 = vadd.f32 %v6114_v39, %v8574_v55  ;;  %v6117_v51 = vadd.f32 %v6116_v15, %v6115_v58  ;;  %v8646_v19 = vadd.f32 %v6028_v21, %v6027_v57 }
 0x3f1   : > { %6657 = vmatmul.mubr.bf16.gmra.mrb[192].mxu1 %v8591_v7 }
 0x3f2   : > { %v8650_v61 = vadd.f32 %v6117_v51, %v8576_v13  ;;  %6660 = vmatprep.mubr.bf16.mxu1 %v4455_v8 }
 0x3f4   : > { %v6118_v47 = vpop.f32.mrb[216].mxu1  ;;  %v6030_v36 = vpop.f32.mrb[232].mxu0 }
 0x3f5   : > { %v6119_v60 = vpop.f32.mrb[217].mxu1  ;;  %v6031_v24 = vpop.f32.mrb[233].mxu0 }
 0x3f6   : > { %v6120_v55 = vadd.f32 %v6119_v60, %v6118_v47  ;;  %v6121_v37 = vpop.f32.mrb[218].mxu1  ;;  %v8652_v1 = vadd.f32 %v6031_v24, %v6030_v36  ;;  %v6033_v54 = vpop.f32.mrb[234].mxu0 }
 0x3f7   : > { %v6122_v7 = vpop.f32.mrb[219].mxu1  ;;  %v6034_v25 = vpop.f32.mrb[235].mxu0 }
 0x3f8   : > { %v8655_v13 = vadd.f32 %v6120_v55, %v8585_v35  ;;  %v6123_v46 = vadd.f32 %v6122_v7, %v6121_v37  ;;  %v8657_v45 = vadd.f32 %v6034_v25, %v6033_v54 }
 0x3f9   : > { %6661 = vmatmul.mubr.bf16.gmra.mrb[196].mxu1 %v4456_v14 }
 0x3fa   : > { %v8660_v28 = vadd.f32 %v6123_v46, %v8587_v33  ;;  %6664 = vmatprep.mubr.bf16.mxu1 %v4457_v12 }
 0x3fc   : > { %v6124_v10 = vpop.f32.mrb[220].mxu1  ;;  %v6036_v9 = vpop.f32.mrb[236].mxu0 }
 0x3fd   : > { %v6125_v41 = vpop.f32.mrb[221].mxu1  ;;  %v6037_v3 = vpop.f32.mrb[237].mxu0 }
 0x3fe   : > { %v6126_v34 = vadd.f32 %v6125_v41, %v6124_v10  ;;  %v6127_v22 = vpop.f32.mrb[222].mxu1  ;;  %v8662_v53 = vadd.f32 %v6037_v3, %v6036_v9  ;;  %v6039_v35 = vpop.f32.mrb[238].mxu0 }
 0x3ff   : > { %v6128_v30 = vpop.f32.mrb[223].mxu1  ;;  %v6040_v23 = vpop.f32.mrb[239].mxu0 }
 0x400   : > { %v8665_v49 = vadd.f32 %v6126_v34, %v8593_v42  ;;  %v6129_v33 = vadd.f32 %v6128_v30, %v6127_v22  ;;  %v8667_v17 = vadd.f32 %v6040_v23, %v6039_v35 }
 0x401   : > { %6665 = vmatmul.mubr.bf16.gmra.mrb[200].mxu1 %v4458_v44 }
 0x402   : > { %v8670_v18 = vadd.f32 %v6129_v33, %v8595_v62 }
 0x404   : > { %v6130_v39 = vpop.f32.mrb[224].mxu1  ;;  %v6042_v58 = vpop.f32.mrb[240].mxu0 }
 0x405   : > { %v6131_v8 = vpop.f32.mrb[225].mxu1  ;;  %v6043_v57 = vpop.f32.mrb[241].mxu0 }
 0x406   : > { %v6132_v15 = vadd.f32 %v6131_v8, %v6130_v39  ;;  %v6133_v21 = vpop.f32.mrb[226].mxu1  ;;  %v8672_v51 = vadd.f32 %v6043_v57, %v6042_v58  ;;  %v6045_v43 = vpop.f32.mrb[242].mxu0 }
 0x407   : > { %v6134_v38 = vpop.f32.mrb[227].mxu1  ;;  %v6046_v11 = vpop.f32.mrb[243].mxu0 }
 0x408   : > { %v8675_v42 = vadd.f32 %v6132_v15, %v8599_v31  ;;  %v6135_v52 = vadd.f32 %v6134_v38, %v6133_v21  ;;  %v8677_v47 = vadd.f32 %v6046_v11, %v6045_v43 }
 0x40a   : > { %v8680_v62 = vadd.f32 %v6135_v52, %v8601_v32 }
 0x40c   : > { %v6136_v36 = vpop.f32.mrb[228].mxu1  ;;  %v6048_v60 = vpop.f32.mrb[244].mxu0 }
 0x40d   : > { %v6137_v14 = vpop.f32.mrb[229].mxu1  ;;  %v6049_v24 = vpop.f32.mrb[245].mxu0 }
 0x40e   : > { %v6138_v55 = vadd.f32 %v6137_v14, %v6136_v36  ;;  %v6139_v37 = vpop.f32.mrb[230].mxu1  ;;  %v8682_v12 = vadd.f32 %v6049_v24, %v6048_v60  ;;  %v6051_v54 = vpop.f32.mrb[246].mxu0 }
 0x40f   : > { %v6140_v7 = vpop.f32.mrb[231].mxu1  ;;  %v6052_v25 = vpop.f32.mrb[247].mxu0 }
 0x410   : > { %v8685_v31 = vadd.f32 %v6138_v55, %v8605_v50  ;;  %v6141_v46 = vadd.f32 %v6140_v7, %v6139_v37  ;;  %v8687_v63 = vadd.f32 %v6052_v25, %v6051_v54 }
 0x412   : > { %v8690_v32 = vadd.f32 %v6141_v46, %v8607_v29 }
 0x414   : > { %v6142_v27 = vpop.f32.mrb[232].mxu1  ;;  %v6054_v10 = vpop.f32.mrb[248].mxu0 }
 0x415   : > { %v6143_v9 = vpop.f32.mrb[233].mxu1  ;;  %v6055_v41 = vpop.f32.mrb[249].mxu0 }
 0x416   : > { %v6144_v44 = vadd.f32 %v6143_v9, %v6142_v27  ;;  %v6145_v3 = vpop.f32.mrb[234].mxu1  ;;  %v8692_v34 = vadd.f32 %v6055_v41, %v6054_v10  ;;  %v6057_v22 = vpop.f32.mrb[250].mxu0 }
 0x417   : > { %v6146_v35 = vpop.f32.mrb[235].mxu1  ;;  %v6058_v30 = vpop.f32.mrb[251].mxu0 }
 0x418   : > { %v8695_v50 = vadd.f32 %v6144_v44, %v8611_v20  ;;  %v6147_v23 = vadd.f32 %v6146_v35, %v6145_v3  ;;  %v8697_v33 = vadd.f32 %v6058_v30, %v6057_v22 }
 0x41a   : > { %v8700_v29 = vadd.f32 %v6147_v23, %v8613_v2 }
 0x41c   : > { %v6148_v39 = vpop.f32.mrb[236].mxu1  ;;  %v6236_v58 = vpop.f32.mrb[252].mxu0 }
 0x41d   : > { %v6149_v8 = vpop.f32.mrb[237].mxu1  ;;  %v6237_v57 = vpop.f32.mrb[253].mxu0 }
 0x41e   : > { %v6150_v15 = vadd.f32 %v6149_v8, %v6148_v39  ;;  %v6238_v21 = vadd.f32 %v6237_v57, %v6236_v58  ;;  %v6151_v43 = vpop.f32.mrb[238].mxu1  ;;  %v6239_v38 = vpop.f32.mrb[254].mxu0 }
 0x41f   : > { %v6152_v11 = vpop.f32.mrb[239].mxu1  ;;  %v6240_v52 = vpop.f32.mrb[255].mxu0 }
 0x420   : > { %v8703_v36 = vadd.f32 %v6150_v15, %v8617_v6  ;;  %v6153_v20 = vadd.f32 %v6152_v11, %v6151_v43  ;;  %v6241_v60 = vadd.f32 %v6240_v52, %v6239_v38  ;;  %v8706_v14 = vadd.f32 %v8620_v48, %v6238_v21 }
 0x422   : > { %v8709_v2 = vadd.f32 %v6153_v20, %v8622_v5  ;;  %v8712_v24 = vadd.f32 %v8626_v16, %v6241_v60 }
 0x424   : > { %v6154_v55 = vpop.f32.mrb[240].mxu1  ;;  %v6242_v37 = vpop.f32.mrb[0].mxu0 }
 0x425   : > { %v6155_v54 = vpop.f32.mrb[241].mxu1  ;;  %v6243_v7 = vpop.f32.mrb[1].mxu0 }
 0x426   : > { %v6156_v25 = vadd.f32 %v6155_v54, %v6154_v55  ;;  %v6244_v46 = vadd.f32 %v6243_v7, %v6242_v37  ;;  %v6157_v27 = vpop.f32.mrb[242].mxu1  ;;  %v6245_v6 = vpop.f32.mrb[2].mxu0 }
 0x427   : > { %v6158_v10 = vpop.f32.mrb[243].mxu1  ;;  %v6246_v9 = vpop.f32.mrb[3].mxu0 }
 0x428   : > { %v8715_v41 = vadd.f32 %v6156_v25, %v8629_v0  ;;  %v6159_v48 = vadd.f32 %v6158_v10, %v6157_v27  ;;  %v6247_v44 = vadd.f32 %v6246_v9, %v6245_v6  ;;  %v8718_v5 = vadd.f32 %v8632_v4, %v6244_v46 }
 0x42a   : > { %v8721_v16 = vadd.f32 %v6159_v48, %v8634_v26  ;;  %v8724_v3 = vadd.f32 %v8638_v59, %v6247_v44 }
 0x42c   : > { %v6160_v22 = vpop.f32.mrb[244].mxu1  ;;  %v6248_v35 = vpop.f32.mrb[4].mxu0 }
 0x42d   : > { %v6161_v30 = vpop.f32.mrb[245].mxu1  ;;  %v6249_v23 = vpop.f32.mrb[5].mxu0 }
 0x42e   : > { %v6162_v39 = vadd.f32 %v6161_v30, %v6160_v22  ;;  %v6250_v58 = vadd.f32 %v6249_v23, %v6248_v35  ;;  %v6163_v8 = vpop.f32.mrb[246].mxu1  ;;  %v6251_v0 = vpop.f32.mrb[6].mxu0 }
 0x42f   : > { %v6164_v57 = vpop.f32.mrb[247].mxu1  ;;  %v6252_v15 = vpop.f32.mrb[7].mxu0 }
 0x430   : > { %v8727_v21 = vadd.f32 %v6162_v39, %v8641_v40  ;;  %v6165_v4 = vadd.f32 %v6164_v57, %v6163_v8  ;;  %v6253_v43 = vadd.f32 %v6252_v15, %v6251_v0  ;;  %v8730_v26 = vadd.f32 %v8644_v56, %v6250_v58 }
 0x432   : > { %v8733_v59 = vadd.f32 %v6165_v4, %v8646_v19  ;;  %v8736_v38 = vadd.f32 %v8650_v61, %v6253_v43 }
 0x434   : > { %v6166_v11 = vpop.f32.mrb[248].mxu1  ;;  %v6254_v52 = vpop.f32.mrb[8].mxu0 }
 0x435   : > { %v6167_v20 = vpop.f32.mrb[249].mxu1  ;;  %v6255_v60 = vpop.f32.mrb[9].mxu0 }
 0x436   : > { %v6168_v55 = vadd.f32 %v6167_v20, %v6166_v11  ;;  %v6256_v37 = vadd.f32 %v6255_v60, %v6254_v52  ;;  %v6169_v54 = vpop.f32.mrb[250].mxu1  ;;  %v6257_v40 = vpop.f32.mrb[10].mxu0 }
 0x437   : > { %v6170_v7 = vpop.f32.mrb[251].mxu1  ;;  %v6258_v25 = vpop.f32.mrb[11].mxu0 }
 0x438   : > { %v8739_v46 = vadd.f32 %v6168_v55, %v8652_v1  ;;  %v6171_v56 = vadd.f32 %v6170_v7, %v6169_v54  ;;  %v6259_v27 = vadd.f32 %v6258_v25, %v6257_v40  ;;  %v8742_v19 = vadd.f32 %v8655_v13, %v6256_v37 }
 0x43a   : > { %v8745_v61 = vadd.f32 %v6171_v56, %v8657_v45  ;;  %v8748_v6 = vadd.f32 %v8660_v28, %v6259_v27 }
 0x43c   : > { %v6172_v10 = vpop.f32.mrb[252].mxu1  ;;  %v6260_v9 = vpop.f32.mrb[12].mxu0 }
 0x43d   : > { %v6173_v48 = vpop.f32.mrb[253].mxu1  ;;  %v6261_v44 = vpop.f32.mrb[13].mxu0 }
 0x43e   : > { %v6174_v22 = vadd.f32 %v6173_v48, %v6172_v10  ;;  %v6262_v35 = vadd.f32 %v6261_v44, %v6260_v9  ;;  %v6175_v30 = vpop.f32.mrb[254].mxu1  ;;  %v6263_v1 = vpop.f32.mrb[14].mxu0 }
 0x43f   : > { %v6176_v23 = vpop.f32.mrb[255].mxu1  ;;  %v6264_v39 = vpop.f32.mrb[15].mxu0 }
 0x440   : > { %v8751_v58 = vadd.f32 %v6174_v22, %v8662_v53  ;;  %v6177_v13 = vadd.f32 %v6176_v23, %v6175_v30  ;;  %v6265_v8 = vadd.f32 %v6264_v39, %v6263_v1  ;;  %v8754_v45 = vadd.f32 %v8665_v49, %v6262_v35 }
 0x442   : > { %v8757_v28 = vadd.f32 %v6177_v13, %v8667_v17  ;;  %v8760_v0 = vadd.f32 %v8670_v18, %v6265_v8 }
 0x444   : > { %v6178_v57 = vpop.f32.mrb[0].mxu1  ;;  %v6266_v15 = vpop.f32.mrb[16].mxu0 }
 0x445   : > { %v6179_v4 = vpop.f32.mrb[1].mxu1  ;;  %v6267_v43 = vpop.f32.mrb[17].mxu0 }
 0x446   : > { %v6180_v11 = vadd.f32 %v6179_v4, %v6178_v57  ;;  %v6268_v52 = vadd.f32 %v6267_v43, %v6266_v15  ;;  %v6181_v20 = vpop.f32.mrb[2].mxu1  ;;  %v6269_v53 = vpop.f32.mrb[18].mxu0 }
 0x447   : > { %v6182_v60 = vpop.f32.mrb[3].mxu1  ;;  %v6270_v55 = vpop.f32.mrb[19].mxu0 }
 0x448   : > { %v8763_v37 = vadd.f32 %v6180_v11, %v8672_v51  ;;  %v6183_v49 = vadd.f32 %v6182_v60, %v6181_v20  ;;  %v6271_v54 = vadd.f32 %v6270_v55, %v6269_v53  ;;  %v8766_v17 = vadd.f32 %v8675_v42, %v6268_v52 }
 0x44a   : > { %v8769_v18 = vadd.f32 %v6183_v49, %v8677_v47  ;;  %v8772_v40 = vadd.f32 %v8680_v62, %v6271_v54 }
 0x44c   : > { %v6184_v7 = vpop.f32.mrb[4].mxu1  ;;  %v6272_v25 = vpop.f32.mrb[20].mxu0 }
 0x44d   : > { %v6185_v56 = vpop.f32.mrb[5].mxu1  ;;  %v6273_v27 = vpop.f32.mrb[21].mxu0 }
 0x44e   : > { %v6186_v10 = vadd.f32 %v6185_v56, %v6184_v7  ;;  %v6274_v9 = vadd.f32 %v6273_v27, %v6272_v25  ;;  %v6187_v48 = vpop.f32.mrb[6].mxu1  ;;  %v6275_v51 = vpop.f32.mrb[22].mxu0 }
 0x44f   : > { %v6188_v44 = vpop.f32.mrb[7].mxu1  ;;  %v6276_v22 = vpop.f32.mrb[23].mxu0 }
 0x450   : > { %v8775_v35 = vadd.f32 %v6186_v10, %v8682_v12  ;;  %v6189_v42 = vadd.f32 %v6188_v44, %v6187_v48  ;;  %v6277_v30 = vadd.f32 %v6276_v22, %v6275_v51  ;;  %v8778_v47 = vadd.f32 %v8685_v31, %v6274_v9 }
 0x452   : > { %v8781_v62 = vadd.f32 %v6189_v42, %v8687_v63  ;;  %v8784_v1 = vadd.f32 %v8690_v32, %v6277_v30 }
 0x454   : > { %v6190_v23 = vpop.f32.mrb[8].mxu1  ;;  %v6278_v39 = vpop.f32.mrb[24].mxu0 }
 0x455   : > { %v6191_v13 = vpop.f32.mrb[9].mxu1  ;;  %v6279_v8 = vpop.f32.mrb[25].mxu0 }
 0x456   : > { %v6192_v57 = vadd.f32 %v6191_v13, %v6190_v23  ;;  %v6280_v15 = vadd.f32 %v6279_v8, %v6278_v39  ;;  %v6193_v4 = vpop.f32.mrb[10].mxu1  ;;  %v6281_v12 = vpop.f32.mrb[26].mxu0 }
 0x457   : > { %v6194_v43 = vpop.f32.mrb[11].mxu1  ;;  %v6282_v11 = vpop.f32.mrb[27].mxu0 }
 0x458   : > { %v8787_v52 = vadd.f32 %v6192_v57, %v8692_v34  ;;  %v6195_v31 = vadd.f32 %v6194_v43, %v6193_v4  ;;  %v6283_v20 = vadd.f32 %v6282_v11, %v6281_v12  ;;  %v8790_v63 = vadd.f32 %v8695_v50, %v6280_v15 }
 0x45a   : > { %v8793_v32 = vadd.f32 %v6195_v31, %v8697_v33  ;;  %v8796_v53 = vadd.f32 %v8700_v29, %v6283_v20 }
 0x45c   : > { %v6284_v60 = vpop.f32.mrb[28].mxu0 }
 0x45d   : > { %v6285_v55 = vpop.f32.mrb[29].mxu0 }
 0x45e   : > { %v6286_v49 = vadd.f32 %v6285_v55, %v6284_v60  ;;  %v6287_v54 = vpop.f32.mrb[30].mxu0 }
 0x45f   : > { %v6288_v7 = vpop.f32.mrb[31].mxu0 }
 0x460   : > { %v6289_v25 = vadd.f32 %v6288_v7, %v6287_v54  ;;  %v8799_v34 = vadd.f32 %v8703_v36, %v6286_v49 }
 0x462   : > { %v8802_v56 = vadd.f32 %v8709_v2, %v6289_v25 }
 0x464   : > { %v6290_v50 = vpop.f32.mrb[32].mxu0 }
 0x465   : > { %v6291_v27 = vpop.f32.mrb[33].mxu0 }
 0x466   : > { %v6292_v10 = vadd.f32 %v6291_v27, %v6290_v50  ;;  %v6293_v33 = vpop.f32.mrb[34].mxu0 }
 0x467   : > { %v6294_v9 = vpop.f32.mrb[35].mxu0 }
 0x468   : > { %v6295_v48 = vadd.f32 %v6294_v9, %v6293_v33  ;;  %v8805_v29 = vadd.f32 %v8715_v41, %v6292_v10 }
 0x46a   : > { %v8808_v51 = vadd.f32 %v8721_v16, %v6295_v48 }
 0x46c   : > { %v6296_v44 = vpop.f32.mrb[36].mxu0 }
 0x46d   : > { %v6297_v22 = vpop.f32.mrb[37].mxu0 }
 0x46e   : > { %v6298_v42 = vadd.f32 %v6297_v22, %v6296_v44  ;;  %v6299_v36 = vpop.f32.mrb[38].mxu0 }
 0x46f   : > { %v6300_v30 = vpop.f32.mrb[39].mxu0 }
 0x470   : > { %v6301_v23 = vadd.f32 %v6300_v30, %v6299_v36  ;;  %v8811_v2 = vadd.f32 %v8727_v21, %v6298_v42 }
 0x472   : > { %v8814_v39 = vadd.f32 %v8733_v59, %v6301_v23 }
 0x474   : > { %v6302_v13 = vpop.f32.mrb[40].mxu0 }
 0x475   : > { %v6303_v8 = vpop.f32.mrb[41].mxu0 }
 0x476   : > { %v6304_v57 = vadd.f32 %v6303_v8, %v6302_v13  ;;  %v6305_v41 = vpop.f32.mrb[42].mxu0 }
 0x477   : > { %v6306_v15 = vpop.f32.mrb[43].mxu0 }
 0x478   : > { %v6307_v4 = vadd.f32 %v6306_v15, %v6305_v41  ;;  %v8817_v16 = vadd.f32 %v8739_v46, %v6304_v57 }
 0x47a   : > { %v8820_v12 = vadd.f32 %v8745_v61, %v6307_v4 }
 0x47c   : > { %v6308_v43 = vpop.f32.mrb[44].mxu0 }
 0x47d   : > { %v6309_v11 = vpop.f32.mrb[45].mxu0 }
 0x47e   : > { %v6310_v31 = vadd.f32 %v6309_v11, %v6308_v43  ;;  %v6311_v21 = vpop.f32.mrb[46].mxu0 }
 0x47f   : > { %v6312_v20 = vpop.f32.mrb[47].mxu0 }
 0x480   : > { %v6313_v60 = vadd.f32 %v6312_v20, %v6311_v21  ;;  %v8823_v59 = vadd.f32 %v8751_v58, %v6310_v31 }
 0x482   : > { %v8826_v55 = vadd.f32 %v8757_v28, %v6313_v60 }
 0x484   : > { %v6314_v49 = vpop.f32.mrb[48].mxu0 }
 0x485   : > { %v6315_v54 = vpop.f32.mrb[49].mxu0 }
 0x486   : > { %v6316_v7 = vadd.f32 %v6315_v54, %v6314_v49  ;;  %v6317_v46 = vpop.f32.mrb[50].mxu0 }
 0x487   : > { %v6318_v25 = vpop.f32.mrb[51].mxu0 }
 0x488   : > { %v6319_v50 = vadd.f32 %v6318_v25, %v6317_v46  ;;  %v8829_v61 = vadd.f32 %v8763_v37, %v6316_v7 }
 0x48a   : > { %v8832_v27 = vadd.f32 %v8769_v18, %v6319_v50 }
 0x48c   : > { %v6320_v10 = vpop.f32.mrb[52].mxu0 }
 0x48d   : > { %v6321_v33 = vpop.f32.mrb[53].mxu0 }
 0x48e   : > { %v6322_v9 = vadd.f32 %v6321_v33, %v6320_v10  ;;  %v6323_v58 = vpop.f32.mrb[54].mxu0 }
 0x48f   : > { %v6324_v48 = vpop.f32.mrb[55].mxu0 }
 0x490   : > { %v6325_v44 = vadd.f32 %v6324_v48, %v6323_v58  ;;  %v8835_v28 = vadd.f32 %v8775_v35, %v6322_v9 }
 0x492   : > { %v8838_v22 = vadd.f32 %v8781_v62, %v6325_v44  ;;  %v8850_v62 = vld [vmem:[%s8944_s5] ss:$0 sm:$0xff] }
 0x494   : > { %v6326_v42 = vpop.f32.mrb[56].mxu0 }
 0x495   : > { %v6327_v36 = vpop.f32.mrb[57].mxu0 }
 0x496   : > { %v6328_v30 = vadd.f32 %v6327_v36, %v6326_v42  ;;  %v6329_v37 = vpop.f32.mrb[58].mxu0 }
 0x497   : > { %v6330_v23 = vpop.f32.mrb[59].mxu0 }
 0x498   : > { %v6331_v13 = vadd.f32 %v6330_v23, %v6329_v37  ;;  %v8841_v18 = vadd.f32 %v8787_v52, %v6328_v30 }
 0x49a   : > { %v8844_v8 = vadd.f32 %v8793_v32, %v6331_v13 }
 0x49c   : > { %v6638_v57 = vpop.f32.mrb[172].mxu1 }
 0x49d   : > { %v6702_v41 = vadd.f32 %v8718_v5, %v6638_v57  ;;  %v4847_v35 = vpop.f32.mrb[173].mxu1 }
 0x49e   : > { %v6705_v15 = vadd.f32 %v8706_v14, %v4847_v35  ;;  %v6639_v4 = vpop.f32.mrb[174].mxu1 }
 0x49f   : > { %v6708_v52 = vadd.f32 %v8724_v3, %v6639_v4  ;;  %v4850_v43 = vpop.f32.mrb[175].mxu1  ;;  %v5015_v11 = vadd.f32 %v6702_v41, %v8850_v62 }
 0x4a0   : > { %v6711_v32 = vadd.f32 %v8712_v24, %v4850_v43  ;;  %v5013_v31 = vadd.f32 %v6705_v15, %v8850_v62 }
 0x4a1   : > { %v5016_v5 = vadd.f32 %v6708_v52, %v8850_v62 }
 0x4a2   : > { %v5014_v21 = vadd.f32 %v6711_v32, %v8850_v62 }
 0x4a3   : > { %v5775_v20 = vpack.c.bf16 %v5016_v5, %v5015_v11 }
 0x4a4   : > { %v5770_v60 = vpack.c.bf16 %v5014_v21, %v5013_v31  ;;  %v5205_v49 = vadd.f32 %v5014_v21, %v5013_v31  ;;  %v6642_v54 = vpop.f32.mrb[176].mxu1 }
 0x4a5   : > { %5849 = vst [vmem:[%s7119_s27 + $0x8] sm:$0xff] %v5775_v20   ;;  %v6714_v14 = vadd.f32 %v8742_v19, %v6642_v54  ;;  %v4863_v7 = vpop.f32.mrb[177].mxu1 }
 0x4a6   : > { %5771 = vst [vmem:[%s7119_s27] sm:$0xff] %v5770_v60   ;;  %v5206_v3 = vadd.f32 %v5205_v49, %v5015_v11  ;;  %v6717_v24 = vadd.f32 %v8730_v26, %v4863_v7  ;;  %v6643_v46 = vpop.f32.mrb[178].mxu1 }
 0x4a7   : > { %v6720_v25 = vadd.f32 %v8748_v6, %v6643_v46  ;;  %v4866_v50 = vpop.f32.mrb[179].mxu1  ;;  %v5019_v58 = vadd.f32 %v6714_v14, %v8850_v62 }
 0x4a8   : > { %v5017_v10 = vadd.f32 %v6717_v24, %v8850_v62  ;;  %v5207_v33 = vadd.f32 %v5206_v3, %v5016_v5  ;;  %v6723_v9 = vadd.f32 %v8736_v38, %v4866_v50 }
 0x4a9   : > { %v5020_v19 = vadd.f32 %v6720_v25, %v8850_v62 }
 0x4aa   : > { %v5208_v48 = vadd.f32 %v5207_v33, %v5017_v10  ;;  %v5018_v44 = vadd.f32 %v6723_v9, %v8850_v62 }
 0x4ab   : > { %v5785_v42 = vpack.c.bf16 %v5020_v19, %v5019_v58 }
 0x4ac   : > { %v5780_v36 = vpack.c.bf16 %v5018_v44, %v5017_v10  ;;  %v5209_v26 = vadd.f32 %v5208_v48, %v5018_v44  ;;  %v6646_v30 = vpop.f32.mrb[180].mxu1 }
 0x4ad   : > { %5851 = vst [vmem:[%s7119_s27 + $0x18] sm:$0xff] %v5785_v42   ;;  %v6726_v6 = vadd.f32 %v8766_v17, %v6646_v30  ;;  %v4879_v37 = vpop.f32.mrb[181].mxu1 }
 0x4ae   : > { %5850 = vst [vmem:[%s7119_s27 + $0x10] sm:$0xff] %v5780_v36   ;;  %v5210_v23 = vadd.f32 %v5209_v26, %v5019_v58  ;;  %v6729_v38 = vadd.f32 %v8754_v45, %v4879_v37  ;;  %v6647_v13 = vpop.f32.mrb[182].mxu1 }
 0x4af   : > { %v6732_v57 = vadd.f32 %v8772_v40, %v6647_v13  ;;  %v4882_v41 = vpop.f32.mrb[183].mxu1  ;;  %v5023_v52 = vadd.f32 %v6726_v6, %v8850_v62 }
 0x4b0   : > { %v5021_v35 = vadd.f32 %v6729_v38, %v8850_v62  ;;  %v5211_v15 = vadd.f32 %v5210_v23, %v5020_v19  ;;  %v6735_v4 = vadd.f32 %v8760_v0, %v4882_v41 }
 0x4b1   : > { %v5024_v17 = vadd.f32 %v6732_v57, %v8850_v62 }
 0x4b2   : > { %v5212_v43 = vadd.f32 %v5211_v15, %v5021_v35  ;;  %v5022_v32 = vadd.f32 %v6735_v4, %v8850_v62 }
 0x4b3   : > { %v5795_v11 = vpack.c.bf16 %v5024_v17, %v5023_v52 }
 0x4b4   : > { %v5790_v5 = vpack.c.bf16 %v5022_v32, %v5021_v35  ;;  %v5213_v45 = vadd.f32 %v5212_v43, %v5022_v32  ;;  %v6650_v31 = vpop.f32.mrb[184].mxu1 }
 0x4b5   : > { %5853 = vst [vmem:[%s7119_s27 + $0x28] sm:$0xff] %v5795_v11   ;;  %v6738_v40 = vadd.f32 %v8790_v63, %v6650_v31  ;;  %v4895_v21 = vpop.f32.mrb[185].mxu1 }
 0x4b6   : > { %5852 = vst [vmem:[%s7119_s27 + $0x20] sm:$0xff] %v5790_v5   ;;  %v5214_v20 = vadd.f32 %v5213_v45, %v5023_v52  ;;  %v6741_v0 = vadd.f32 %v8778_v47, %v4895_v21  ;;  %v6651_v60 = vpop.f32.mrb[186].mxu1 }
 0x4b7   : > { %v6744_v49 = vadd.f32 %v8796_v53, %v6651_v60  ;;  %v4898_v54 = vpop.f32.mrb[187].mxu1  ;;  %v5027_v24 = vadd.f32 %v6738_v40, %v8850_v62 }
 0x4b8   : > { %v5025_v14 = vadd.f32 %v6741_v0, %v8850_v62  ;;  %v5215_v7 = vadd.f32 %v5214_v20, %v5024_v17  ;;  %v6747_v3 = vadd.f32 %v8784_v1, %v4898_v54 }
 0x4b9   : > { %v5028_v63 = vadd.f32 %v6744_v49, %v8850_v62 }
 0x4ba   : > { %v5216_v46 = vadd.f32 %v5215_v7, %v5025_v14  ;;  %v5026_v25 = vadd.f32 %v6747_v3, %v8850_v62 }
 0x4bb   : > { %v5805_v50 = vpack.c.bf16 %v5028_v63, %v5027_v24 }
 0x4bc   : > { %v5800_v10 = vpack.c.bf16 %v5026_v25, %v5025_v14  ;;  %v5217_v47 = vadd.f32 %v5216_v46, %v5026_v25  ;;  %v6654_v33 = vpop.f32.mrb[188].mxu1 }
 0x4bd   : > { %5855 = vst [vmem:[%s7119_s27 + $0x38] sm:$0xff] %v5805_v50   ;;  %v6750_v53 = vadd.f32 %v8805_v29, %v6654_v33  ;;  %v4911_v9 = vpop.f32.mrb[189].mxu1 }
 0x4be   : > { %5854 = vst [vmem:[%s7119_s27 + $0x30] sm:$0xff] %v5800_v10   ;;  %v5218_v58 = vadd.f32 %v5217_v47, %v5027_v24  ;;  %v6753_v1 = vadd.f32 %v8799_v34, %v4911_v9  ;;  %v6655_v19 = vpop.f32.mrb[190].mxu1 }
 0x4bf   : > { %v6756_v48 = vadd.f32 %v8808_v51, %v6655_v19  ;;  %v4914_v44 = vpop.f32.mrb[191].mxu1  ;;  %v5031_v30 = vadd.f32 %v6750_v53, %v8850_v62 }
 0x4c0   : > { %v5029_v42 = vadd.f32 %v6753_v1, %v8850_v62  ;;  %v5219_v36 = vadd.f32 %v5218_v58, %v5028_v63  ;;  %v6759_v26 = vadd.f32 %v8802_v56, %v4914_v44 }
 0x4c1   : > { %v5032_v29 = vadd.f32 %v6756_v48, %v8850_v62 }
 0x4c2   : > { %v5220_v6 = vadd.f32 %v5219_v36, %v5029_v42  ;;  %v5030_v37 = vadd.f32 %v6759_v26, %v8850_v62 }
 0x4c3   : > { %v5815_v23 = vpack.c.bf16 %v5032_v29, %v5031_v30 }
 0x4c4   : > { %v5810_v38 = vpack.c.bf16 %v5030_v37, %v5029_v42  ;;  %v5221_v34 = vadd.f32 %v5220_v6, %v5030_v37  ;;  %v6658_v13 = vpop.f32.mrb[192].mxu1 }
 0x4c5   : > { %5857 = vst [vmem:[%s7119_s27 + $0x48] sm:$0xff] %v5815_v23   ;;  %v6762_v51 = vadd.f32 %v8817_v16, %v6658_v13  ;;  %v4927_v57 = vpop.f32.mrb[193].mxu1 }
 0x4c6   : > { %5856 = vst [vmem:[%s7119_s27 + $0x40] sm:$0xff] %v5810_v38   ;;  %v5222_v41 = vadd.f32 %v5221_v34, %v5031_v30  ;;  %v6765_v56 = vadd.f32 %v8811_v2, %v4927_v57  ;;  %v6659_v35 = vpop.f32.mrb[194].mxu1 }
 0x4c7   : > { %v6768_v15 = vadd.f32 %v8820_v12, %v6659_v35  ;;  %v4930_v4 = vpop.f32.mrb[195].mxu1  ;;  %v5035_v32 = vadd.f32 %v6762_v51, %v8850_v62 }
 0x4c8   : > { %v5033_v52 = vadd.f32 %v6765_v56, %v8850_v62  ;;  %v5223_v17 = vadd.f32 %v5222_v41, %v5032_v29  ;;  %v6771_v43 = vadd.f32 %v8814_v39, %v4930_v4 }
 0x4c9   : > { %v5036_v16 = vadd.f32 %v6768_v15, %v8850_v62 }
 0x4ca   : > { %v5224_v11 = vadd.f32 %v5223_v17, %v5033_v52  ;;  %v5034_v5 = vadd.f32 %v6771_v43, %v8850_v62 }
 0x4cb   : > { %v5825_v45 = vpack.c.bf16 %v5036_v16, %v5035_v32 }
 0x4cc   : > { %v5820_v31 = vpack.c.bf16 %v5034_v5, %v5033_v52  ;;  %v5225_v2 = vadd.f32 %v5224_v11, %v5034_v5  ;;  %v6662_v40 = vpop.f32.mrb[196].mxu1 }
 0x4cd   : > { %5859 = vst [vmem:[%s7119_s27 + $0x58] sm:$0xff] %v5825_v45   ;;  %v6774_v12 = vadd.f32 %v8829_v61, %v6662_v40  ;;  %v4943_v21 = vpop.f32.mrb[197].mxu1 }
 0x4ce   : > { %5858 = vst [vmem:[%s7119_s27 + $0x50] sm:$0xff] %v5820_v31   ;;  %v5226_v20 = vadd.f32 %v5225_v2, %v5035_v32  ;;  %v6777_v39 = vadd.f32 %v8823_v59, %v4943_v21  ;;  %v6663_v0 = vpop.f32.mrb[198].mxu1 }
 0x4cf   : > { %v6780_v60 = vadd.f32 %v8832_v27, %v6663_v0  ;;  %v4946_v49 = vpop.f32.mrb[199].mxu1  ;;  %v5039_v3 = vadd.f32 %v6774_v12, %v8850_v62 }
 0x4d0   : > { %v5037_v54 = vadd.f32 %v6777_v39, %v8850_v62  ;;  %v5227_v14 = vadd.f32 %v5226_v20, %v5036_v16  ;;  %v6783_v7 = vadd.f32 %v8826_v55, %v4946_v49 }
 0x4d1   : > { %v5040_v61 = vadd.f32 %v6780_v60, %v8850_v62 }
 0x4d2   : > { %v5228_v24 = vadd.f32 %v5227_v14, %v5037_v54  ;;  %v5038_v63 = vadd.f32 %v6783_v7, %v8850_v62 }
 0x4d3   : > { %v5835_v46 = vpack.c.bf16 %v5040_v61, %v5039_v3 }
 0x4d4   : > { %v5830_v25 = vpack.c.bf16 %v5038_v63, %v5037_v54  ;;  %v5229_v59 = vadd.f32 %v5228_v24, %v5038_v63  ;;  %v6666_v50 = vpop.f32.mrb[200].mxu1 }
 0x4d5   : > { %5861 = vst [vmem:[%s7119_s27 + $0x68] sm:$0xff] %v5835_v46   ;;  %v6786_v27 = vadd.f32 %v8841_v18, %v6666_v50  ;;  %v4959_v10 = vpop.f32.mrb[201].mxu1 }
 0x4d6   : > { %5860 = vst [vmem:[%s7119_s27 + $0x60] sm:$0xff] %v5830_v25   ;;  %v5230_v47 = vadd.f32 %v5229_v59, %v5039_v3  ;;  %v6789_v55 = vadd.f32 %v8835_v28, %v4959_v10  ;;  %v6667_v33 = vpop.f32.mrb[202].mxu1 }
 0x4d7   : > { %v6792_v53 = vadd.f32 %v8844_v8, %v6667_v33  ;;  %v4962_v9 = vpop.f32.mrb[203].mxu1  ;;  %v5043_v48 = vadd.f32 %v6786_v27, %v8850_v62 }
 0x4d8   : > { %v5041_v58 = vadd.f32 %v6789_v55, %v8850_v62  ;;  %v5231_v1 = vadd.f32 %v5230_v47, %v5040_v61  ;;  %v6795_v19 = vadd.f32 %v8838_v22, %v4962_v9 }
 0x4d9   : > { %v5044_v18 = vadd.f32 %v6792_v53, %v8850_v62 }
 0x4da   : > { %v5232_v44 = vadd.f32 %v5231_v1, %v5041_v58  ;;  %v5042_v42 = vadd.f32 %v6795_v19, %v8850_v62 }
 0x4db   : > { %v5845_v36 = vpack.c.bf16 %v5044_v18, %v5043_v48 }
 0x4dc   : > { %v5840_v26 = vpack.c.bf16 %v5042_v42, %v5041_v58  ;;  %v5233_v28 = vadd.f32 %v5232_v44, %v5042_v42 }
 0x4dd   : > { %5863 = vst [vmem:[%s7119_s27 + $0x78] sm:$0xff] %v5845_v36  }
 0x4de   : > { %5862 = vst [vmem:[%s7119_s27 + $0x70] sm:$0xff] %v5840_v26   ;;  %v5234_v8 = vadd.f32 %v5233_v28, %v5043_v48 }
 0x4e0   : > { %v5235_v30 = vadd.f32 %v5234_v8, %v5044_v18 }
 0x4e2   : > { %v5236_v29 = vrot.slane %v5235_v30, 4 }
 0x4e4   : > { %v5237_v6 = vadd.f32 %v5236_v29, %v5235_v30 }
 0x4e6   : > { %v5238_v37 = vrot.slane %v5237_v6, 2 }
 0x4e8   : > { %v5239_v23 = vadd.f32 %v5238_v37, %v5237_v6 }
 0x4ea   : > { %v5240_v22 = vrot.slane %v5239_v23, 1 }
 0x4ec   : > { %v5241_v38 = vadd.f32 %v5240_v22, %v5239_v23 }
 0x4ee   : > { %5242 = vst [vmem:[%s359_s11] sm:$0x1] %v5241_v38 }
 0x4ef PF: > { %s18_s24 = sadd.s32 1, %s7024_s24  }
 0x4f0   : > { %p15_p9 = scmp.ge.s32.totalorder %s18_s24, 6  }
 0x4f2   :  { %17 = sbr.rel (!%p15_p9) target bundleno = 1 (0x1), region = 107 }

</bundles_post_ra>
